<compile_context>
chip_gen: v5e
topology: v5e:2x2
jax: 0.10.0
libtpu: 0.0.40
codegen_flags: <defaults>
</compile_context>

<pallas_src>
import jax
import jax.numpy as jnp
from jax.experimental import pallas as pl
from jax.experimental.pallas import tpu as pltpu

IMAGE_DIM = 28
LATENT_DIM = 20
BATCH_SIZE = 50  # the PyTorch module hard-codes the noise to shape (50, latent_dim)

# logical dims
D_IN = 28 * 28          # 784
H1 = 16 * 16            # 256
H2 = 10 * 10            # 100

# lane-padded dims (multiples of 128)
D_IN_PAD = 896
H2_PAD = 128
LAT_PAD = 128
HEAD_PAD = 2 * LAT_PAD  # 256: mu in lanes [0,128), log_sigma in lanes [128,256)
D_OUT_PAD = 896

# sublane row offsets inside the packed weight slabs
#   256-lane slab (out-width 256): w1 rows [0,896), head rows [896,1024), wd2 rows [1024,1152)
W256_HEAD_ROW = D_IN_PAD                 # 896
W256_WD2_ROW = D_IN_PAD + LAT_PAD        # 1024
W256_ROWS = D_IN_PAD + LAT_PAD + H2_PAD  # 1152
#   128-lane slab (out-width 128): w2 rows [0,256), w3 rows [256,384), wd1 rows [384,512)
W128_W3_ROW = H1                         # 256
W128_WD1_ROW = H1 + H2_PAD               # 384
W128_ROWS = H1 + H2_PAD + LAT_PAD        # 512


# ---------------------------------------------------------------------------
# Kernel
# ---------------------------------------------------------------------------
def wae_kernel(x_ref, eps_ref, w256_ref, w128_ref, wd3_ref, bias_ref,
               head_ref, xhat_ref):
    def mm(h_bf16, w_bf16):
        # bf16 MXU matmul with f32 accumulation
        return jnp.dot(h_bf16, w_bf16, preferred_element_type=jnp.float32)

    def relu_bf16(a_f32):
        # f32 bias/ReLU result, immediately rounded to bf16 (it would be
        # rounded before the next MXU push anyway) -> half the live bytes.
        return jnp.maximum(a_f32, 0.0).astype(jnp.bfloat16)

    x = x_ref[...]                                                   # (Bp, 896) bf16

    # encoder: 896 -> 256 -> 128 -> 128 (ReLU after each; pads are exact zeros)
    h = relu_bf16(mm(x, w256_ref[0:D_IN_PAD, :]) + bias_ref[0:1, :H1])
    h = relu_bf16(mm(h, w128_ref[0:H1, :]) + bias_ref[1:2, :H2_PAD])
    z = relu_bf16(mm(h, w128_ref[W128_W3_ROW:W128_WD1_ROW, :]) + bias_ref[2:3, :LAT_PAD])

    # fused mu || log_sigma head (one MXU push), kept in f32
    head = (mm(z, w256_ref[W256_HEAD_ROW:W256_WD2_ROW, :])
            + bias_ref[3:4, :HEAD_PAD])                              # (Bp, 256) f32
    mu = head[:, :LAT_PAD]                                           # lane-block aligned
    log_sigma = head[:, LAT_PAD:]

    # reparameterization: mu + exp(log_sigma) * eps   (pad lanes: 0 + 1*0 = 0)
    sample = (mu + jnp.exp(log_sigma) * eps_ref[...]).astype(jnp.bfloat16)

    # decoder: 128 -> 128 -> 256 -> 896 (ReLU on first two)
    d = relu_bf16(mm(sample, w128_ref[W128_WD1_ROW:W128_ROWS, :]) + bias_ref[4:5, :H2_PAD])
    d = relu_bf16(mm(d, w256_ref[W256_WD2_ROW:W256_ROWS, :]) + bias_ref[5:6, :H1])
    xhat = mm(d, wd3_ref[...]) + bias_ref[6:7, :]                    # (Bp, 896) f32

    head_ref[...] = head
    xhat_ref[...] = xhat.astype(jnp.bfloat16)


# ---------------------------------------------------------------------------
# Parameters (PyTorch nn.Linear default init, stored as (in, out) / (out,))
# ---------------------------------------------------------------------------
def _init_linear(key, fan_in, fan_out):
    kw, kb = jax.random.split(key)
    bound = 1.0 / jnp.sqrt(jnp.float32(fan_in))
    w = jax.random.uniform(kw, (fan_in, fan_out), jnp.float32, -bound, bound)
    b = jax.random.uniform(kb, (fan_out,), jnp.float32, -bound, bound)
    return w, b


def make_wae_params(key):
    dims = [
        (D_IN, H1),               # encoder L1
        (H1, H2),                 # encoder L2
        (H2, LATENT_DIM),         # encoder L3
        (LATENT_DIM, LATENT_DIM), # mu head
        (LATENT_DIM, LATENT_DIM), # sigma head
        (LATENT_DIM, H2),         # decoder L1
        (H2, H1),                 # decoder L2
        (H1, D_IN),               # decoder L3
    ]
    keys = jax.random.split(key, len(dims))
    return [_init_linear(k, fi, fo) for k, (fi, fo) in zip(keys, dims)]


def prepare_kernel_params(params):
    """Pack weights into 3 bf16 slabs + one f32 bias slab (4 DMAs total)."""
    (w1, b1), (w2, b2), (w3, b3), (wmu, bmu), (wsig, bsig), \
        (wd1, bd1), (wd2, bd2), (wd3, bd3) = params

    def place(slab, w, row0):
        fi, fo = w.shape
        return slab.at[row0:row0 + fi, :fo].set(w.astype(jnp.bfloat16))

    # 256-lane slab: w1 | (mu||log_sigma head) | wd2, stacked along sublanes
    w256 = jnp.zeros((W256_ROWS, HEAD_PAD), jnp.bfloat16)
    w256 = place(w256, w1, 0)
    w256 = w256.at[W256_HEAD_ROW:W256_HEAD_ROW + LATENT_DIM, :LATENT_DIM].set(
        wmu.astype(jnp.bfloat16))
    w256 = w256.at[W256_HEAD_ROW:W256_HEAD_ROW + LATENT_DIM,
                   LAT_PAD:LAT_PAD + LATENT_DIM].set(wsig.astype(jnp.bfloat16))
    w256 = place(w256, wd2, W256_WD2_ROW)

    # 128-lane slab: w2 | w3 | wd1
    w128 = jnp.zeros((W128_ROWS, H2_PAD), jnp.bfloat16)
    w128 = place(w128, w2, 0)
    w128 = place(w128, w3, W128_W3_ROW)
    w128 = place(w128, wd1, W128_WD1_ROW)

    # decoder output layer alone (256 x 896)
    wd3p = jnp.zeros((H1, D_OUT_PAD), jnp.bfloat16).at[:, :D_IN].set(
        wd3.astype(jnp.bfloat16))

    # bias slab: one f32 row per layer (row 7 unused)
    biases = jnp.zeros((8, D_OUT_PAD), jnp.float32)
    biases = biases.at[0, :H1].set(b1)
    biases = biases.at[1, :H2].set(b2)
    biases = biases.at[2, :LATENT_DIM].set(b3)
    biases = biases.at[3, :LATENT_DIM].set(bmu)
    biases = biases.at[3, LAT_PAD:LAT_PAD + LATENT_DIM].set(bsig)
    biases = biases.at[4, :H2].set(bd1)
    biases = biases.at[5, :H1].set(bd2)
    biases = biases.at[6, :D_IN].set(bd3)

    return {"w256": w256, "w128": w128, "wd3": wd3p, "biases": biases}


# ---------------------------------------------------------------------------
# Wrapper
# ---------------------------------------------------------------------------
@jax.jit
def wae_forward(x, eps, kp):
    """x: (B, 1, 28, 28), eps: (B, LATENT_DIM). Returns (mu, log_sigma, x_hat)."""
    b = x.shape[0]
    b_pad = max(16, ((b + 15) // 16) * 16)  # 50 -> 64: bf16-friendly sublane packing

    x_flat = x.reshape(b, D_IN).astype(jnp.bfloat16)
    x_p = jnp.pad(x_flat, ((0, b_pad - b), (0, D_IN_PAD - D_IN)))
    eps_p = jnp.pad(eps.astype(jnp.float32),
                    ((0, b_pad - b), (0, LAT_PAD - LATENT_DIM)))

    vmem = pl.BlockSpec(memory_space=pltpu.MemorySpace.VMEM)

    head, xhat_p = pl.pallas_call(
        wae_kernel,
        out_shape=(
            jax.ShapeDtypeStruct((b_pad, HEAD_PAD), jnp.float32),    # mu||log_sigma
            jax.ShapeDtypeStruct((b_pad, D_OUT_PAD), jnp.bfloat16),  # x_hat (padded)
        ),
        in_specs=[vmem] * 6,
        out_specs=(vmem, vmem),
        cost_estimate=pl.CostEstimate(
            flops=76_000_000,            # ~2 * B_pad * sum(K*N) over the padded layers
            transcendentals=b_pad * LAT_PAD,
            bytes_accessed=1_600_000,    # bf16 weight slabs + activations + outputs
        ),
    )(x_p, eps_p, kp["w256"], kp["w128"], kp["wd3"], kp["biases"])

    mu = head[:b, :LATENT_DIM]
    log_sigma = head[:b, LAT_PAD:LAT_PAD + LATENT_DIM]
    x_hat = xhat_p[:b, :D_IN].astype(jnp.float32)
    return mu, log_sigma, x_hat


# ---------------------------------------------------------------------------
# Pure-JAX reference (unpadded, f32) for correctness checking
# ---------------------------------------------------------------------------
def wae_reference(x, eps, params):
    (w1, b1), (w2, b2), (w3, b3), (wmu, bmu), (wsig, bsig), \
        (wd1, bd1), (wd2, bd2), (wd3, bd3) = params
    h = x.reshape(x.shape[0], D_IN)
    h = jax.nn.relu(h @ w1 + b1)
    h = jax.nn.relu(h @ w2 + b2)
    z = jax.nn.relu(h @ w3 + b3)
    mu = z @ wmu + bmu
    log_sigma = z @ wsig + bsig
    sample = mu + jnp.exp(log_sigma) * eps
    d = jax.nn.relu(sample @ wd1 + bd1)
    d = jax.nn.relu(d @ wd2 + bd2)
    x_hat = d @ wd3 + bd3
    return mu, log_sigma, x_hat


if __name__ == "__main__":
    key = jax.random.PRNGKey(0)
    k_params, k_x, k_eps = jax.random.split(key, 3)

    params = make_wae_params(k_params)
    kernel_params = prepare_kernel_params(params)

    # batch must be 50: the PyTorch module adds noise of shape (50, latent_dim)
    x = jax.random.normal(k_x, (BATCH_SIZE, 1, IMAGE_DIM, IMAGE_DIM), jnp.float32)
    # torch.randn(...) in forward() replaced by a deterministic JAX std-normal sample
    eps = jax.random.normal(k_eps, (BATCH_SIZE, LATENT_DIM), jnp.float32)

    mu_z, log_sigma_z, x_hat = wae_forward(x, eps, kernel_params)
    jax.block_until_ready((mu_z, log_sigma_z, x_hat))

    assert mu_z.shape == (BATCH_SIZE, LATENT_DIM)
    assert log_sigma_z.shape == (BATCH_SIZE, LATENT_DIM)
    assert x_hat.shape == (BATCH_SIZE, D_IN)

    # loose tolerance: weights/activations go through the MXU in bfloat16
    mu_r, ls_r, xh_r = wae_reference(x, eps, params)
    assert jnp.allclose(mu_z, mu_r, atol=5e-2, rtol=5e-2)
    assert jnp.allclose(log_sigma_z, ls_r, atol=5e-2, rtol=5e-2)
    assert jnp.allclose(x_hat, xh_r, atol=5e-2, rtol=5e-2)

    print("KERNEL_OK")
</pallas_src>

<mosaic_0001>
module attributes {stable_mosaic.version = 11 : i64} {
  func.func @wae_kernel(%arg0: memref<64x896xbf16, #tpu.memory_space<vmem>>, %arg1: memref<64x128xf32, #tpu.memory_space<vmem>>, %arg2: memref<1152x256xbf16, #tpu.memory_space<vmem>>, %arg3: memref<512x128xbf16, #tpu.memory_space<vmem>>, %arg4: memref<256x896xbf16, #tpu.memory_space<vmem>>, %arg5: memref<8x896xf32, #tpu.memory_space<vmem>>, %arg6: memref<64x256xf32, #tpu.memory_space<vmem>>, %arg7: memref<64x896xbf16, #tpu.memory_space<vmem>>) attributes {dimension_semantics = [], scalar_prefetch = 0 : i64, scratch_operands = 0 : i64, tpu.core_type = #tpu.core_type<tc>} {
    %c0 = arith.constant 0 : index
    %c0_0 = arith.constant 0 : index
    %0 = vector.load %arg0[%c0, %c0_0] : memref<64x896xbf16, #tpu.memory_space<vmem>>, vector<64x896xbf16>
    %c0_1 = arith.constant 0 : index
    %c0_2 = arith.constant 0 : index
    %1 = vector.load %arg2[%c0_1, %c0_2] : memref<1152x256xbf16, #tpu.memory_space<vmem>>, vector<896x256xbf16>
    %cst = arith.constant dense<0.000000e+00> : vector<64x256xf32>
    %2 = tpu.matmul %0, %1, %cst {dimension_numbers = #tpu.dot_dimension_numbers<[1], [0], [0], [1], [0, 0, 1, 1], [], []>} : vector<64x896xbf16>, vector<896x256xbf16>, vector<64x256xf32> -> vector<64x256xf32>
    %c0_3 = arith.constant 0 : index
    %c0_4 = arith.constant 0 : index
    %3 = vector.load %arg5[%c0_3, %c0_4] : memref<8x896xf32, #tpu.memory_space<vmem>>, vector<1x256xf32>
    %4 = vector.broadcast %3 : vector<1x256xf32> to vector<64x256xf32>
    %5 = arith.addf %2, %4 : vector<64x256xf32>
    %cst_5 = arith.constant 0.000000e+00 : f32
    %6 = vector.broadcast %cst_5 : f32 to vector<64x256xf32>
    %7 = arith.maximumf %5, %6 : vector<64x256xf32>
    %8 = arith.truncf %7 : vector<64x256xf32> to vector<64x256xbf16>
    %c0_6 = arith.constant 0 : index
    %c0_7 = arith.constant 0 : index
    %9 = vector.load %arg3[%c0_6, %c0_7] : memref<512x128xbf16, #tpu.memory_space<vmem>>, vector<256x128xbf16>
    %cst_8 = arith.constant dense<0.000000e+00> : vector<64x128xf32>
    %10 = tpu.matmul %8, %9, %cst_8 {dimension_numbers = #tpu.dot_dimension_numbers<[1], [0], [0], [1], [0, 0, 1, 1], [], []>} : vector<64x256xbf16>, vector<256x128xbf16>, vector<64x128xf32> -> vector<64x128xf32>
    %c1 = arith.constant 1 : index
    %c0_9 = arith.constant 0 : index
    %11 = vector.load %arg5[%c1, %c0_9] : memref<8x896xf32, #tpu.memory_space<vmem>>, vector<1x128xf32>
    %12 = vector.broadcast %11 : vector<1x128xf32> to vector<64x128xf32>
    %13 = arith.addf %10, %12 : vector<64x128xf32>
    %cst_10 = arith.constant 0.000000e+00 : f32
    %14 = vector.broadcast %cst_10 : f32 to vector<64x128xf32>
    %15 = arith.maximumf %13, %14 : vector<64x128xf32>
    %16 = arith.truncf %15 : vector<64x128xf32> to vector<64x128xbf16>
    %c256 = arith.constant 256 : index
    %c0_11 = arith.constant 0 : index
    %17 = vector.load %arg3[%c256, %c0_11] : memref<512x128xbf16, #tpu.memory_space<vmem>>, vector<128x128xbf16>
    %cst_12 = arith.constant dense<0.000000e+00> : vector<64x128xf32>
    %18 = tpu.matmul %16, %17, %cst_12 {dimension_numbers = #tpu.dot_dimension_numbers<[1], [0], [0], [1], [0, 0, 1, 1], [], []>} : vector<64x128xbf16>, vector<128x128xbf16>, vector<64x128xf32> -> vector<64x128xf32>
    %c2 = arith.constant 2 : index
    %c0_13 = arith.constant 0 : index
    %19 = vector.load %arg5[%c2, %c0_13] : memref<8x896xf32, #tpu.memory_space<vmem>>, vector<1x128xf32>
    %20 = vector.broadcast %19 : vector<1x128xf32> to vector<64x128xf32>
    %21 = arith.addf %18, %20 : vector<64x128xf32>
    %cst_14 = arith.constant 0.000000e+00 : f32
    %22 = vector.broadcast %cst_14 : f32 to vector<64x128xf32>
    %23 = arith.maximumf %21, %22 : vector<64x128xf32>
    %24 = arith.truncf %23 : vector<64x128xf32> to vector<64x128xbf16>
    %c896 = arith.constant 896 : index
    %c0_15 = arith.constant 0 : index
    %25 = vector.load %arg2[%c896, %c0_15] : memref<1152x256xbf16, #tpu.memory_space<vmem>>, vector<128x256xbf16>
    %cst_16 = arith.constant dense<0.000000e+00> : vector<64x256xf32>
    %26 = tpu.matmul %24, %25, %cst_16 {dimension_numbers = #tpu.dot_dimension_numbers<[1], [0], [0], [1], [0, 0, 1, 1], [], []>} : vector<64x128xbf16>, vector<128x256xbf16>, vector<64x256xf32> -> vector<64x256xf32>
    %c3 = arith.constant 3 : index
    %c0_17 = arith.constant 0 : index
    %27 = vector.load %arg5[%c3, %c0_17] : memref<8x896xf32, #tpu.memory_space<vmem>>, vector<1x256xf32>
    %28 = vector.broadcast %27 : vector<1x256xf32> to vector<64x256xf32>
    %29 = arith.addf %26, %28 : vector<64x256xf32>
    %30 = vector.extract_strided_slice %29 {offsets = [0, 0], sizes = [64, 128], strides = [1, 1]} : vector<64x256xf32> to vector<64x128xf32>
    %31 = vector.extract_strided_slice %29 {offsets = [0, 128], sizes = [64, 128], strides = [1, 1]} : vector<64x256xf32> to vector<64x128xf32>
    %32 = math.exp %31 : vector<64x128xf32>
    %c0_18 = arith.constant 0 : index
    %c0_19 = arith.constant 0 : index
    %33 = vector.load %arg1[%c0_18, %c0_19] : memref<64x128xf32, #tpu.memory_space<vmem>>, vector<64x128xf32>
    %34 = arith.mulf %32, %33 : vector<64x128xf32>
    %35 = arith.addf %30, %34 : vector<64x128xf32>
    %36 = arith.truncf %35 : vector<64x128xf32> to vector<64x128xbf16>
    %c384 = arith.constant 384 : index
    %c0_20 = arith.constant 0 : index
    %37 = vector.load %arg3[%c384, %c0_20] : memref<512x128xbf16, #tpu.memory_space<vmem>>, vector<128x128xbf16>
    %cst_21 = arith.constant dense<0.000000e+00> : vector<64x128xf32>
    %38 = tpu.matmul %36, %37, %cst_21 {dimension_numbers = #tpu.dot_dimension_numbers<[1], [0], [0], [1], [0, 0, 1, 1], [], []>} : vector<64x128xbf16>, vector<128x128xbf16>, vector<64x128xf32> -> vector<64x128xf32>
    %c4 = arith.constant 4 : index
    %c0_22 = arith.constant 0 : index
    %39 = vector.load %arg5[%c4, %c0_22] : memref<8x896xf32, #tpu.memory_space<vmem>>, vector<1x128xf32>
    %40 = vector.broadcast %39 : vector<1x128xf32> to vector<64x128xf32>
    %41 = arith.addf %38, %40 : vector<64x128xf32>
    %cst_23 = arith.constant 0.000000e+00 : f32
    %42 = vector.broadcast %cst_23 : f32 to vector<64x128xf32>
    %43 = arith.maximumf %41, %42 : vector<64x128xf32>
    %44 = arith.truncf %43 : vector<64x128xf32> to vector<64x128xbf16>
    %c1024 = arith.constant 1024 : index
    %c0_24 = arith.constant 0 : index
    %45 = vector.load %arg2[%c1024, %c0_24] : memref<1152x256xbf16, #tpu.memory_space<vmem>>, vector<128x256xbf16>
    %cst_25 = arith.constant dense<0.000000e+00> : vector<64x256xf32>
    %46 = tpu.matmul %44, %45, %cst_25 {dimension_numbers = #tpu.dot_dimension_numbers<[1], [0], [0], [1], [0, 0, 1, 1], [], []>} : vector<64x128xbf16>, vector<128x256xbf16>, vector<64x256xf32> -> vector<64x256xf32>
    %c5 = arith.constant 5 : index
    %c0_26 = arith.constant 0 : index
    %47 = vector.load %arg5[%c5, %c0_26] : memref<8x896xf32, #tpu.memory_space<vmem>>, vector<1x256xf32>
    %48 = vector.broadcast %47 : vector<1x256xf32> to vector<64x256xf32>
    %49 = arith.addf %46, %48 : vector<64x256xf32>
    %cst_27 = arith.constant 0.000000e+00 : f32
    %50 = vector.broadcast %cst_27 : f32 to vector<64x256xf32>
    %51 = arith.maximumf %49, %50 : vector<64x256xf32>
    %52 = arith.truncf %51 : vector<64x256xf32> to vector<64x256xbf16>
    %c0_28 = arith.constant 0 : index
    %c0_29 = arith.constant 0 : index
    %53 = vector.load %arg4[%c0_28, %c0_29] : memref<256x896xbf16, #tpu.memory_space<vmem>>, vector<256x896xbf16>
    %cst_30 = arith.constant dense<0.000000e+00> : vector<64x896xf32>
    %54 = tpu.matmul %52, %53, %cst_30 {dimension_numbers = #tpu.dot_dimension_numbers<[1], [0], [0], [1], [0, 0, 1, 1], [], []>} : vector<64x256xbf16>, vector<256x896xbf16>, vector<64x896xf32> -> vector<64x896xf32>
    %c6 = arith.constant 6 : index
    %c0_31 = arith.constant 0 : index
    %55 = vector.load %arg5[%c6, %c0_31] : memref<8x896xf32, #tpu.memory_space<vmem>>, vector<1x896xf32>
    %56 = vector.broadcast %55 : vector<1x896xf32> to vector<64x896xf32>
    %57 = arith.addf %54, %56 : vector<64x896xf32>
    %c0_32 = arith.constant 0 : index
    %c0_33 = arith.constant 0 : index
    %58 = vector.load %arg6[%c0_32, %c0_33] : memref<64x256xf32, #tpu.memory_space<vmem>>, vector<64x256xf32>
    tpu.vector_store %arg6[%c0_32, %c0_33], %29 {strides = array<i32>} : memref<64x256xf32, #tpu.memory_space<vmem>>, vector<64x256xf32>,
    %59 = arith.truncf %57 : vector<64x896xf32> to vector<64x896xbf16>
    %c0_34 = arith.constant 0 : index
    %c0_35 = arith.constant 0 : index
    %60 = vector.load %arg7[%c0_34, %c0_35] : memref<64x896xbf16, #tpu.memory_space<vmem>>, vector<64x896xbf16>
    tpu.vector_store %arg7[%c0_34, %c0_35], %59 {strides = array<i32>} : memref<64x896xbf16, #tpu.memory_space<vmem>>, vector<64x896xbf16>,
    return
  }
}

</mosaic_0001>

<bundles_post_ra>
// kernel: wae_forward.1
= control target key start
LH: loop header
LB: loop body
LE: loop exit
PB: predicated region body
PF: predicated region fallthrough
CT: control target
= control target key end

     0   :  { %s7391_s2 = inlined_call_operand.vmem [shape: bf16[1152,256], index: 2, kind: input, shape index: {}]   ;;  %s7392_s0 = inlined_call_operand.vmem [shape: bf16[64,896], index: 0, kind: input, shape index: {}]   ;;  %s7393_s5 = inlined_call_operand.vmem [shape: f32[8,896], index: 5, kind: input, shape index: {}]   ;;  %s7394_s3 = inlined_call_operand.vmem [shape: bf16[512,128], index: 3, kind: input, shape index: {}]   ;;  %s7395_s6 = inlined_call_operand.vmem [shape: f32[64,256], index: 6, kind: output, shape index: {0}]   ;;  %s7396_s1 = inlined_call_operand.vmem [shape: f32[64,128], index: 1, kind: input, shape index: {}]   ;;  %s7397_s4 = inlined_call_operand.vmem [shape: bf16[256,896], index: 4, kind: input, shape index: {}]   ;;  %s7398_s7 = inlined_call_operand.vmem [shape: bf16[64,896], index: 7, kind: output, shape index: {1}]  }
   0x1   :  { %v3497_v0 = vld [vmem:[%s7391_s2 + $0x70] sm:$0xf]  ;;  %v4638_v1 = vld [vmem:[%s7391_s2 + $0x74] sm:$0xf0]  ;;  %v3489_v11 = vld [vmem:[%s7391_s2 + $0x60] sm:$0xf] }
   0x2   :  { %v3561_v2 = vld [vmem:[%s7391_s2 + $0xf0] sm:$0xf]  ;;  %v3498_v3 = vor.u32 %v4638_v1, %v3497_v0  ;;  %v4654_v4 = vld [vmem:[%s7391_s2 + $0xf4] sm:$0xf0]  ;;  %v4636_v13 = vld [vmem:[%s7391_s2 + $0x64] sm:$0xf0] }
   0x3   :  { %v3625_v5 = vld [vmem:[%s7391_s2 + $0x170] sm:$0xf]  ;;  %v4670_v6 = vld [vmem:[%s7391_s2 + $0x174] sm:$0xf0]  ;;  %v3562_v7 = vor.u32 %v4654_v4, %v3561_v2  ;;  %v3553_v14 = vld [vmem:[%s7391_s2 + $0xe0] sm:$0xf]  ;;  %v3490_v16 = vor.u32 %v4636_v13, %v3489_v11 }
   0x4   :  { %v3626_v8 = vor.u32 %v4670_v6, %v3625_v5  ;;  %v3689_v9 = vld [vmem:[%s7391_s2 + $0x1f0] sm:$0xf]  ;;  %v4686_v10 = vld [vmem:[%s7391_s2 + $0x1f4] sm:$0xf0]  ;;  %879 = vmatpush.bf16.msra.mxu0 %v3498_v3  ;;  %v4652_v15 = vld [vmem:[%s7391_s2 + $0xe4] sm:$0xf0] }
   0x5   :  { %v3690_v12 = vor.u32 %v4686_v10, %v3689_v9  ;;  %908 = vmatpush.bf16.msra.mxu1 %v3562_v7  ;;  %v3554_v17 = vor.u32 %v4652_v15, %v3553_v14  ;;  %v3617_v18 = vld [vmem:[%s7391_s2 + $0x160] sm:$0xf]  ;;  %v4668_v19 = vld [vmem:[%s7391_s2 + $0x164] sm:$0xf0]  ;;  %v3481_v23 = vld [vmem:[%s7391_s2 + $0x50] sm:$0xf] }
   0x6   :  { %937 = vmatpush.bf16.msra.mxu2 %v3626_v8  ;;  %v3681_v20 = vld [vmem:[%s7391_s2 + $0x1e0] sm:$0xf]  ;;  %v3618_v21 = vor.u32 %v4668_v19, %v3617_v18  ;;  %v4684_v22 = vld [vmem:[%s7391_s2 + $0x1e4] sm:$0xf0]  ;;  %v4634_v24 = vld [vmem:[%s7391_s2 + $0x54] sm:$0xf0] }
   0x7   :  { %966 = vmatpush.bf16.msra.mxu3 %v3690_v12  ;;  %v3682_v25 = vor.u32 %v4684_v22, %v3681_v20  ;;  %v3545_v26 = vld [vmem:[%s7391_s2 + $0xd0] sm:$0xf]  ;;  %v4650_v27 = vld [vmem:[%s7391_s2 + $0xd4] sm:$0xf0]  ;;  %v3482_v29 = vor.u32 %v4634_v24, %v3481_v23  ;;  %v3473_v35 = vld [vmem:[%s7391_s2 + $0x40] sm:$0xf] }
   0x8   :  { %v3609_v28 = vld [vmem:[%s7391_s2 + $0x150] sm:$0xf]  ;;  %880 = vmatpush.bf16.msra.mxu0 %v3490_v16  ;;  %v4666_v30 = vld [vmem:[%s7391_s2 + $0x154] sm:$0xf0]  ;;  %v3546_v33 = vor.u32 %v4650_v27, %v3545_v26  ;;  %v4632_v36 = vld [vmem:[%s7391_s2 + $0x44] sm:$0xf0] }
   0x9   :  { %v3673_v31 = vld [vmem:[%s7391_s2 + $0x1d0] sm:$0xf]  ;;  %v4682_v32 = vld [vmem:[%s7391_s2 + $0x1d4] sm:$0xf0]  ;;  %909 = vmatpush.bf16.msra.mxu1 %v3554_v17  ;;  %v3610_v34 = vor.u32 %v4666_v30, %v3609_v28  ;;  %v3537_v37 = vld [vmem:[%s7391_s2 + $0xc0] sm:$0xf]  ;;  %v3474_v44 = vor.u32 %v4632_v36, %v3473_v35 }
   0xa   :  { %938 = vmatpush.bf16.msra.mxu2 %v3618_v21  ;;  %v3674_v38 = vor.u32 %v4682_v32, %v3673_v31  ;;  %v4648_v39 = vld [vmem:[%s7391_s2 + $0xc4] sm:$0xf0]  ;;  %v3601_v40 = vld [vmem:[%s7391_s2 + $0x140] sm:$0xf]  ;;  %v3465_v47 = vld [vmem:[%s7391_s2 + $0x30] sm:$0xf] }
   0xb   :  { %967 = vmatpush.bf16.msra.mxu3 %v3682_v25  ;;  %v4664_v41 = vld [vmem:[%s7391_s2 + $0x144] sm:$0xf0]  ;;  %v3665_v42 = vld [vmem:[%s7391_s2 + $0x1c0] sm:$0xf]  ;;  %v3538_v45 = vor.u32 %v4648_v39, %v3537_v37  ;;  %v4630_v48 = vld [vmem:[%s7391_s2 + $0x34] sm:$0xf0] }
   0xc   :  { %v4680_v43 = vld [vmem:[%s7391_s2 + $0x1c4] sm:$0xf0]  ;;  %881 = vmatpush.bf16.msra.mxu0 %v3482_v29  ;;  %v3602_v46 = vor.u32 %v4664_v41, %v3601_v40  ;;  %v3529_v49 = vld [vmem:[%s7391_s2 + $0xb0] sm:$0xf]  ;;  %v4646_v51 = vld [vmem:[%s7391_s2 + $0xb4] sm:$0xf0]  ;;  %v3466_v56 = vor.u32 %v4630_v48, %v3465_v47 }
   0xd   :  { %910 = vmatpush.bf16.msra.mxu1 %v3546_v33  ;;  %v3666_v50 = vor.u32 %v4680_v43, %v3665_v42  ;;  %v3593_v52 = vld [vmem:[%s7391_s2 + $0x130] sm:$0xf]  ;;  %v4662_v53 = vld [vmem:[%s7391_s2 + $0x134] sm:$0xf0]  ;;  %v3530_v57 = vor.u32 %v4646_v51, %v3529_v49  ;;  %v3457_v59 = vld [vmem:[%s7391_s2 + $0x20] sm:$0xf] }
   0xe   :  { %939 = vmatpush.bf16.msra.mxu2 %v3610_v34  ;;  %v3657_v54 = vld [vmem:[%s7391_s2 + $0x1b0] sm:$0xf]  ;;  %v4678_v55 = vld [vmem:[%s7391_s2 + $0x1b4] sm:$0xf0]  ;;  %v3594_v58 = vor.u32 %v4662_v53, %v3593_v52  ;;  %v4628_v60 = vld [vmem:[%s7391_s2 + $0x24] sm:$0xf0] }
   0xf   :  { %968 = vmatpush.bf16.msra.mxu3 %v3674_v38  ;;  %v3521_v61 = vld [vmem:[%s7391_s2 + $0xa0] sm:$0xf]  ;;  %v3658_v62 = vor.u32 %v4678_v55, %v3657_v54  ;;  %v4644_v63 = vld [vmem:[%s7391_s2 + $0xa4] sm:$0xf0]  ;;  %v3458_v4 = vor.u32 %v4628_v60, %v3457_v59  ;;  %v3449_v7 = vld [vmem:[%s7391_s2 + $0x10] sm:$0xf] }
  0x10   :  { %882 = vmatpush.bf16.msra.mxu0 %v3474_v44  ;;  %v3585_v0 = vld [vmem:[%s7391_s2 + $0x120] sm:$0xf]  ;;  %v4660_v1 = vld [vmem:[%s7391_s2 + $0x124] sm:$0xf0]  ;;  %v3522_v5 = vor.u32 %v4644_v63, %v3521_v61  ;;  %v4626_v8 = vld [vmem:[%s7391_s2 + $0x14] sm:$0xf0] }
  0x11   :  { %911 = vmatpush.bf16.msra.mxu1 %v3538_v45  ;;  %v3649_v2 = vld [vmem:[%s7391_s2 + $0x1a0] sm:$0xf]  ;;  %v4676_v3 = vld [vmem:[%s7391_s2 + $0x1a4] sm:$0xf0]  ;;  %v3586_v6 = vor.u32 %v4660_v1, %v3585_v0  ;;  %v3513_v9 = vld [vmem:[%s7391_s2 + $0x90] sm:$0xf]  ;;  %v3450_v16 = vor.u32 %v4626_v8, %v3449_v7 }
  0x12   :  { %940 = vmatpush.bf16.msra.mxu2 %v3602_v46  ;;  %v3650_v10 = vor.u32 %v4676_v3, %v3649_v2  ;;  %v4642_v11 = vld [vmem:[%s7391_s2 + $0x94] sm:$0xf0]  ;;  %v3577_v12 = vld [vmem:[%s7391_s2 + $0x110] sm:$0xf]  ;;  %v3441_v17 = vld [vmem:[%s7391_s2] sm:$0xf] }
  0x13   :  { %969 = vmatpush.bf16.msra.mxu3 %v3666_v50  ;;  %v4658_v13 = vld [vmem:[%s7391_s2 + $0x114] sm:$0xf0]  ;;  %v3641_v14 = vld [vmem:[%s7391_s2 + $0x190] sm:$0xf]  ;;  %v4624_v18 = vld [vmem:[%s7391_s2 + $0x4] sm:$0xf0]  ;;  %v3514_v20 = vor.u32 %v4642_v11, %v3513_v9 }
  0x14   :  { %883 = vmatpush.bf16.msra.mxu0 %v3466_v56  ;;  %v4674_v15 = vld [vmem:[%s7391_s2 + $0x194] sm:$0xf0]  ;;  %v3505_v19 = vld [vmem:[%s7391_s2 + $0x80] sm:$0xf]  ;;  %v3578_v21 = vor.u32 %v4658_v13, %v3577_v12  ;;  %v4640_v22 = vld [vmem:[%s7391_s2 + $0x84] sm:$0xf0]  ;;  %v3442_v32 = vor.u32 %v4624_v18, %v3441_v17 }
  0x15   :  { %912 = vmatpush.bf16.msra.mxu1 %v3530_v57  ;;  %v3569_v23 = vld [vmem:[%s7391_s2 + $0x100] sm:$0xf]  ;;  %v4656_v24 = vld [vmem:[%s7391_s2 + $0x104] sm:$0xf0]  ;;  %v3642_v25 = vor.u32 %v4674_v15, %v3641_v14  ;;  %v4598_v29 = vld [vmem:[%s7392_s0 + $0x18] sm:$0xf0]  ;;  %v3506_v36 = vor.u32 %v4640_v22, %v3505_v19 }
  0x16   :  { %941 = vmatpush.bf16.msra.mxu2 %v3594_v58  ;;  %v3633_v26 = vld [vmem:[%s7391_s2 + $0x180] sm:$0xf]  ;;  %v4672_v27 = vld [vmem:[%s7391_s2 + $0x184] sm:$0xf0]  ;;  %v3753_v30 = vld [vmem:[%s7391_s2 + $0x270] sm:$0xf]  ;;  %v3570_v37 = vor.u32 %v4656_v24, %v3569_v23 }
  0x17   :  { %970 = vmatpush.bf16.msra.mxu3 %v3658_v62  ;;  %v3329_v28 = vld [vmem:[%s7392_s0] sm:$0xf]  ;;  %v4702_v31 = vld [vmem:[%s7391_s2 + $0x274] sm:$0xf0]  ;;  %v4595_v33 = vld [vmem:[%s7392_s0 + $0x4] sm:$0xf]  ;;  %v3634_v41 = vor.u32 %v4672_v27, %v3633_v26 }
  0x18   :  { %884 = vmatpush.bf16.msra.mxu0 %v3458_v4  ;;  %v3817_v34 = vld [vmem:[%s7391_s2 + $0x2f0] sm:$0xf]  ;;  %v4718_v35 = vld [vmem:[%s7391_s2 + $0x2f4] sm:$0xf0]  ;;  %v3331_v38 = vld [vmem:[%s7392_s0 + $0x1c] sm:$0xf0]  ;;  %v3754_v42 = vor.u32 %v4702_v31, %v3753_v30  ;;  %v5195_v45 = vor.u32 %v4598_v29, %v3329_v28 }
  0x19   :  { %913 = vmatpush.bf16.msra.mxu1 %v3522_v5  ;;  %v3337_v39 = vld [vmem:[%s7392_s0 + $0x8] sm:$0xf]  ;;  %v4599_v40 = vld [vmem:[%s7392_s0 + $0x20] sm:$0xf0]  ;;  %v4596_v43 = vld [vmem:[%s7392_s0 + $0xc] sm:$0xf]  ;;  %v3818_v46 = vor.u32 %v4718_v35, %v3817_v34  ;;  %v5203_v49 = vor.u32 %v4595_v33, %v3331_v38 }
  0x1a   :  { %942 = vmatpush.bf16.msra.mxu2 %v3586_v6  ;;  %v3339_v44 = vld [vmem:[%s7392_s0 + $0x24] sm:$0xf0]  ;;  %v3745_v47 = vld [vmem:[%s7391_s2 + $0x260] sm:$0xf]  ;;  %v5205_v50 = vor.u32 %v4599_v40, %v3337_v39  ;;  %v3737_v55 = vld [vmem:[%s7391_s2 + $0x250] sm:$0xf] }
  0x1b   :  { %971 = vmatpush.bf16.msra.mxu3 %v3650_v10  ;;  %v4700_v48 = vld [vmem:[%s7391_s2 + $0x264] sm:$0xf0]  ;;  %v3809_v51 = vld [vmem:[%s7391_s2 + $0x2e0] sm:$0xf]  ;;  %v5213_v53 = vor.u32 %v4596_v43, %v3339_v44  ;;  %v4698_v57 = vld [vmem:[%s7391_s2 + $0x254] sm:$0xf0] }
  0x1c   :  { %885 = vmatpush.bf16.msra.mxu0 %v3450_v16  ;;  %v4716_v52 = vld [vmem:[%s7391_s2 + $0x2e4] sm:$0xf0]  ;;  %v3746_v54 = vor.u32 %v4700_v48, %v3745_v47  ;;  %v3881_v58 = vld [vmem:[%s7391_s2 + $0x370] sm:$0xf]  ;;  %v4734_v59 = vld [vmem:[%s7391_s2 + $0x374] sm:$0xf0]  ;;  %v3738_v2 = vor.u32 %v4698_v57, %v3737_v55 }
  0x1d   :  { %914 = vmatpush.bf16.msra.mxu1 %v3514_v20  ;;  %v3810_v56 = vor.u32 %v4716_v52, %v3809_v51  ;;  %v3801_v60 = vld [vmem:[%s7391_s2 + $0x2d0] sm:$0xf]  ;;  %v4714_v61 = vld [vmem:[%s7391_s2 + $0x2d4] sm:$0xf0]  ;;  %v3882_v62 = vor.u32 %v4734_v59, %v3881_v58  ;;  %v3729_v63 = vld [vmem:[%s7391_s2 + $0x240] sm:$0xf] }
  0x1e   :  { %943 = vmatpush.bf16.msra.mxu2 %v3578_v21  ;;  %v4696_v0 = vld [vmem:[%s7391_s2 + $0x244] sm:$0xf0]  ;;  %v4637_v1 = vld [vmem:[%s7391_s2 + $0x74] sm:$0xf]  ;;  %v3499_v3 = vld [vmem:[%s7391_s2 + $0x78] sm:$0xf0]  ;;  %v3802_v6 = vor.u32 %v4714_v61, %v3801_v60 }
  0x1f   :  { %972 = vmatpush.bf16.msra.mxu3 %v3642_v25  ;;  %v3873_v4 = vld [vmem:[%s7391_s2 + $0x360] sm:$0xf]  ;;  %v4732_v5 = vld [vmem:[%s7391_s2 + $0x364] sm:$0xf0]  ;;  %v3502_v8 = vor.u32 %v4637_v1, %v3499_v3  ;;  %v4635_v10 = vld [vmem:[%s7391_s2 + $0x64] sm:$0xf]  ;;  %v3730_v18 = vor.u32 %v4696_v0, %v3729_v63 }
  0x20   :  { %886 = vmatpush.bf16.msra.mxu0 %v3442_v32  ;;  %v3793_v7 = vld [vmem:[%s7391_s2 + $0x2c0] sm:$0xf]  ;;  %v3874_v9 = vor.u32 %v4732_v5, %v3873_v4  ;;  %v3491_v11 = vld [vmem:[%s7391_s2 + $0x68] sm:$0xf0]  ;;  %v4712_v12 = vld [vmem:[%s7391_s2 + $0x2c4] sm:$0xf0] }
  0x21   :  { %915 = vmatpush.bf16.msra.mxu1 %v3506_v36  ;;  %v3865_v13 = vld [vmem:[%s7391_s2 + $0x350] sm:$0xf]  ;;  %v4730_v14 = vld [vmem:[%s7391_s2 + $0x354] sm:$0xf0]  ;;  %v3494_v15 = vor.u32 %v4635_v10, %v3491_v11  ;;  %v4605_v17 = vld [vmem:[%s7392_s0 + $0x50] sm:$0xf0]  ;;  %v3794_v23 = vor.u32 %v4712_v12, %v3793_v7 }
  0x22   :  { %944 = vmatpush.bf16.msra.mxu2 %v3570_v37  ;;  %v3357_v16 = vld [vmem:[%s7392_s0 + $0x38] sm:$0xf]  ;;  %v3721_v19 = vld [vmem:[%s7391_s2 + $0x230] sm:$0xf]  ;;  %v3866_v20 = vor.u32 %v4730_v14, %v3865_v13  ;;  %v4633_v21 = vld [vmem:[%s7391_s2 + $0x54] sm:$0xf] }
  0x23   :  { %973 = vmatpush.bf16.msra.mxu3 %v3634_v41  ;;  %887 = vmatmul.bf16.vlgmr.msra.gmra.mxu0 %v5195_v45  ;;  %v3483_v22 = vld [vmem:[%s7391_s2 + $0x58] sm:$0xf0]  ;;  %v4694_v24 = vld [vmem:[%s7391_s2 + $0x234] sm:$0xf0]  ;;  %v3857_v25 = vld [vmem:[%s7391_s2 + $0x340] sm:$0xf]  ;;  %v5324_v39 = vor.u32 %v4605_v17, %v3357_v16 }
  0x24   :  { %995 = vmatpush.bf16.msrb.mxu0 %v3754_v42  ;;  %916 = vmatmul.bf16.vlgmr.msra.gmra.mxu1 %v5203_v49  ;;  %v4728_v26 = vld [vmem:[%s7391_s2 + $0x344] sm:$0xf0]  ;;  %v4602_v27 = vld [vmem:[%s7392_s0 + $0x3c] sm:$0xf]  ;;  %v3785_v28 = vld [vmem:[%s7391_s2 + $0x2b0] sm:$0xf]  ;;  %v3486_v33 = vor.u32 %v4633_v21, %v3483_v22  ;;  %v3722_v36 = vor.u32 %v4694_v24, %v3721_v19 }
  0x25   :  { %1024 = vmatpush.bf16.msrb.mxu1 %v3818_v46  ;;  %945 = vmatmul.bf16.vlgmr.msra.gmra.mxu2 %v5205_v50  ;;  %v4710_v29 = vld [vmem:[%s7391_s2 + $0x2b4] sm:$0xf0]  ;;  %v3365_v31 = vld [vmem:[%s7392_s0 + $0x40] sm:$0xf]  ;;  %v4606_v32 = vld [vmem:[%s7392_s0 + $0x58] sm:$0xf0]  ;;  %v3858_v38 = vor.u32 %v4728_v26, %v3857_v25 }
  0x26   :  { %974 = vmatmul.bf16.vlgmr.msra.gmra.mxu3 %v5213_v53  ;;  %1053 = vmatpush.bf16.msrb.mxu2 %v3882_v62  ;;  %v3359_v30 = vld [vmem:[%s7392_s0 + $0x54] sm:$0xf0]  ;;  %v4603_v34 = vld [vmem:[%s7392_s0 + $0x44] sm:$0xf]  ;;  %v3367_v35 = vld [vmem:[%s7392_s0 + $0x5c] sm:$0xf0]  ;;  %v3786_v40 = vor.u32 %v4710_v29, %v3785_v28  ;;  %v5337_v46 = vor.u32 %v4606_v32, %v3365_v31 }
  0x27   :  { %1082 = vmatpush.bf16.msrb.mxu3 %v3502_v8  ;;  %v3713_v37 = vld [vmem:[%s7391_s2 + $0x220] sm:$0xf]  ;;  %v4692_v41 = vld [vmem:[%s7391_s2 + $0x224] sm:$0xf0]  ;;  %v4631_v42 = vld [vmem:[%s7391_s2 + $0x44] sm:$0xf]  ;;  %v5335_v44 = vor.u32 %v4602_v27, %v3359_v30  ;;  %v5345_v51 = vor.u32 %v4603_v34, %v3367_v35 }
  0x28   :  { %996 = vmatpush.bf16.msrb.mxu0 %v3746_v54  ;;  %v3475_v43 = vld [vmem:[%s7391_s2 + $0x48] sm:$0xf0]  ;;  %v3777_v47 = vld [vmem:[%s7391_s2 + $0x2a0] sm:$0xf]  ;;  %v4708_v48 = vld [vmem:[%s7391_s2 + $0x2a4] sm:$0xf0]  ;;  %v3714_v52 = vor.u32 %v4692_v41, %v3713_v37 }
  0x29   :  { %1025 = vmatpush.bf16.msrb.mxu1 %v3810_v56  ;;  %v3478_v54 = vor.u32 %v4631_v42, %v3475_v43  ;;  %v3849_v55 = vld [vmem:[%s7391_s2 + $0x330] sm:$0xf]  ;;  %v4726_v56 = vld [vmem:[%s7391_s2 + $0x334] sm:$0xf0]  ;;  %v3778_v57 = vor.u32 %v4708_v48, %v3777_v47  ;;  %v4629_v61 = vld [vmem:[%s7391_s2 + $0x34] sm:$0xf] }
  0x2a   :  { %1054 = vmatpush.bf16.msrb.mxu2 %v3874_v9  ;;  %v3850_v58 = vor.u32 %v4726_v56, %v3849_v55  ;;  %v3705_v59 = vld [vmem:[%s7391_s2 + $0x210] sm:$0xf]  ;;  %v4690_v60 = vld [vmem:[%s7391_s2 + $0x214] sm:$0xf0]  ;;  %v3467_v0 = vld [vmem:[%s7391_s2 + $0x38] sm:$0xf0] }
  0x2b   :  { %1083 = vmatpush.bf16.msrb.mxu3 %v3494_v15  ;;  %v3769_v62 = vld [vmem:[%s7391_s2 + $0x290] sm:$0xf]  ;;  %v4706_v63 = vld [vmem:[%s7391_s2 + $0x294] sm:$0xf0]  ;;  %v3706_v1 = vor.u32 %v4690_v60, %v3705_v59  ;;  %v3841_v3 = vld [vmem:[%s7391_s2 + $0x320] sm:$0xf] }
  0x2c   :  { %997 = vmatpush.bf16.msrb.mxu0 %v3738_v2  ;;  %v3470_v2 = vor.u32 %v4629_v61, %v3467_v0  ;;  %v4724_v4 = vld [vmem:[%s7391_s2 + $0x324] sm:$0xf0]  ;;  %v4627_v5 = vld [vmem:[%s7391_s2 + $0x24] sm:$0xf]  ;;  %v3459_v8 = vld [vmem:[%s7391_s2 + $0x28] sm:$0xf0] }
  0x2d   :  { %1026 = vmatpush.bf16.msrb.mxu1 %v3802_v6  ;;  %v3770_v6 = vor.u32 %v4706_v63, %v3769_v62  ;;  %v3842_v7 = vor.u32 %v4724_v4, %v3841_v3  ;;  %v3697_v9 = vld [vmem:[%s7391_s2 + $0x200] sm:$0xf]  ;;  %v4688_v10 = vld [vmem:[%s7391_s2 + $0x204] sm:$0xf0]  ;;  %v3833_v11 = vld [vmem:[%s7391_s2 + $0x310] sm:$0xf]  ;;  %v3462_v16 = vor.u32 %v4627_v5, %v3459_v8 }
  0x2e   :  { %1055 = vmatpush.bf16.msrb.mxu2 %v3866_v20  ;;  %v4722_v12 = vld [vmem:[%s7391_s2 + $0x314] sm:$0xf0]  ;;  %v3761_v13 = vld [vmem:[%s7391_s2 + $0x280] sm:$0xf]  ;;  %v4704_v14 = vld [vmem:[%s7391_s2 + $0x284] sm:$0xf0]  ;;  %v3698_v17 = vor.u32 %v4688_v10, %v3697_v9 }
  0x2f   :  { %1084 = vmatpush.bf16.msrb.mxu3 %v3486_v33  ;;  %v3385_v15 = vld [vmem:[%s7392_s0 + $0x70] sm:$0xf]  ;;  %v3834_v19 = vor.u32 %v4722_v12, %v3833_v11  ;;  %v3762_v20 = vor.u32 %v4704_v14, %v3761_v13  ;;  %v4625_v21 = vld [vmem:[%s7391_s2 + $0x14] sm:$0xf]  ;;  %v3451_v22 = vld [vmem:[%s7391_s2 + $0x18] sm:$0xf0] }
  0x30   :  { %998 = vmatpush.bf16.msrb.mxu0 %v3730_v18  ;;  %v4612_v18 = vld [vmem:[%s7392_s0 + $0x88] sm:$0xf0]  ;;  %v3825_v24 = vld [vmem:[%s7391_s2 + $0x300] sm:$0xf]  ;;  %v4720_v25 = vld [vmem:[%s7391_s2 + $0x304] sm:$0xf0]  ;;  %v3454_v31 = vor.u32 %v4625_v21, %v3451_v22 }
  0x31   :  { %1027 = vmatpush.bf16.msrb.mxu1 %v3794_v23  ;;  %v4609_v23 = vld [vmem:[%s7392_s0 + $0x74] sm:$0xf]  ;;  %v3387_v26 = vld [vmem:[%s7392_s0 + $0x8c] sm:$0xf0]  ;;  %v3393_v27 = vld [vmem:[%s7392_s0 + $0x78] sm:$0xf]  ;;  %v5441_v32 = vor.u32 %v4612_v18, %v3385_v15  ;;  %v3826_v33 = vor.u32 %v4720_v25, %v3825_v24 }
  0x32   :  { %1056 = vmatpush.bf16.msrb.mxu2 %v3858_v38  ;;  %v4613_v28 = vld [vmem:[%s7392_s0 + $0x90] sm:$0xf0]  ;;  %v4610_v29 = vld [vmem:[%s7392_s0 + $0x7c] sm:$0xf]  ;;  %v3395_v30 = vld [vmem:[%s7392_s0 + $0x94] sm:$0xf0] }
  0x33   :  { %892 = vmatmul.bf16.gmra.mxu0 %v5324_v39  ;;  %1085 = vmatpush.bf16.msrb.mxu3 %v3478_v54  ;;  %v4623_v34 = vld [vmem:[%s7391_s2 + $0x4] sm:$0xf]  ;;  %v3443_v35 = vld [vmem:[%s7391_s2 + $0x8] sm:$0xf0]  ;;  %v5451_v37 = vor.u32 %v4613_v28, %v3393_v27  ;;  %v5453_v38 = vor.u32 %v4610_v29, %v3395_v30  ;;  %v4653_v41 = vld [vmem:[%s7391_s2 + $0xf4] sm:$0xf] }
  0x34   :  { %999 = vmatpush.bf16.msrb.mxu0 %v3722_v36  ;;  %921 = vmatmul.bf16.gmra.mxu1 %v5335_v44  ;;  %v5449_v36 = vor.u32 %v4609_v23, %v3387_v26  ;;  %v3563_v42 = vld [vmem:[%s7391_s2 + $0xf8] sm:$0xf0]  ;;  %v4669_v47 = vld [vmem:[%s7391_s2 + $0x174] sm:$0xf]  ;;  %v3555_v55 = vld [vmem:[%s7391_s2 + $0xe8] sm:$0xf0] }
  0x35   :  { %1028 = vmatpush.bf16.msrb.mxu1 %v3786_v40  ;;  %950 = vmatmul.bf16.gmra.mxu2 %v5337_v46  ;;  %v3446_v40 = vor.u32 %v4623_v34, %v3443_v35  ;;  %v3566_v43 = vor.u32 %v4653_v41, %v3563_v42  ;;  %v3627_v48 = vld [vmem:[%s7391_s2 + $0x178] sm:$0xf0]  ;;  %v4667_v56 = vld [vmem:[%s7391_s2 + $0x164] sm:$0xf]  ;;  %v3413_v60 = vld [vmem:[%s7392_s0 + $0xa8] sm:$0xf] }
  0x36   :  { %979 = vmatmul.bf16.gmra.mxu3 %v5345_v51  ;;  %1057 = vmatpush.bf16.msrb.mxu2 %v3850_v58  ;;  %v3630_v54 = vor.u32 %v4669_v47, %v3627_v48  ;;  %v4619_v61 = vld [vmem:[%s7392_s0 + $0xc0] sm:$0xf0]  ;;  %v4616_v62 = vld [vmem:[%s7392_s0 + $0xac] sm:$0xf]  ;;  %v3415_v63 = vld [vmem:[%s7392_s0 + $0xc4] sm:$0xf0] }
  0x37   :  { %1086 = vmatpush.bf16.msrb.mxu3 %v3470_v2  ;;  %v3421_v0 = vld [vmem:[%s7392_s0 + $0xb0] sm:$0xf]  ;;  %v4617_v2 = vld [vmem:[%s7392_s0 + $0xb4] sm:$0xf]  ;;  %v5507_v4 = vor.u32 %v4619_v61, %v3413_v60  ;;  %v5509_v5 = vor.u32 %v4616_v62, %v3415_v63  ;;  %v3547_v9 = vld [vmem:[%s7391_s2 + $0xd8] sm:$0xf0] }
  0x38   :  { %1000 = vmatpush.bf16.msrb.mxu0 %v3714_v52  ;;  %v4651_v52 = vld [vmem:[%s7391_s2 + $0xe4] sm:$0xf]  ;;  %v3423_v3 = vld [vmem:[%s7392_s0 + $0xcc] sm:$0xf0]  ;;  %v4649_v8 = vld [vmem:[%s7391_s2 + $0xd4] sm:$0xf] }
  0x39   :  { %1029 = vmatpush.bf16.msrb.mxu1 %v3778_v57  ;;  %v3619_v57 = vld [vmem:[%s7391_s2 + $0x168] sm:$0xf0]  ;;  %v3558_v58 = vor.u32 %v4651_v52, %v3555_v55  ;;  %v3550_v10 = vor.u32 %v4649_v8, %v3547_v9  ;;  %v4665_v11 = vld [vmem:[%s7391_s2 + $0x154] sm:$0xf]  ;;  %v3611_v12 = vld [vmem:[%s7391_s2 + $0x158] sm:$0xf0] }
  0x3a   :  { %1058 = vmatpush.bf16.msrb.mxu2 %v3842_v7  ;;  %v3622_v59 = vor.u32 %v4667_v56, %v3619_v57  ;;  %v5513_v7 = vor.u32 %v4617_v2, %v3423_v3  ;;  %v4647_v13 = vld [vmem:[%s7391_s2 + $0xc4] sm:$0xf]  ;;  %v3614_v14 = vor.u32 %v4665_v11, %v3611_v12  ;;  %v3539_v15 = vld [vmem:[%s7391_s2 + $0xc8] sm:$0xf0]  ;;  %v4597_v22 = vld [vmem:[%s7392_s0 + $0x14] sm:$0xf] }
  0x3b   :  { %1087 = vmatpush.bf16.msrb.mxu3 %v3462_v16  ;;  %v4663_v16 = vld [vmem:[%s7391_s2 + $0x144] sm:$0xf]  ;;  %v3542_v18 = vor.u32 %v4647_v13, %v3539_v15  ;;  %v4600_v21 = vld [vmem:[%s7392_s0 + $0x28] sm:$0xf0]  ;;  %v3347_v23 = vld [vmem:[%s7392_s0 + $0x2c] sm:$0xf0] }
  0x3c   :  { %1001 = vmatpush.bf16.msrb.mxu0 %v3706_v1  ;;  %v4620_v1 = vld [vmem:[%s7392_s0 + $0xc8] sm:$0xf0]  ;;  %v3353_v24 = vld [vmem:[%s7392_s0 + $0x18] sm:$0xf]  ;;  %v4601_v25 = vld [vmem:[%s7392_s0 + $0x30] sm:$0xf0]  ;;  %v5563_v27 = vor.u32 %v4597_v22, %v3347_v23 }
  0x3d   :  { %1030 = vmatpush.bf16.msrb.mxu1 %v3770_v6  ;;  %v5511_v6 = vor.u32 %v4620_v1, %v3421_v0  ;;  %v5565_v28 = vor.u32 %v4601_v25, %v3353_v24  ;;  %v4685_v29 = vld [vmem:[%s7391_s2 + $0x1f4] sm:$0xf]  ;;  %v3691_v30 = vld [vmem:[%s7391_s2 + $0x1f8] sm:$0xf0]  ;;  %v3683_v52 = vld [vmem:[%s7391_s2 + $0x1e8] sm:$0xf0] }
  0x3e   :  { %1059 = vmatpush.bf16.msrb.mxu2 %v3834_v19  ;;  %v3531_v34 = vld [vmem:[%s7391_s2 + $0xb8] sm:$0xf0]  ;;  %v4701_v35 = vld [vmem:[%s7391_s2 + $0x274] sm:$0xf]  ;;  %v3747_v56 = vld [vmem:[%s7391_s2 + $0x268] sm:$0xf0] }
  0x3f   :  { %1088 = vmatpush.bf16.msrb.mxu3 %v3454_v31  ;;  %v3694_v31 = vor.u32 %v4685_v29, %v3691_v30  ;;  %v4661_v41 = vld [vmem:[%s7391_s2 + $0x134] sm:$0xf]  ;;  %v3595_v42 = vld [vmem:[%s7391_s2 + $0x138] sm:$0xf0]  ;;  %v4643_v57 = vld [vmem:[%s7391_s2 + $0xa4] sm:$0xf] }
  0x40   :  { %1002 = vmatpush.bf16.msrb.mxu0 %v3698_v17  ;;  %v3603_v17 = vld [vmem:[%s7391_s2 + $0x148] sm:$0xf0]  ;;  %v3598_v47 = vor.u32 %v4661_v41, %v3595_v42  ;;  %v4681_v61 = vld [vmem:[%s7391_s2 + $0x1d4] sm:$0xf]  ;;  %v3675_v62 = vld [vmem:[%s7391_s2 + $0x1d8] sm:$0xf0] }
  0x41   :  { %1031 = vmatpush.bf16.msrb.mxu1 %v3762_v20  ;;  %v3606_v19 = vor.u32 %v4663_v16, %v3603_v17  ;;  %v3345_v20 = vld [vmem:[%s7392_s0 + $0x10] sm:$0xf]  ;;  %v4659_v63 = vld [vmem:[%s7391_s2 + $0x124] sm:$0xf]  ;;  %v3678_v0 = vor.u32 %v4681_v61, %v3675_v62  ;;  %v3587_v1 = vld [vmem:[%s7391_s2 + $0x128] sm:$0xf0] }
  0x42   :  { %1060 = vmatpush.bf16.msrb.mxu2 %v3826_v33  ;;  %v5561_v26 = vor.u32 %v4600_v21, %v3345_v20  ;;  %v4645_v33 = vld [vmem:[%s7391_s2 + $0xb4] sm:$0xf]  ;;  %v3739_v3 = vld [vmem:[%s7391_s2 + $0x258] sm:$0xf0]  ;;  %v3590_v8 = vor.u32 %v4659_v63, %v3587_v1  ;;  %v4679_v9 = vld [vmem:[%s7391_s2 + $0x1c4] sm:$0xf] }
  0x43   :  { %897 = vmatmul.bf16.gmra.mxu0 %v5441_v32  ;;  %1089 = vmatpush.bf16.msrb.mxu3 %v3446_v40  ;;  %v3534_v40 = vor.u32 %v4645_v33, %v3531_v34  ;;  %v4697_v2 = vld [vmem:[%s7391_s2 + $0x254] sm:$0xf]  ;;  %v3373_v11 = vld [vmem:[%s7392_s0 + $0x48] sm:$0xf]  ;;  %v4607_v12 = vld [vmem:[%s7392_s0 + $0x60] sm:$0xf0] }
  0x44   :  { %926 = vmatmul.bf16.gmra.mxu1 %v5449_v36  ;;  %1111 = vmatpush.bf16.msra.mxu0 %v3566_v43  ;;  %v3755_v43 = vld [vmem:[%s7391_s2 + $0x278] sm:$0xf0]  ;;  %v4604_v13 = vld [vmem:[%s7392_s0 + $0x4c] sm:$0xf]  ;;  %v3375_v15 = vld [vmem:[%s7392_s0 + $0x64] sm:$0xf0] }
  0x45   :  { %955 = vmatmul.bf16.gmra.mxu2 %v5451_v37  ;;  %1140 = vmatpush.bf16.msra.mxu1 %v3630_v54  ;;  %v3758_v48 = vor.u32 %v4701_v35, %v3755_v43  ;;  %v4699_v54 = vld [vmem:[%s7391_s2 + $0x264] sm:$0xf]  ;;  %v3381_v16 = vld [vmem:[%s7392_s0 + $0x50] sm:$0xf]  ;;  %v4608_v17 = vld [vmem:[%s7392_s0 + $0x68] sm:$0xf0]  ;;  %v5663_v22 = vor.u32 %v4604_v13, %v3375_v15 }
  0x46   :  { %984 = vmatmul.bf16.gmra.mxu3 %v5453_v38  ;;  %1169 = vmatpush.bf16.msra.mxu2 %v3694_v31  ;;  %v4695_v20 = vld [vmem:[%s7391_s2 + $0x244] sm:$0xf]  ;;  %v3731_v21 = vld [vmem:[%s7391_s2 + $0x248] sm:$0xf0]  ;;  %v5665_v23 = vor.u32 %v4608_v17, %v3381_v16  ;;  %v4677_v25 = vld [vmem:[%s7391_s2 + $0x1b4] sm:$0xf] }
  0x47   :  { %1198 = vmatpush.bf16.msra.mxu3 %v3758_v48  ;;  %v3734_v24 = vor.u32 %v4695_v20, %v3731_v21  ;;  %v3659_v29 = vld [vmem:[%s7391_s2 + $0x1b8] sm:$0xf0]  ;;  %v4641_v31 = vld [vmem:[%s7391_s2 + $0x94] sm:$0xf]  ;;  %v3651_v48 = vld [vmem:[%s7391_s2 + $0x1a8] sm:$0xf0] }
  0x48   :  { %1112 = vmatpush.bf16.msra.mxu0 %v3558_v58  ;;  %v3523_v58 = vld [vmem:[%s7391_s2 + $0xa8] sm:$0xf0]  ;;  %v3662_v30 = vor.u32 %v4677_v25, %v3659_v29  ;;  %v3515_v33 = vld [vmem:[%s7391_s2 + $0x98] sm:$0xf0]  ;;  %v4693_v34 = vld [vmem:[%s7391_s2 + $0x234] sm:$0xf] }
  0x49   :  { %1141 = vmatpush.bf16.msra.mxu1 %v3622_v59  ;;  %v3750_v59 = vor.u32 %v4699_v54, %v3747_v56  ;;  %v3526_v60 = vor.u32 %v4643_v57, %v3523_v58  ;;  %v3518_v35 = vor.u32 %v4641_v31, %v3515_v33  ;;  %v3579_v41 = vld [vmem:[%s7391_s2 + $0x118] sm:$0xf0]  ;;  %v3715_v54 = vld [vmem:[%s7391_s2 + $0x228] sm:$0xf0]  ;;  %v4673_v58 = vld [vmem:[%s7391_s2 + $0x194] sm:$0xf] }
  0x4a   :  { %v3723_v42 = vld [vmem:[%s7391_s2 + $0x238] sm:$0xf0]  ;;  %v3507_v56 = vld [vmem:[%s7391_s2 + $0x88] sm:$0xf0]  ;;  %v4689_v1 = vld [vmem:[%s7391_s2 + $0x214] sm:$0xf] }
  0x4b   :  { %1199 = vmatpush.bf16.msra.mxu3 %v3750_v59  ;;  %v3643_v59 = vld [vmem:[%s7391_s2 + $0x198] sm:$0xf0]  ;;  %v3571_v62 = vld [vmem:[%s7391_s2 + $0x108] sm:$0xf0]  ;;  %v4687_v21 = vld [vmem:[%s7391_s2 + $0x204] sm:$0xf] }
  0x4c   :  { %1113 = vmatpush.bf16.msra.mxu0 %v3550_v10  ;;  %v3667_v10 = vld [vmem:[%s7391_s2 + $0x1c8] sm:$0xf0]  ;;  %v3646_v61 = vor.u32 %v4673_v58, %v3643_v59  ;;  %v4717_v29 = vld [vmem:[%s7391_s2 + $0x2f4] sm:$0xf] }
  0x4d   :  { %1142 = vmatpush.bf16.msra.mxu1 %v3614_v14  ;;  %v3742_v14 = vor.u32 %v4697_v2, %v3739_v3  ;;  %v3707_v2 = vld [vmem:[%s7391_s2 + $0x218] sm:$0xf0]  ;;  %v3401_v3 = vld [vmem:[%s7392_s0 + $0x80] sm:$0xf]  ;;  %v3635_v15 = vld [vmem:[%s7391_s2 + $0x188] sm:$0xf0] }
  0x4e   :  { %v3710_v13 = vor.u32 %v4689_v1, %v3707_v2  ;;  %v4733_v33 = vld [vmem:[%s7391_s2 + $0x374] sm:$0xf]  ;;  %v5838_v1 = vld [vmem:[%s7393_s5] ss:$8 sm:$0x3] }
  0x4f   :  { %1200 = vmatpush.bf16.msra.mxu3 %v3742_v14  ;;  %v4671_v14 = vld [vmem:[%s7391_s2 + $0x184] sm:$0xf]  ;;  %v4713_v59 = vld [vmem:[%s7391_s2 + $0x2d4] sm:$0xf]  ;;  %v3795_v2 = vld [vmem:[%s7391_s2 + $0x2c8] sm:$0xf0] }
  0x50   :  { %1114 = vmatpush.bf16.msra.mxu0 %v3542_v18  ;;  %v3670_v18 = vor.u32 %v4679_v9, %v3667_v10  ;;  %v4611_v9 = vld [vmem:[%s7392_s0 + $0x84] sm:$0xf]  ;;  %v3403_v10 = vld [vmem:[%s7392_s0 + $0x9c] sm:$0xf0]  ;;  %v3638_v17 = vor.u32 %v4671_v14, %v3635_v15 }
  0x51   :  { %1143 = vmatpush.bf16.msra.mxu1 %v3606_v19  ;;  %v5655_v19 = vor.u32 %v4607_v12, %v3373_v11  ;;  %v3409_v11 = vld [vmem:[%s7392_s0 + $0x88] sm:$0xf]  ;;  %v4615_v12 = vld [vmem:[%s7392_s0 + $0xa0] sm:$0xf0] }
  0x52   :  { %v5759_v20 = vor.u32 %v4615_v12, %v3409_v11 }
  0x53   :  { %902 = vmatmul.bf16.gmra.mxu0 %v5507_v4  ;;  %1201 = vmatpush.bf16.msra.mxu3 %v3734_v24  ;;  %v3699_v24 = vld [vmem:[%s7391_s2 + $0x208] sm:$0xf0] }
  0x54   :  { %931 = vmatmul.bf16.gmra.mxu1 %v5509_v5  ;;  %1115 = vmatpush.bf16.msra.mxu0 %v3534_v40  ;;  %v4657_v40 = vld [vmem:[%s7391_s2 + $0x114] sm:$0xf]  ;;  %v3702_v25 = vor.u32 %v4687_v21, %v3699_v24  ;;  %v3787_v21 = vld [vmem:[%s7391_s2 + $0x2b8] sm:$0xf0] }
  0x55   :  { %960 = vmatmul.bf16.gmra.mxu2 %v5511_v6  ;;  %1144 = vmatpush.bf16.msra.mxu1 %v3598_v47  ;;  %v3582_v43 = vor.u32 %v4657_v40, %v3579_v41  ;;  %v3726_v47 = vor.u32 %v4693_v34, %v3723_v42  ;;  %v3883_v34 = vld [vmem:[%s7391_s2 + $0x378] sm:$0xf0]  ;;  %v3429_v40 = vld [vmem:[%s7392_s0 + $0xb8] sm:$0xf]  ;;  %v3811_v41 = vld [vmem:[%s7391_s2 + $0x2e8] sm:$0xf0] }
  0x56   :  { %989 = vmatmul.bf16.gmra.mxu3 %v5513_v7  ;;  %v4731_v42 = vld [vmem:[%s7391_s2 + $0x364] sm:$0xf] }
  0x57   :  { %1202 = vmatpush.bf16.msra.mxu3 %v3726_v47  ;;  %v4618_v47 = vld [vmem:[%s7392_s0 + $0xbc] sm:$0xf] }
  0x58   :  { %1116 = vmatpush.bf16.msra.mxu0 %v3526_v60  ;;  %v4655_v60 = vld [vmem:[%s7391_s2 + $0x104] sm:$0xf] }
  0x59   :  { %1145 = vmatpush.bf16.msra.mxu1 %v3590_v8  ;;  %v4614_v8 = vld [vmem:[%s7392_s0 + $0x98] sm:$0xf0] }
  0x5a   :  { %v5755_v16 = vor.u32 %v4614_v8, %v3401_v3  ;;  %v4727_v3 = vld [vmem:[%s7391_s2 + $0x344] sm:$0xf] }
  0x5c   :  { %1117 = vmatpush.bf16.msra.mxu0 %v3518_v35  ;;  %v3886_v35 = vor.u32 %v4733_v33, %v3883_v34  ;;  %v3779_v33 = vld [vmem:[%s7391_s2 + $0x2a8] sm:$0xf0]  ;;  %v4723_v34 = vld [vmem:[%s7391_s2 + $0x324] sm:$0xf] }
  0x5d   :  { %1146 = vmatpush.bf16.msra.mxu1 %v3582_v43  ;;  %v4621_v43 = vld [vmem:[%s7392_s0 + $0xd0] sm:$0xf0] }
  0x63   :  { %1003 = vmatmul.bf16.vlgmr.msrb.gmra.mxu0 %v5561_v26 }
  0x64   :  { %1032 = vmatmul.bf16.vlgmr.msrb.gmra.mxu1 %v5563_v27 }
  0x65   :  { %1061 = vmatmul.bf16.vlgmr.msrb.gmra.mxu2 %v5565_v28 }
  0x66   :  { %1090 = vmatmul.bf16.vlgmr.msrb.gmra.mxu3 %v5195_v45  ;;  %v4683_v45 = vld [vmem:[%s7391_s2 + $0x1e4] sm:$0xf] }
  0x67   :  { %v3686_v55 = vor.u32 %v4683_v45, %v3683_v52  ;;  %v4691_v45 = vld [vmem:[%s7391_s2 + $0x224] sm:$0xf] }
  0x68   :  { %v3718_v63 = vor.u32 %v4691_v45, %v3715_v54  ;;  %v3431_v45 = vld [vmem:[%s7392_s0 + $0xd4] sm:$0xf0]  ;;  %v4622_v54 = vld [vmem:[%s7392_s0 + $0xd8] sm:$0xf0] }
  0x69   :  { %1170 = vmatpush.bf16.msra.mxu2 %v3686_v55  ;;  %v4639_v55 = vld [vmem:[%s7391_s2 + $0x84] sm:$0xf] }
  0x6a   :  { %v3510_v57 = vor.u32 %v4639_v55, %v3507_v56  ;;  %1203 = vmatpush.bf16.msra.mxu3 %v3718_v63  ;;  %v5813_v56 = vor.u32 %v4621_v43, %v3429_v40  ;;  %v3867_v63 = vld [vmem:[%s7391_s2 + $0x358] sm:$0xf0]  ;;  %v3843_v40 = vld [vmem:[%s7391_s2 + $0x328] sm:$0xf0] }
  0x6c   :  { %1118 = vmatpush.bf16.msra.mxu0 %v3510_v57  ;;  %v5815_v57 = vor.u32 %v4618_v47, %v3431_v45  ;;  %v4705_v45 = vld [vmem:[%s7391_s2 + $0x294] sm:$0xf] }
  0x6d   :  { %1171 = vmatpush.bf16.msra.mxu2 %v3678_v0  ;;  %v3574_v0 = vor.u32 %v4655_v60, %v3571_v62  ;;  %v3803_v60 = vld [vmem:[%s7391_s2 + $0x2d8] sm:$0xf0]  ;;  %v4729_v62 = vld [vmem:[%s7391_s2 + $0x354] sm:$0xf] }
  0x6e   :  { %1204 = vmatpush.bf16.msra.mxu3 %v3710_v13 }
  0x6f   :  { %1147 = vmatpush.bf16.msra.mxu1 %v3574_v0  ;;  %v3870_v0 = vor.u32 %v4729_v62, %v3867_v63  ;;  %v4741_v63 = vld [vmem:[%s7394_s3 + $0x30] sm:$0xff] }
  0x71   :  { %1172 = vmatpush.bf16.msra.mxu2 %v3670_v18  ;;  %v5757_v18 = vor.u32 %v4611_v9, %v3403_v10  ;;  %v3859_v9 = vld [vmem:[%s7391_s2 + $0x348] sm:$0xf0]  ;;  %v5853_v10 = vperm.slane %v5838_v1, 0 }
  0x72   :  { %1205 = vmatpush.bf16.msra.mxu3 %v3702_v25  ;;  %v3862_v11 = vor.u32 %v4727_v3, %v3859_v9  ;;  %v4725_v25 = vld [vmem:[%s7391_s2 + $0x334] sm:$0xf] }
  0x73   :  { %1008 = vmatmul.bf16.gmra.mxu0 %v5655_v19  ;;  %1256 = vmatpush.bf16.msrb.mxu1 %v3886_v35 }
  0x74   :  { %1037 = vmatmul.bf16.gmra.mxu1 %v5663_v22 }
  0x75   :  { %1066 = vmatmul.bf16.gmra.mxu2 %v5665_v23 }
  0x76   :  { %1095 = vmatmul.bf16.gmra.mxu3 %v5324_v39  ;;  %1173 = vmatpush.bf16.msra.mxu2 %v3662_v30  ;;  %v4675_v39 = vld [vmem:[%s7391_s2 + $0x1a4] sm:$0xf]  ;;  %v3819_v30 = vld [vmem:[%s7391_s2 + $0x2f8] sm:$0xf0] }
  0x77   :  { %v3654_v52 = vor.u32 %v4675_v39, %v3651_v48  ;;  %v3822_v31 = vor.u32 %v4717_v29, %v3819_v30  ;;  %v3875_v48 = vld [vmem:[%s7391_s2 + $0x368] sm:$0xf0] }
  0x78   :  { %v3878_v55 = vor.u32 %v4731_v42, %v3875_v48 }
  0x79   :  { %1227 = vmatpush.bf16.msrb.mxu0 %v3822_v31 }
  0x7a   :  { %1174 = vmatpush.bf16.msra.mxu2 %v3654_v52  ;;  %v3437_v52 = vld [vmem:[%s7392_s0 + $0xc0] sm:$0xf]  ;;  %1257 = vmatpush.bf16.msrb.mxu1 %v3878_v55  ;;  %v4721_v55 = vld [vmem:[%s7391_s2 + $0x314] sm:$0xf] }
  0x7b   :  { %v5817_v58 = vor.u32 %v4622_v54, %v3437_v52  ;;  %v3771_v52 = vld [vmem:[%s7391_s2 + $0x298] sm:$0xf0] }
  0x7c   :  { %v3774_v54 = vor.u32 %v4705_v45, %v3771_v52 }
  0x7e   :  { %1175 = vmatpush.bf16.msra.mxu2 %v3646_v61  ;;  %v3806_v61 = vor.u32 %v4713_v59, %v3803_v60  ;;  %1258 = vmatpush.bf16.msrb.mxu1 %v3870_v0  ;;  %v4703_v0 = vld [vmem:[%s7391_s2 + $0x284] sm:$0xf] }
  0x82   :  { %1176 = vmatpush.bf16.msra.mxu2 %v3638_v17  ;;  %1259 = vmatpush.bf16.msrb.mxu1 %v3862_v11  ;;  %v4709_v17 = vld [vmem:[%s7391_s2 + $0x2b4] sm:$0xf]  ;;  %v4740_v11 = vld [vmem:[%s7394_s3 + $0x28] sm:$0xff] }
  0x83   :  { %1013 = vmatmul.bf16.gmra.mxu0 %v5755_v16  ;;  %v3790_v24 = vor.u32 %v4709_v17, %v3787_v21  ;;  %v4739_v17 = vld [vmem:[%s7394_s3 + $0x20] sm:$0xff] }
  0x84   :  { %1042 = vmatmul.bf16.gmra.mxu1 %v5757_v18 }
  0x85   :  { %1071 = vmatmul.bf16.gmra.mxu2 %v5759_v20 }
  0x86   :  { %1100 = vmatmul.bf16.gmra.mxu3 %v5441_v32  ;;  %v4715_v32 = vld [vmem:[%s7391_s2 + $0x2e4] sm:$0xf] }
  0x87   :  { %v3814_v39 = vor.u32 %v4715_v32, %v3811_v41  ;;  %v3846_v32 = vor.u32 %v4723_v34, %v3843_v40  ;;  %v4735_v40 = vld [vmem:[%s7394_s3] sm:$0xff] }
  0x89   :  { %1228 = vmatpush.bf16.msrb.mxu0 %v3814_v39 }
  0x8d   :  { %1229 = vmatpush.bf16.msrb.mxu0 %v3806_v61 }
  0x93   :  { %1018 = vmatmul.bf16.gmra.mxu0 %v5813_v56 }
  0x94   :  { %1047 = vmatmul.bf16.gmra.mxu1 %v5815_v57 }
  0x95   :  { %1076 = vmatmul.bf16.gmra.mxu2 %v5817_v58 }
  0x96   :  { %1105 = vmatmul.bf16.gmra.mxu3 %v5507_v4  ;;  %v4711_v4 = vld [vmem:[%s7391_s2 + $0x2c4] sm:$0xf] }
  0x97   :  { %v3798_v8 = vor.u32 %v4711_v4, %v3795_v2  ;;  %v3763_v4 = vld [vmem:[%s7391_s2 + $0x288] sm:$0xf0]  ;;  %v4719_v2 = vld [vmem:[%s7391_s2 + $0x304] sm:$0xf] }
  0x98   :  { %v3766_v3 = vor.u32 %v4703_v0, %v3763_v4 }
  0x99   :  { %1230 = vmatpush.bf16.msrb.mxu0 %v3798_v8  ;;  %v3827_v8 = vld [vmem:[%s7391_s2 + $0x308] sm:$0xf0] }
  0x9a   :  { %v3830_v9 = vor.u32 %v4719_v2, %v3827_v8 }
  0x9d   :  { %1231 = vmatpush.bf16.msrb.mxu0 %v3790_v24 }
  0xa0   :  { %v888_v12 = vpop.f32.mrf.mxu0 }
  0xa1   :  { %v889_v13 = vadd.f32 %v888_v12, %v5853_v10  ;;  %v917_v14 = vpop.f32.mrf.mxu1 }
  0xa3   :  { %v918_v15 = vadd.f32 %v917_v14, %v889_v13  ;;  %1119 = vmatmul.bf16.vlgmr.msra.gmra.mxu0 %v5203_v49  ;;  %v3851_v49 = vld [vmem:[%s7391_s2 + $0x338] sm:$0xf0] }
  0xa4   :  { %1148 = vmatmul.bf16.vlgmr.msra.gmra.mxu1 %v5205_v50  ;;  %v3854_v50 = vor.u32 %v4725_v25, %v3851_v49  ;;  %v4738_v25 = vld [vmem:[%s7394_s3 + $0x18] sm:$0xff] }
  0xa5   :  { %1177 = vmatmul.bf16.vlgmr.msra.gmra.mxu2 %v5213_v53 }
  0xa6   :  { %1206 = vmatmul.bf16.vlgmr.msra.gmra.mxu3 %v5561_v26  ;;  %1260 = vmatpush.bf16.msrb.mxu1 %v3854_v50  ;;  %v4707_v26 = vld [vmem:[%s7391_s2 + $0x2a4] sm:$0xf] }
  0xa7   :  { %v3782_v35 = vor.u32 %v4707_v26, %v3779_v33 }
  0xa8   :  { %v946_v53 = vpop.f32.mrf.mxu2  ;;  %v5874_v30 = vpop.f32.mrf.mxu0 }
  0xa9   :  { %v5872_v29 = vadd.f32 %v946_v53, %v918_v15  ;;  %v5876_v31 = vpop.f32.mrf.mxu1  ;;  %v5890_v41 = vpop.f32.mrf.mxu3  ;;  %1232 = vmatpush.bf16.msrb.mxu0 %v3782_v35  ;;  %v891_v52 = vadd.f32 %v5874_v30, %v5853_v10 }
  0xaa   :  { %1261 = vmatpush.bf16.msrb.mxu1 %v3846_v32 }
  0xad   :  { %1233 = vmatpush.bf16.msrb.mxu0 %v3774_v54 }
  0xb0   :  { %v5892_v42 = vpop.f32.mrf.mxu2  ;;  %v893_v43 = vpop.f32.mrf.mxu0 }
  0xb1   :  { %v894_v47 = vadd.f32 %v893_v43, %v5853_v10  ;;  %v922_v39 = vpop.f32.mrf.mxu1  ;;  %v5914_v60 = vpop.f32.mrf.mxu3  ;;  %1234 = vmatpush.bf16.msrb.mxu0 %v3766_v3 }
  0xb3   :  { %v923_v48 = vadd.f32 %v922_v39, %v894_v47  ;;  %1124 = vmatmul.bf16.gmra.mxu0 %v5335_v44  ;;  %v3835_v44 = vld [vmem:[%s7391_s2 + $0x318] sm:$0xf0] }
  0xb4   :  { %1153 = vmatmul.bf16.gmra.mxu1 %v5337_v46  ;;  %v4742_v46 = vld [vmem:[%s7394_s3 + $0x38] sm:$0xff] }
  0xb5   :  { %1182 = vmatmul.bf16.gmra.mxu2 %v5345_v51  ;;  %v3838_v51 = vor.u32 %v4721_v55, %v3835_v44  ;;  %v976_v44 = vadd.f32 %v5890_v41, %v5872_v29 }
  0xb6   :  { %1211 = vmatmul.bf16.gmra.mxu3 %v5655_v19  ;;  %1438 = vmatpush.bf16.msrb.mxu2 %v4742_v46 }
  0xb7   :  { %1262 = vmatpush.bf16.msrb.mxu1 %v3838_v51 }
  0xb8   :  { %v951_v59 = vpop.f32.mrf.mxu2  ;;  %v5918_v61 = vpop.f32.mrf.mxu0 }
  0xb9   :  { %v5916_v19 = vadd.f32 %v951_v59, %v923_v48  ;;  %v5920_v62 = vpop.f32.mrf.mxu1  ;;  %v5946_v21 = vpop.f32.mrf.mxu3 }
  0xba   :  { %1439 = vmatpush.bf16.msrb.mxu2 %v4741_v63 }
  0xbb   :  { %1263 = vmatpush.bf16.msrb.mxu1 %v3830_v9 }
  0xbe   :  { %1440 = vmatpush.bf16.msrb.mxu2 %v4740_v11 }
  0xc0   :  { %v5940_v12 = vpop.f32.mrf.mxu2  ;;  %v898_v13 = vpop.f32.mrf.mxu0 }
  0xc1   :  { %v899_v14 = vadd.f32 %v898_v13, %v5853_v10  ;;  %v927_v15 = vpop.f32.mrf.mxu1 }
  0xc2   :  { %1441 = vmatpush.bf16.msrb.mxu2 %v4739_v17 }
  0xc3   :  { %v928_v24 = vadd.f32 %v927_v15, %v899_v14  ;;  %1129 = vmatmul.bf16.gmra.mxu0 %v5449_v36  ;;  %v4737_v36 = vld [vmem:[%s7394_s3 + $0x10] sm:$0xff] }
  0xc4   :  { %1158 = vmatmul.bf16.gmra.mxu1 %v5451_v37  ;;  %v982_v37 = vpop.f32.mrf.mxu3 }
  0xc5   :  { %1187 = vmatmul.bf16.gmra.mxu2 %v5453_v38  ;;  %v4736_v38 = vld [vmem:[%s7394_s3 + $0x8] sm:$0xff] }
  0xc6   :  { %1216 = vmatmul.bf16.gmra.mxu3 %v5755_v16  ;;  %1442 = vmatpush.bf16.msrb.mxu2 %v4738_v25 }
  0xc8   :  { %v956_v49 = vpop.f32.mrf.mxu2  ;;  %v5957_v53 = vpop.f32.mrf.mxu0 }
  0xc9   :  { %v5955_v50 = vadd.f32 %v956_v49, %v928_v24  ;;  %v5959_v26 = vpop.f32.mrf.mxu1 }
  0xca   :  { %1443 = vmatpush.bf16.msrb.mxu2 %v4737_v36 }
  0xcc   :  { %v985_v43 = vpop.f32.mrf.mxu3 }
  0xce   :  { %1444 = vmatpush.bf16.msrb.mxu2 %v4736_v38 }
  0xd0   :  { %v5967_v16 = vpop.f32.mrf.mxu2  ;;  %v903_v33 = vpop.f32.mrf.mxu0 }
  0xd1   :  { %v904_v34 = vadd.f32 %v903_v33, %v5853_v10  ;;  %v932_v35 = vpop.f32.mrf.mxu1 }
  0xd2   :  { %1445 = vmatpush.bf16.msrb.mxu2 %v4735_v40 }
  0xd3   :  { %v933_v32 = vadd.f32 %v932_v35, %v904_v34  ;;  %1134 = vmatmul.bf16.gmra.mxu0 %v5509_v5 }
  0xd4   :  { %1163 = vmatmul.bf16.gmra.mxu1 %v5511_v6  ;;  %v987_v5 = vpop.f32.mrf.mxu3 }
  0xd5   :  { %1192 = vmatmul.bf16.gmra.mxu2 %v5513_v7  ;;  %v920_v7 = vadd.f32 %v5876_v31, %v891_v52 }
  0xd6   :  { %1221 = vmatmul.bf16.gmra.mxu3 %v5813_v56 }
  0xd7   :  { %v949_v56 = vadd.f32 %v5892_v42, %v920_v7 }
  0xd8   :  { %v961_v47 = vpop.f32.mrf.mxu2  ;;  %v5979_v48 = vpop.f32.mrf.mxu0 }
  0xd9   :  { %v5977_v39 = vadd.f32 %v961_v47, %v933_v32  ;;  %v5981_v45 = vpop.f32.mrf.mxu1  ;;  %v978_v51 = vadd.f32 %v5914_v60, %v949_v56 }
  0xdc   :  { %v5994_v0 = vpop.f32.mrf.mxu3 }
  0xe0   :  { %v5985_v54 = vpop.f32.mrf.mxu2  ;;  %v1004_v55 = vpop.f32.mrf.mxu0 }
  0xe1   :  { %v1033_v6 = vpop.f32.mrf.mxu1  ;;  %v1005_v30 = vadd.f32 %v1004_v55, %v976_v44 }
  0xe3   :  { %1235 = vmatmul.bf16.vlgmr.msrb.gmra.mxu0 %v5563_v27  ;;  %v1034_v2 = vadd.f32 %v1033_v6, %v1005_v30  ;;  %v896_v27 = vadd.f32 %v5918_v61, %v5853_v10  ;;  %v981_v61 = vadd.f32 %v5946_v21, %v5916_v19 }
  0xe4   :  { %1264 = vmatmul.bf16.vlgmr.msrb.gmra.mxu1 %v5565_v28  ;;  %v992_v13 = vpop.f32.mrf.mxu3 }
  0xe5   :  { %v925_v29 = vadd.f32 %v5920_v62, %v896_v27 }
  0xe7   :  { %v954_v11 = vadd.f32 %v5940_v12, %v925_v29 }
  0xe8   :  { %v1062_v46 = vpop.f32.mrf.mxu2  ;;  %v1006_v59 = vpop.f32.mrf.mxu0 }
  0xe9   :  { %v1035_v63 = vpop.f32.mrf.mxu1  ;;  %v1007_v4 = vadd.f32 %v1006_v59, %v978_v51  ;;  %v1063_v31 = vadd.f32 %v1062_v46, %v1034_v2  ;;  %v983_v17 = vadd.f32 %v982_v37, %v954_v11  ;;  %v4750_v2 = vld [vmem:[%s7394_s3 + $0x78] sm:$0xff] }
  0xea   :  { %1467 = vmatpush.bf16.msrb.mxu3 %v4750_v2 }
  0xeb   :  { %v1036_v42 = vadd.f32 %v1035_v63, %v1007_v4  ;;  %v1285_v41 = vmax.f32 %v1063_v31, 0.0 }
  0xec   :  { %v1091_v38 = vpop.f32.mrf.mxu3 }
  0xf0   :  { %v1064_v3 = vpop.f32.mrf.mxu2  ;;  %v1009_v8 = vpop.f32.mrf.mxu0 }
  0xf1   :  { %v1065_v28 = vadd.f32 %v1064_v3, %v1036_v42  ;;  %v1038_v9 = vpop.f32.mrf.mxu1  ;;  %v1010_v24 = vadd.f32 %v1009_v8, %v981_v61 }
  0xf3   :  { %v1287_v60 = vmax.f32 %v1065_v28, 0.0  ;;  %1240 = vmatmul.bf16.gmra.mxu0 %v5663_v22  ;;  %v1039_v36 = vadd.f32 %v1038_v9, %v1010_v24  ;;  %v901_v22 = vadd.f32 %v5957_v53, %v5853_v10  ;;  %v986_v53 = vadd.f32 %v985_v43, %v5955_v50 }
  0xf4   :  { %1269 = vmatmul.bf16.gmra.mxu1 %v5665_v23  ;;  %v6011_v6 = vpop.f32.mrf.mxu3 }
  0xf5   :  { %v1301_v14 = vpack.c.bf16 %v1287_v60, %v1285_v41  ;;  %v930_v19 = vadd.f32 %v5959_v26, %v901_v22 }
  0xf7   :  { %1446 = vmatmul.bf16.vlgmr.msrb.gmra.mxu2 %v1301_v14  ;;  %v959_v37 = vadd.f32 %v5967_v16, %v930_v19 }
  0xf8   :  { %v1067_v15 = vpop.f32.mrf.mxu2  ;;  %v1011_v25 = vpop.f32.mrf.mxu0 }
  0xf9   :  { %v1040_v49 = vpop.f32.mrf.mxu1  ;;  %v1012_v62 = vadd.f32 %v1011_v25, %v983_v17  ;;  %v1068_v12 = vadd.f32 %v1067_v15, %v1039_v36  ;;  %v988_v55 = vadd.f32 %v987_v5, %v959_v37  ;;  %v4748_v17 = vld [vmem:[%s7394_s3 + $0x68] sm:$0xff]  ;;  %v4747_v36 = vld [vmem:[%s7394_s3 + $0x60] sm:$0xff] }
  0xfb   :  { %v1041_v33 = vadd.f32 %v1040_v49, %v1012_v62  ;;  %v1289_v21 = vmax.f32 %v1068_v12, 0.0 }
  0xfc   :  { %v1096_v43 = vpop.f32.mrf.mxu3 }
 0x100   :  { %v1069_v34 = vpop.f32.mrf.mxu2  ;;  %v1014_v23 = vpop.f32.mrf.mxu0 }
 0x101   :  { %v1070_v35 = vadd.f32 %v1069_v34, %v1041_v33  ;;  %v1043_v40 = vpop.f32.mrf.mxu1  ;;  %v1015_v7 = vadd.f32 %v1014_v23, %v986_v53  ;;  %v4746_v23 = vld [vmem:[%s7394_s3 + $0x58] sm:$0xff] }
 0x103   :  { %v1291_v32 = vmax.f32 %v1070_v35, 0.0  ;;  %1245 = vmatmul.bf16.gmra.mxu0 %v5757_v18  ;;  %v1044_v46 = vadd.f32 %v1043_v40, %v1015_v7  ;;  %v906_v18 = vadd.f32 %v5979_v48, %v5853_v10  ;;  %v991_v48 = vadd.f32 %v5994_v0, %v5977_v39 }
 0x104   :  { %1274 = vmatmul.bf16.gmra.mxu1 %v5759_v20 }
 0x105   :  { %v1303_v47 = vpack.c.bf16 %v1291_v32, %v1289_v21  ;;  %v935_v50 = vadd.f32 %v5981_v45, %v906_v18  ;;  %v4745_v32 = vld [vmem:[%s7394_s3 + $0x50] sm:$0xff] }
 0x107   :  { %1451 = vmatmul.bf16.gmra.mxu2 %v1303_v47  ;;  %v964_v27 = vadd.f32 %v5985_v54, %v935_v50  ;;  %v4749_v54 = vld [vmem:[%s7394_s3 + $0x70] sm:$0xff] }
 0x108   :  { %v1072_v52 = vpop.f32.mrf.mxu2  ;;  %v1016_v56 = vpop.f32.mrf.mxu0  ;;  %1468 = vmatpush.bf16.msrb.mxu3 %v4749_v54 }
 0x109   :  { %v1045_v44 = vpop.f32.mrf.mxu1  ;;  %v1017_v26 = vadd.f32 %v1016_v56, %v988_v55  ;;  %v1073_v51 = vadd.f32 %v1072_v52, %v1044_v46  ;;  %v993_v31 = vadd.f32 %v992_v13, %v964_v27  ;;  %v4744_v56 = vld [vmem:[%s7394_s3 + $0x48] sm:$0xff] }
 0x10b   :  { %v1046_v16 = vadd.f32 %v1045_v44, %v1017_v26  ;;  %v1293_v5 = vmax.f32 %v1073_v51, 0.0  ;;  %v4743_v51 = vld [vmem:[%s7394_s3 + $0x40] sm:$0xff] }
 0x10c   :  { %1469 = vmatpush.bf16.msrb.mxu3 %v4748_v17 }
 0x110   :  { %v1074_v30 = vpop.f32.mrf.mxu2  ;;  %v1019_v59 = vpop.f32.mrf.mxu0  ;;  %1470 = vmatpush.bf16.msrb.mxu3 %v4747_v36 }
 0x111   :  { %v1075_v20 = vadd.f32 %v1074_v30, %v1046_v16  ;;  %v1048_v63 = vpop.f32.mrf.mxu1  ;;  %v1020_v42 = vadd.f32 %v1019_v59, %v991_v48 }
 0x113   :  { %v1295_v4 = vmax.f32 %v1075_v20, 0.0  ;;  %1250 = vmatmul.bf16.gmra.mxu0 %v5815_v57  ;;  %v6025_v57 = vperm.slane %v5838_v1, 1  ;;  %v1049_v9 = vadd.f32 %v1048_v63, %v1020_v42 }
 0x114   :  { %1279 = vmatmul.bf16.gmra.mxu1 %v5817_v58  ;;  %v6030_v58 = vpop.f32.mrf.mxu3  ;;  %1471 = vmatpush.bf16.msrb.mxu3 %v4746_v23 }
 0x115   :  { %v1305_v10 = vpack.c.bf16 %v1295_v4, %v1293_v5  ;;  %v1092_v29 = vadd.f32 %v1091_v38, %v6025_v57  ;;  %v1097_v22 = vadd.f32 %v1096_v43, %v6025_v57  ;;  %v1094_v2 = vadd.f32 %v6011_v6, %v6025_v57 }
 0x117   :  { %1456 = vmatmul.bf16.gmra.mxu2 %v1305_v10 }
 0x118   :  { %v1077_v45 = vpop.f32.mrf.mxu2  ;;  %v1021_v3 = vpop.f32.mrf.mxu0  ;;  %1472 = vmatpush.bf16.msrb.mxu3 %v4745_v32 }
 0x119   :  { %v1050_v28 = vpop.f32.mrf.mxu1  ;;  %v1022_v8 = vadd.f32 %v1021_v3, %v993_v31  ;;  %v1078_v39 = vadd.f32 %v1077_v45, %v1049_v9 }
 0x11b   :  { %v1051_v0 = vadd.f32 %v1050_v28, %v1022_v8  ;;  %v1297_v14 = vmax.f32 %v1078_v39, 0.0 }
 0x11c   :  { %v1101_v25 = vpop.f32.mrf.mxu3  ;;  %1473 = vmatpush.bf16.msrb.mxu3 %v4744_v56 }
 0x11d   :  { %v1102_v37 = vadd.f32 %v1101_v25, %v6025_v57 }
 0x120   :  { %v1079_v41 = vpop.f32.mrf.mxu2  ;;  %v1120_v11 = vpop.f32.mrf.mxu0  ;;  %1474 = vmatpush.bf16.msrb.mxu3 %v4743_v51 }
 0x121   :  { %v1080_v60 = vadd.f32 %v1079_v41, %v1051_v0  ;;  %v1121_v13 = vadd.f32 %v1120_v11, %v1092_v29  ;;  %v1149_v1 = vpop.f32.mrf.mxu1  ;;  %v1099_v11 = vadd.f32 %v6030_v58, %v6025_v57 }
 0x123   :  { %v1299_v61 = vmax.f32 %v1080_v60, 0.0  ;;  %v1150_v15 = vadd.f32 %v1149_v1, %v1121_v13 }
 0x124   :  { %v6040_v38 = vpop.f32.mrf.mxu3 }
 0x125   :  { %v1307_v24 = vpack.c.bf16 %v1299_v61, %v1297_v14 }
 0x127   :  { %1461 = vmatmul.bf16.gmra.mxu2 %v1307_v24 }
 0x128   :  { %v1122_v49 = vpop.f32.mrf.mxu0  ;;  %v1178_v46 = vpop.f32.mrf.mxu2 }
 0x129   :  { %v1151_v62 = vpop.f32.mrf.mxu1  ;;  %v1123_v27 = vadd.f32 %v1122_v49, %v1094_v2  ;;  %v1179_v48 = vadd.f32 %v1178_v46, %v1150_v15 }
 0x12b   :  { %v1152_v31 = vadd.f32 %v1151_v62, %v1123_v27 }
 0x12c   :  { %v1106_v21 = vpop.f32.mrf.mxu3 }
 0x12d   :  { %v1107_v18 = vadd.f32 %v1106_v21, %v6025_v57 }
 0x130   :  { %v1125_v12 = vpop.f32.mrf.mxu0  ;;  %v1180_v50 = vpop.f32.mrf.mxu2 }
 0x131   :  { %v1126_v33 = vadd.f32 %v1125_v12, %v1097_v22  ;;  %v1154_v34 = vpop.f32.mrf.mxu1  ;;  %v1181_v8 = vadd.f32 %v1180_v50, %v1152_v31 }
 0x133   :  { %v1155_v35 = vadd.f32 %v1154_v34, %v1126_v33 }
 0x134   :  { %v6051_v7 = vpop.f32.mrf.mxu3 }
 0x138   :  { %v1127_v40 = vpop.f32.mrf.mxu0  ;;  %v1183_v10 = vpop.f32.mrf.mxu2 }
 0x139   :  { %v1156_v19 = vpop.f32.mrf.mxu1  ;;  %v1128_v1 = vadd.f32 %v1127_v40, %v1099_v11  ;;  %v1184_v15 = vadd.f32 %v1183_v10, %v1155_v35  ;;  %v1104_v40 = vadd.f32 %v6040_v38, %v6025_v57 }
 0x13b   :  { %v1157_v25 = vadd.f32 %v1156_v19, %v1128_v1  ;;  %v4755_v1 = vld [vmem:[%s7394_s3 + $0xa0] sm:$0xff] }
 0x13c   :  { %v1207_v16 = vpop.f32.mrf.mxu3 }
 0x13d   :  { %v1208_v28 = vadd.f32 %v1207_v16, %v1179_v48 }
 0x140   :  { %v1130_v47 = vpop.f32.mrf.mxu0  ;;  %v1185_v29 = vpop.f32.mrf.mxu2 }
 0x141   :  { %v1131_v53 = vadd.f32 %v1130_v47, %v1102_v37  ;;  %v1159_v52 = vpop.f32.mrf.mxu1  ;;  %v1186_v22 = vadd.f32 %v1185_v29, %v1157_v25  ;;  %v4758_v29 = vld [vmem:[%s7394_s3 + $0xb8] sm:$0xff]  ;;  %v4752_v25 = vld [vmem:[%s7394_s3 + $0x88] sm:$0xff] }
 0x142   :  { %1573 = vmatpush.bf16.msra.mxu0 %v4758_v29 }
 0x143   :  { %v6049_v55 = vadd.f32 %v1159_v52, %v1131_v53 }
 0x144   :  { %v1209_v43 = vpop.f32.mrf.mxu3 }
 0x145   :  { %v1210_v9 = vadd.f32 %v1209_v43, %v1181_v8 }
 0x148   :  { %v1132_v44 = vpop.f32.mrf.mxu0  ;;  %v1188_v62 = vpop.f32.mrf.mxu2 }
 0x149   :  { %v6056_v26 = vpop.f32.mrf.mxu1  ;;  %v1133_v47 = vadd.f32 %v1132_v44, %v1104_v40  ;;  %v1189_v52 = vadd.f32 %v1188_v62, %v6049_v55  ;;  %v1109_v55 = vadd.f32 %v6051_v7, %v6025_v57 }
 0x14b   :  { %v1162_v51 = vadd.f32 %v6056_v26, %v1133_v47 }
 0x14c   :  { %v1212_v3 = vpop.f32.mrf.mxu3 }
 0x14d   :  { %v1213_v36 = vadd.f32 %v1212_v3, %v1184_v15 }
 0x150   :  { %v1135_v30 = vpop.f32.mrf.mxu0  ;;  %v1190_v35 = vpop.f32.mrf.mxu2 }
 0x151   :  { %v1136_v20 = vadd.f32 %v1135_v30, %v1107_v18  ;;  %v1164_v59 = vpop.f32.mrf.mxu1 }
 0x153   :  { %v6062_v63 = vadd.f32 %v1164_v59, %v1136_v20  ;;  %v1191_v20 = vadd.f32 %v1190_v35, %v1162_v51 }
 0x154   :  { %v1214_v13 = vpop.f32.mrf.mxu3 }
 0x155   :  { %v1215_v34 = vadd.f32 %v1214_v13, %v1186_v22 }
 0x158   :  { %v6064_v5 = vpop.f32.mrf.mxu0  ;;  %v1193_v50 = vpop.f32.mrf.mxu2 }
 0x159   :  { %v6066_v4 = vpop.f32.mrf.mxu1 }
 0x15c   :  { %v1217_v33 = vpop.f32.mrf.mxu3 }
 0x15d   :  { %v1218_v30 = vadd.f32 %v1217_v33, %v1189_v52 }
 0x160   :  { %v1236_v45 = vpop.f32.mrf.mxu0 }
 0x161   :  { %v1265_v42 = vpop.f32.mrf.mxu1  ;;  %v1237_v54 = vadd.f32 %v1236_v45, %v1208_v28  ;;  %v1138_v45 = vadd.f32 %v6064_v5, %v1109_v55  ;;  %v1195_v28 = vpop.f32.mrf.mxu2  ;;  %v4757_v5 = vld [vmem:[%s7394_s3 + $0xb0] sm:$0xff]  ;;  %v4774_v55 = vld [vmem:[%s7391_s2 + $0x3f4] sm:$0xf0] }
 0x162   :  { %1574 = vmatpush.bf16.msra.mxu0 %v4757_v5  ;;  %v4020_v5 = vld [vmem:[%s7391_s2 + $0x3c8] sm:$0xf0] }
 0x163   :  { %v1266_v0 = vadd.f32 %v1265_v42, %v1237_v54  ;;  %v1194_v42 = vadd.f32 %v1193_v50, %v6062_v63  ;;  %v1167_v54 = vadd.f32 %v6066_v4, %v1138_v45  ;;  %v4756_v4 = vld [vmem:[%s7394_s3 + $0xa8] sm:$0xff]  ;;  %v4044_v50 = vld [vmem:[%s7391_s2 + $0x3f8] sm:$0xf0] }
 0x164   :  { %v1219_v46 = vpop.f32.mrf.mxu3 }
 0x165   :  { %v1286_v14 = vmax.f32 %v1266_v0, 0.0  ;;  %v1220_v43 = vadd.f32 %v1219_v46, %v1191_v20  ;;  %v1196_v57 = vadd.f32 %v1195_v28, %v1167_v54  ;;  %v4026_v54 = vld [vmem:[%s7391_s2 + $0x3d0] sm:$0xf] }
 0x166   :  { %1575 = vmatpush.bf16.msra.mxu0 %v4756_v4  ;;  %v4018_v4 = vld [vmem:[%s7391_s2 + $0x3c0] sm:$0xf] }
 0x168   :  { %v1238_v39 = vpop.f32.mrf.mxu0 }
 0x169   :  { %v1239_v41 = vadd.f32 %v1238_v39, %v1210_v9  ;;  %v1267_v60 = vpop.f32.mrf.mxu1 }
 0x16a   :  { %1576 = vmatpush.bf16.msra.mxu0 %v4755_v1 }
 0x16b   :  { %v1268_v6 = vadd.f32 %v1267_v60, %v1239_v41 }
 0x16c   :  { %v1222_v10 = vpop.f32.mrf.mxu3 }
 0x16d   :  { %v1288_v61 = vmax.f32 %v1268_v6, 0.0  ;;  %v1223_v39 = vadd.f32 %v1222_v10, %v1194_v42  ;;  %v4042_v10 = vld [vmem:[%s7391_s2 + $0x3f0] sm:$0xf]  ;;  %v4769_v42 = vld [vmem:[%s7391_s2 + $0x3d4] sm:$0xf] }
 0x16e   :  { %v4043_v45 = vor.u32 %v4774_v55, %v4042_v10 }
 0x16f   :  { %v1302_v17 = vpack.c.bf16 %v1288_v61, %v1286_v14 }
 0x170   :  { %v1241_v24 = vpop.f32.mrf.mxu0  ;;  %1717 = vmatpush.bf16.msra.mxu1 %v4043_v45 }
 0x171   :  { %v1270_v49 = vpop.f32.mrf.mxu1  ;;  %1475 = vmatmul.bf16.vlgmr.msrb.gmra.mxu3 %v1302_v17  ;;  %v1242_v12 = vadd.f32 %v1241_v24, %v1213_v36  ;;  %v4754_v17 = vld [vmem:[%s7394_s3 + $0x98] sm:$0xff]  ;;  %v4753_v24 = vld [vmem:[%s7394_s3 + $0x90] sm:$0xff] }
 0x172   :  { %1577 = vmatpush.bf16.msra.mxu0 %v4754_v17 }
 0x173   :  { %v1271_v21 = vadd.f32 %v1270_v49, %v1242_v12  ;;  %v4751_v49 = vld [vmem:[%s7394_s3 + $0x80] sm:$0xff] }
 0x174   :  { %v1224_v7 = vpop.f32.mrf.mxu3  ;;  %v6108_v12 = vld [vmem:[%s7393_s5 + $0x1] ss:$0 sm:$0xff] }
 0x175   :  { %v1290_v53 = vmax.f32 %v1271_v21, 0.0  ;;  %v1225_v0 = vadd.f32 %v1224_v7, %v1196_v57  ;;  %v4767_v7 = vld [vmem:[%s7391_s2 + $0x3c4] sm:$0xf] }
 0x176   :  { %1578 = vmatpush.bf16.msra.mxu0 %v4753_v24 }
 0x178   :  { %v1243_v23 = vpop.f32.mrf.mxu0 }
 0x179   :  { %v1244_v58 = vadd.f32 %v1243_v23, %v1215_v34  ;;  %v1272_v32 = vpop.f32.mrf.mxu1 }
 0x17a   :  { %1579 = vmatpush.bf16.msra.mxu0 %v4752_v25  ;;  %v1447_v62 = vpop.f32.mrf.mxu2  ;;  %v4763_v25 = vld [vmem:[%s7391_s2 + $0x3a4] sm:$0xf] }
 0x17b   :  { %v1273_v37 = vadd.f32 %v1272_v32, %v1244_v58  ;;  %v1448_v34 = vadd.f32 %v1447_v62, %v6108_v12 }
 0x17d   :  { %v1292_v19 = vmax.f32 %v1273_v37, 0.0 }
 0x17e   :  { %1580 = vmatpush.bf16.msra.mxu0 %v4751_v49  ;;  %v4004_v49 = vld [vmem:[%s7391_s2 + $0x3a8] sm:$0xf0] }
 0x17f   :  { %v1304_v56 = vpack.c.bf16 %v1292_v19, %v1290_v53 }
 0x180   :  { %v1246_v18 = vpop.f32.mrf.mxu0 }
 0x181   :  { %v1275_v16 = vpop.f32.mrf.mxu1  ;;  %1480 = vmatmul.bf16.gmra.mxu3 %v1304_v56  ;;  %v1247_v59 = vadd.f32 %v1246_v18, %v1218_v30 }
 0x182   :  { %v1449_v36 = vpop.f32.mrf.mxu2 }
 0x183   :  { %v1276_v2 = vadd.f32 %v1275_v16, %v1247_v59  ;;  %v1450_v23 = vadd.f32 %v1449_v36, %v6108_v12  ;;  %v4773_v59 = vld [vmem:[%s7391_s2 + $0x3f4] sm:$0xf]  ;;  %v4007_v36 = vor.u32 %v4763_v25, %v4004_v49  ;;  %v4778_v25 = vld [vmem:[%s7394_s3 + $0xd8] sm:$0xff] }
 0x184   :  { %v4777_v49 = vld [vmem:[%s7394_s3 + $0xd0] sm:$0xff] }
 0x185   :  { %v1294_v31 = vmax.f32 %v1276_v2, 0.0 }
 0x188   :  { %v1248_v38 = vpop.f32.mrf.mxu0 }
 0x189   :  { %v1249_v27 = vadd.f32 %v1248_v38, %v1220_v43  ;;  %v1277_v44 = vpop.f32.mrf.mxu1  ;;  %v4771_v43 = vld [vmem:[%s7391_s2 + $0x3e4] sm:$0xf] }
 0x18a   :  { %v1452_v33 = vpop.f32.mrf.mxu2 }
 0x18b   :  { %v1278_v48 = vadd.f32 %v1277_v44, %v1249_v27  ;;  %v1453_v19 = vadd.f32 %v1452_v33, %v6108_v12  ;;  %v4047_v27 = vor.u32 %v4773_v59, %v4044_v50  ;;  %v4036_v44 = vld [vmem:[%s7391_s2 + $0x3e8] sm:$0xf0]  ;;  %v3996_v33 = vld [vmem:[%s7391_s2 + $0x398] sm:$0xf0]  ;;  %v4762_v59 = vld [vmem:[%s7391_s2 + $0x394] sm:$0xf0] }
 0x18d   :  { %v1296_v26 = vmax.f32 %v1278_v48, 0.0  ;;  %1746 = vmatpush.bf16.msra.mxu2 %v4047_v27  ;;  %v4039_v48 = vor.u32 %v4771_v43, %v4036_v44  ;;  %v3986_v43 = vld [vmem:[%s7391_s2 + $0x380] sm:$0xf] }
 0x18e   :  { %v1524_v44 = vld [vmem:[%s7393_s5 + $0x2] ss:$0 sm:$0xff] }
 0x18f   :  { %v1306_v3 = vpack.c.bf16 %v1296_v26, %v1294_v31  ;;  %v4034_v31 = vld [vmem:[%s7391_s2 + $0x3e0] sm:$0xf]  ;;  %v4772_v26 = vld [vmem:[%s7391_s2 + $0x3e4] sm:$0xf0] }
 0x190   :  { %v1251_v8 = vpop.f32.mrf.mxu0  ;;  %v4035_v28 = vor.u32 %v4772_v26, %v4034_v31 }
 0x191   :  { %v1280_v9 = vpop.f32.mrf.mxu1  ;;  %1485 = vmatmul.bf16.gmra.mxu3 %v1306_v3  ;;  %v1252_v63 = vadd.f32 %v1251_v8, %v1223_v39  ;;  %v4028_v3 = vld [vmem:[%s7391_s2 + $0x3d8] sm:$0xf0]  ;;  %1747 = vmatpush.bf16.msra.mxu2 %v4039_v48 }
 0x192   :  { %v1454_v35 = vpop.f32.mrf.mxu2  ;;  %v4031_v29 = vor.u32 %v4769_v42, %v4028_v3  ;;  %1718 = vmatpush.bf16.msra.mxu1 %v4035_v28 }
 0x193   :  { %v1281_v60 = vadd.f32 %v1280_v9, %v1252_v63  ;;  %v1455_v56 = vadd.f32 %v1454_v35, %v6108_v12  ;;  %v4770_v9 = vld [vmem:[%s7391_s2 + $0x3d4] sm:$0xf0] }
 0x195   :  { %v1298_v14 = vmax.f32 %v1281_v60, 0.0  ;;  %v4768_v60 = vld [vmem:[%s7391_s2 + $0x3c4] sm:$0xf0]  ;;  %1748 = vmatpush.bf16.msra.mxu2 %v4031_v29 }
 0x198   :  { %v1253_v41 = vpop.f32.mrf.mxu0 }
 0x199   :  { %v1254_v11 = vadd.f32 %v1253_v41, %v1225_v0  ;;  %v1282_v6 = vpop.f32.mrf.mxu1  ;;  %v4027_v0 = vor.u32 %v4770_v9, %v4026_v54 }
 0x19a   :  { %v1457_v52 = vpop.f32.mrf.mxu2 }
 0x19b   :  { %v1283_v13 = vadd.f32 %v1282_v6, %v1254_v11  ;;  %v1458_v8 = vadd.f32 %v1457_v52, %v6108_v12  ;;  %v4023_v6 = vor.u32 %v4767_v7, %v4020_v5  ;;  %1719 = vmatpush.bf16.msra.mxu1 %v4027_v0  ;;  %v4766_v52 = vld [vmem:[%s7391_s2 + $0x3b4] sm:$0xf0]  ;;  %v4781_v7 = vld [vmem:[%s7394_s3 + $0xf0] sm:$0xff]  ;;  %v4780_v5 = vld [vmem:[%s7394_s3 + $0xe8] sm:$0xff] }
 0x19d   :  { %v1300_v61 = vmax.f32 %v1283_v13, 0.0  ;;  %1749 = vmatpush.bf16.msra.mxu2 %v4023_v6 }
 0x19f   :  { %v1308_v15 = vpack.c.bf16 %v1300_v61, %v1298_v14  ;;  %v4765_v14 = vld [vmem:[%s7391_s2 + $0x3b4] sm:$0xf]  ;;  %v4012_v61 = vld [vmem:[%s7391_s2 + $0x3b8] sm:$0xf0] }
 0x1a0   :  { %v4015_v24 = vor.u32 %v4765_v14, %v4012_v61 }
 0x1a1   :  { %1490 = vmatmul.bf16.gmra.mxu3 %v1308_v15  ;;  %v4019_v15 = vor.u32 %v4768_v60, %v4018_v4  ;;  %v4779_v4 = vld [vmem:[%s7394_s3 + $0xe0] sm:$0xff] }
 0x1a2   :  { %v1459_v38 = vpop.f32.mrf.mxu2  ;;  %1750 = vmatpush.bf16.msra.mxu2 %v4015_v24 }
 0x1a3   :  { %v1460_v39 = vadd.f32 %v1459_v38, %v6108_v12  ;;  %1720 = vmatpush.bf16.msra.mxu1 %v4019_v15  ;;  %v4760_v38 = vld [vmem:[%s7391_s2 + $0x384] sm:$0xf0] }
 0x1a6   :  { %1751 = vmatpush.bf16.msra.mxu2 %v4007_v36  ;;  %v3983_v36 = vld [vmem:[%s7393_s5 + $0x3] ss:$8 sm:$0x3] }
 0x1aa   :  { %v1462_v11 = vpop.f32.mrf.mxu2 }
 0x1f4   :  { %v1476_v22 = vpop.f32.mrf.mxu3 }
 0x1f5   :  { %v1477_v21 = vadd.f32 %v1476_v22, %v1448_v34  ;;  %v4761_v22 = vld [vmem:[%s7391_s2 + $0x394] sm:$0xf]  ;;  %v1464_v34 = vpop.f32.mrf.mxu2 }
 0x1f7   :  { %v1496_v40 = vmax.f32 %v1477_v21, 0.0  ;;  %v3999_v21 = vor.u32 %v4761_v22, %v3996_v33  ;;  %v4775_v22 = vld [vmem:[%s7394_s3 + $0xc0] sm:$0xff]  ;;  %v6244_v33 = vperm.slane %v3983_v36, 0 }
 0x1f9   :  { %1752 = vmatpush.bf16.msra.mxu2 %v3999_v21  ;;  %v6250_v21 = vperm.slane %v3983_v36, 1  ;;  %v4133_v36 = vld [vmem:[%s7391_s2 + $0x468] sm:$0xf0] }
 0x1fc   :  { %v1478_v58 = vpop.f32.mrf.mxu3 }
 0x1fd   :  { %v1479_v32 = vadd.f32 %v1478_v58, %v1450_v23  ;;  %v1463_v23 = vadd.f32 %v1462_v11, %v6108_v12  ;;  %v1465_v58 = vadd.f32 %v1464_v34, %v6108_v12  ;;  %v4002_v12 = vld [vmem:[%s7391_s2 + $0x3a0] sm:$0xf] }
 0x1ff   :  { %v1497_v37 = vmax.f32 %v1479_v32, 0.0 }
 0x201   :  { %v1504_v47 = vpack.c.bf16 %v1497_v37, %v1496_v40 }
 0x203   :  { %1581 = vmatmul.bf16.vlgmr.msra.gmra.mxu0 %v1504_v47 }
 0x204   :  { %v1481_v53 = vpop.f32.mrf.mxu3 }
 0x205   :  { %v1482_v46 = vadd.f32 %v1481_v53, %v1453_v19  ;;  %v4010_v19 = vld [vmem:[%s7391_s2 + $0x3b0] sm:$0xf] }
 0x207   :  { %v1498_v16 = vmax.f32 %v1482_v46, 0.0  ;;  %v4764_v46 = vld [vmem:[%s7391_s2 + $0x3a4] sm:$0xf0] }
 0x20c   :  { %v1483_v18 = vpop.f32.mrf.mxu3 }
 0x20d   :  { %v1484_v51 = vadd.f32 %v1483_v18, %v1455_v56  ;;  %v4011_v56 = vor.u32 %v4766_v52, %v4010_v19  ;;  %v4003_v18 = vor.u32 %v4764_v46, %v4002_v12  ;;  %v1791_v46 = vld [vmem:[%s7396_s1] sm:$0xff] }
 0x20f   :  { %v1499_v30 = vmax.f32 %v1484_v51, 0.0  ;;  %1721 = vmatpush.bf16.msra.mxu1 %v4011_v56  ;;  %v4759_v51 = vld [vmem:[%s7391_s2 + $0x384] sm:$0xf] }
 0x211   :  { %v1505_v20 = vpack.c.bf16 %v1499_v30, %v1498_v16  ;;  %v3988_v16 = vld [vmem:[%s7391_s2 + $0x388] sm:$0xf0] }
 0x212   :  { %v3991_v30 = vor.u32 %v4759_v51, %v3988_v16  ;;  %v1792_v51 = vld [vmem:[%s7396_s1 + $0x8] sm:$0xff] }
 0x213   :  { %1586 = vmatmul.bf16.gmra.mxu0 %v1505_v20  ;;  %1722 = vmatpush.bf16.msra.mxu1 %v4003_v18  ;;  %v3994_v20 = vld [vmem:[%s7391_s2 + $0x390] sm:$0xf] }
 0x214   :  { %v1486_v2 = vpop.f32.mrf.mxu3  ;;  %1753 = vmatpush.bf16.msra.mxu2 %v3991_v30  ;;  %v3995_v50 = vor.u32 %v4762_v59, %v3994_v20 }
 0x215   :  { %v1487_v57 = vadd.f32 %v1486_v2, %v1458_v8  ;;  %v3987_v2 = vor.u32 %v4760_v38, %v3986_v43 }
 0x217   :  { %v1500_v13 = vmax.f32 %v1487_v57, 0.0  ;;  %1723 = vmatpush.bf16.msra.mxu1 %v3995_v50 }
 0x21b   :  { %1724 = vmatpush.bf16.msra.mxu1 %v3987_v2 }
 0x21c   :  { %v1488_v63 = vpop.f32.mrf.mxu3 }
 0x21d   :  { %v1489_v41 = vadd.f32 %v1488_v63, %v1460_v39  ;;  %v4782_v39 = vld [vmem:[%s7394_s3 + $0xf8] sm:$0xff] }
 0x21e   :  { %1884 = vmatpush.bf16.msra.mxu3 %v4782_v39 }
 0x21f   :  { %v1501_v1 = vmax.f32 %v1489_v41, 0.0 }
 0x221   :  { %v1506_v17 = vpack.c.bf16 %v1501_v1, %v1500_v13 }
 0x222   :  { %1885 = vmatpush.bf16.msra.mxu3 %v4781_v7 }
 0x223   :  { %1591 = vmatmul.bf16.gmra.mxu0 %v1506_v17 }
 0x224   :  { %v1491_v62 = vpop.f32.mrf.mxu3 }
 0x225   :  { %v1492_v32 = vadd.f32 %v1491_v62, %v1463_v23  ;;  %v4776_v62 = vld [vmem:[%s7394_s3 + $0xc8] sm:$0xff] }
 0x226   :  { %1886 = vmatpush.bf16.msra.mxu3 %v4780_v5 }
 0x227   :  { %v1502_v35 = vmax.f32 %v1492_v32, 0.0 }
 0x22a   :  { %1887 = vmatpush.bf16.msra.mxu3 %v4779_v4 }
 0x22c   :  { %v1493_v40 = vpop.f32.mrf.mxu3 }
 0x22d   :  { %v1494_v37 = vadd.f32 %v1493_v40, %v1465_v58 }
 0x22e   :  { %1888 = vmatpush.bf16.msra.mxu3 %v4778_v25  ;;  %v4796_v25 = vld [vmem:[%s7391_s2 + $0x464] sm:$0xf0] }
 0x22f   :  { %v1503_v47 = vmax.f32 %v1494_v37, 0.0 }
 0x231   :  { %v1507_v53 = vpack.c.bf16 %v1503_v47, %v1502_v35 }
 0x232   :  { %1889 = vmatpush.bf16.msra.mxu3 %v4777_v49  ;;  %v4795_v49 = vld [vmem:[%s7391_s2 + $0x464] sm:$0xf] }
 0x233   :  { %1596 = vmatmul.bf16.gmra.mxu0 %v1507_v53 }
 0x236   :  { %1890 = vmatpush.bf16.msra.mxu3 %v4776_v62 }
 0x23a   :  { %1891 = vmatpush.bf16.msra.mxu3 %v4775_v22  ;;  %v4136_v22 = vor.u32 %v4795_v49, %v4133_v36  ;;  %v4085_v49 = vld [vmem:[%s7391_s2 + $0x408] sm:$0xf0] }
 0x280   :  { %v1582_v27 = vpop.f32.mrf.mxu0 }
 0x281   :  { %v1583_v10 = vadd.f32 %v1582_v27, %v1524_v44 }
 0x283   :  { %v1602_v45 = vmax.f32 %v1583_v10, 0.0 }
 0x288   :  { %v1584_v55 = vpop.f32.mrf.mxu0 }
 0x289   :  { %v1585_v48 = vadd.f32 %v1584_v55, %v1524_v44 }
 0x28b   :  { %v1603_v31 = vmax.f32 %v1585_v48, 0.0 }
 0x28d   :  { %v1610_v26 = vpack.c.bf16 %v1603_v31, %v1602_v45 }
 0x28f   :  { %1725 = vmatmul.bf16.vlgmr.msra.gmra.mxu1 %v1610_v26  ;;  %1754 = vmatmul.bf16.vlgmr.msra.gmra.mxu2 %v1610_v26 }
 0x290   :  { %v1587_v42 = vpop.f32.mrf.mxu0 }
 0x291   :  { %v1588_v3 = vadd.f32 %v1587_v42, %v1524_v44  ;;  %v1793_v42 = vld [vmem:[%s7396_s1 + $0x10] sm:$0xff] }
 0x293   :  { %v1604_v54 = vmax.f32 %v1588_v3, 0.0 }
 0x298   :  { %v1589_v28 = vpop.f32.mrf.mxu0 }
 0x299   :  { %v1590_v8 = vadd.f32 %v1589_v28, %v1524_v44 }
 0x29b   :  { %v1605_v9 = vmax.f32 %v1590_v8, 0.0  ;;  %v1794_v8 = vld [vmem:[%s7396_s1 + $0x18] sm:$0xff] }
 0x29d   :  { %v1611_v29 = vpack.c.bf16 %v1605_v9, %v1604_v54 }
 0x29f   :  { %1730 = vmatmul.bf16.gmra.mxu1 %v1611_v29  ;;  %1759 = vmatmul.bf16.gmra.mxu2 %v1611_v29 }
 0x2a0   :  { %v1592_v57 = vpop.f32.mrf.mxu0 }
 0x2a1   :  { %v1593_v63 = vadd.f32 %v1592_v57, %v1524_v44 }
 0x2a3   :  { %v1606_v60 = vmax.f32 %v1593_v63, 0.0 }
 0x2a8   :  { %v1594_v0 = vpop.f32.mrf.mxu0 }
 0x2a9   :  { %v1595_v41 = vadd.f32 %v1594_v0, %v1524_v44 }
 0x2ab   :  { %v1607_v11 = vmax.f32 %v1595_v41, 0.0 }
 0x2ad   :  { %v1612_v6 = vpack.c.bf16 %v1607_v11, %v1606_v60  ;;  %v4139_v11 = vld [vmem:[%s7391_s2 + $0x470] sm:$0xf] }
 0x2af   :  { %1735 = vmatmul.bf16.gmra.mxu1 %v1612_v6  ;;  %1764 = vmatmul.bf16.gmra.mxu2 %v1612_v6  ;;  %v4798_v6 = vld [vmem:[%s7391_s2 + $0x474] sm:$0xf0] }
 0x2b0   :  { %v1597_v13 = vpop.f32.mrf.mxu0 }
 0x2b1   :  { %v1598_v1 = vadd.f32 %v1597_v13, %v1524_v44  ;;  %v4797_v13 = vld [vmem:[%s7391_s2 + $0x474] sm:$0xf] }
 0x2b3   :  { %v1608_v15 = vmax.f32 %v1598_v1, 0.0 }
 0x2b8   :  { %v1599_v14 = vpop.f32.mrf.mxu0 }
 0x2b9   :  { %v1600_v61 = vadd.f32 %v1599_v14, %v1524_v44 }
 0x2bb   :  { %v1609_v17 = vmax.f32 %v1600_v61, 0.0  ;;  %v4140_v61 = vor.u32 %v4798_v6, %v4139_v11 }
 0x2bd   :  { %v1613_v24 = vpack.c.bf16 %v1609_v17, %v1608_v15  ;;  %v4141_v15 = vld [vmem:[%s7391_s2 + $0x478] sm:$0xf0]  ;;  %2028 = vmatpush.bf16.msrb.mxu0 %v4140_v61 }
 0x2be   :  { %v4144_v17 = vor.u32 %v4797_v13, %v4141_v15  ;;  %v4093_v61 = vld [vmem:[%s7391_s2 + $0x418] sm:$0xf0]  ;;  %v4083_v15 = vld [vmem:[%s7391_s2 + $0x400] sm:$0xf] }
 0x2bf   :  { %1740 = vmatmul.bf16.gmra.mxu1 %v1613_v24  ;;  %1769 = vmatmul.bf16.gmra.mxu2 %v1613_v24  ;;  %v4131_v24 = vld [vmem:[%s7391_s2 + $0x460] sm:$0xf] }
 0x2c0   :  { %v4132_v62 = vor.u32 %v4796_v25, %v4131_v24  ;;  %2057 = vmatpush.bf16.msrb.mxu1 %v4144_v17  ;;  %v4783_v25 = vld [vmem:[%s7391_s2 + $0x404] sm:$0xf] }
 0x2c2   :  { %2029 = vmatpush.bf16.msrb.mxu0 %v4132_v62  ;;  %v4088_v62 = vor.u32 %v4783_v25, %v4085_v49  ;;  %v4823_v25 = vld [vmem:[%s7397_s4 + $0xc0] sm:$0xf0] }
 0x2c4   :  { %2058 = vmatpush.bf16.msrb.mxu1 %v4136_v22  ;;  %v6443_v22 = vld [vmem:[%s7393_s5 + $0x4] ss:$0 sm:$0xff] }
 0x30c   :  { %v1726_v34 = vpop.f32.mrf.mxu1 }
 0x30d   :  { %v1727_v23 = vadd.f32 %v1726_v34, %v6244_v33  ;;  %v4123_v34 = vld [vmem:[%s7391_s2 + $0x450] sm:$0xf] }
 0x30f   :  { %3239 = vst [vmem:[%s7395_s6] sm:$0xff] %v1727_v23 }
 0x312   :  { %v1755_v58 = vpop.f32.mrf.mxu2 }
 0x313   :  { %v1756_v32 = vadd.f32 %v1755_v58, %v6250_v21 }
 0x314   :  { %v1728_v40 = vpop.f32.mrf.mxu1 }
 0x315   :  { %3240 = vst [vmem:[%s7395_s6 + $0x8] sm:$0xff] %v1756_v32  ;;  %v1729_v37 = vadd.f32 %v1728_v40, %v6244_v33  ;;  %v1775_v35 = vmul.f32 1.442695, %v1756_v32  ;;  %v1795_v32 = vld [vmem:[%s7396_s1 + $0x20] sm:$0xff]  ;;  %v4793_v40 = vld [vmem:[%s7391_s2 + $0x454] sm:$0xf] }
 0x317   :  { %3241 = vst [vmem:[%s7395_s6 + $0x10] sm:$0xff] %v1729_v37  ;;  %4911 = vpow2.f32 %v1775_v35 }
 0x31a   :  { %v1757_v47 = vpop.f32.mrf.mxu2 }
 0x31b   :  { %v1758_v53 = vadd.f32 %v1757_v47, %v6250_v21 }
 0x31c   :  { %v1731_v19 = vpop.f32.mrf.mxu1 }
 0x31d   :  { %v1777_v52 = vmul.f32 1.442695, %v1758_v53  ;;  %3242 = vst [vmem:[%s7395_s6 + $0x18] sm:$0xff] %v1758_v53  ;;  %v1732_v56 = vadd.f32 %v1731_v19, %v6244_v33  ;;  %v4912_v12 = vpop.eup %4911  ;;  %v1796_v53 = vld [vmem:[%s7396_s1 + $0x28] sm:$0xff] }
 0x31e   :  { %v1799_v30 = vmul.f32 %v4912_v12, %v1791_v46  ;;  %v4115_v46 = vld [vmem:[%s7391_s2 + $0x440] sm:$0xf] }
 0x31f   :  { %4913 = vpow2.f32 %v1777_v52  ;;  %3243 = vst [vmem:[%s7395_s6 + $0x20] sm:$0xff] %v1732_v56 }
 0x320   :  { %v1807_v2 = vadd.f32 %v1799_v30, %v1727_v23  ;;  %v4794_v23 = vld [vmem:[%s7391_s2 + $0x454] sm:$0xf0]  ;;  %v4791_v30 = vld [vmem:[%s7391_s2 + $0x444] sm:$0xf] }
 0x321   :  { %v4124_v19 = vor.u32 %v4794_v23, %v4123_v34 }
 0x322   :  { %v1760_v18 = vpop.f32.mrf.mxu2 }
 0x323   :  { %v1761_v16 = vadd.f32 %v1760_v18, %v6250_v21  ;;  %v4792_v18 = vld [vmem:[%s7391_s2 + $0x444] sm:$0xf0]  ;;  %2030 = vmatpush.bf16.msrb.mxu0 %v4124_v19 }
 0x324   :  { %v1733_v20 = vpop.f32.mrf.mxu1 }
 0x325   :  { %v4914_v59 = vpop.eup %4913  ;;  %3244 = vst [vmem:[%s7395_s6 + $0x28] sm:$0xff] %v1761_v16  ;;  %v1734_v50 = vadd.f32 %v1733_v20, %v6244_v33  ;;  %v1779_v38 = vmul.f32 1.442695, %v1761_v16  ;;  %v4117_v20 = vld [vmem:[%s7391_s2 + $0x448] sm:$0xf0] }
 0x326   :  { %v1800_v43 = vmul.f32 %v4914_v59, %v1792_v51 }
 0x327   :  { %3245 = vst [vmem:[%s7395_s6 + $0x30] sm:$0xff] %v1734_v50  ;;  %4915 = vpow2.f32 %v1779_v38 }
 0x328   :  { %v1808_v27 = vadd.f32 %v1800_v43, %v1729_v37  ;;  %v4125_v37 = vld [vmem:[%s7391_s2 + $0x458] sm:$0xf0]  ;;  %v4116_v43 = vor.u32 %v4792_v18, %v4115_v46  ;;  %v4345_v46 = vld [vmem:[%s7397_s4 + $0x188] sm:$0xf]  ;;  %v4851_v18 = vld [vmem:[%s7397_s4 + $0x1a0] sm:$0xf0] }
 0x329   :  { %v4128_v12 = vor.u32 %v4793_v40, %v4125_v37 }
 0x32a   :  { %v1762_v44 = vpop.f32.mrf.mxu2  ;;  %v1815_v10 = vpack.c.bf16 %v1808_v27, %v1807_v2  ;;  %v4107_v27 = vld [vmem:[%s7391_s2 + $0x430] sm:$0xf]  ;;  %2031 = vmatpush.bf16.msrb.mxu0 %v4116_v43 }
 0x32b   :  { %v1763_v55 = vadd.f32 %v1762_v44, %v6250_v21  ;;  %2059 = vmatpush.bf16.msrb.mxu1 %v4128_v12  ;;  %v4790_v44 = vld [vmem:[%s7391_s2 + $0x434] sm:$0xf0] }
 0x32c   :  { %v1736_v48 = vpop.f32.mrf.mxu1  ;;  %1892 = vmatmul.bf16.vlgmr.msra.gmra.mxu3 %v1815_v10  ;;  %v4789_v10 = vld [vmem:[%s7391_s2 + $0x434] sm:$0xf] }
 0x32d   :  { %v1781_v45 = vmul.f32 1.442695, %v1763_v55  ;;  %3246 = vst [vmem:[%s7395_s6 + $0x38] sm:$0xff] %v1763_v55  ;;  %v6287_v31 = vadd.f32 %v1736_v48, %v6244_v33  ;;  %v4916_v26 = vpop.eup %4915  ;;  %v4109_v55 = vld [vmem:[%s7391_s2 + $0x438] sm:$0xf0] }
 0x32e   :  { %v1801_v9 = vmul.f32 %v4916_v26, %v1793_v42  ;;  %v4108_v26 = vor.u32 %v4790_v44, %v4107_v27  ;;  %v4112_v42 = vor.u32 %v4789_v10, %v4109_v55  ;;  %v4289_v44 = vld [vmem:[%s7397_s4 + $0x118] sm:$0xf]  ;;  %v4837_v10 = vld [vmem:[%s7397_s4 + $0x130] sm:$0xf0] }
 0x32f   :  { %4917 = vpow2.f32 %v1781_v45  ;;  %3247 = vst [vmem:[%s7395_s6 + $0x40] sm:$0xff] %v6287_v31  ;;  %v4513_v55 = vld [vmem:[%s7397_s4 + $0x2d8] sm:$0xf] }
 0x330   :  { %v1809_v5 = vadd.f32 %v1801_v9, %v1732_v56  ;;  %2032 = vmatpush.bf16.msrb.mxu0 %v4108_v26  ;;  %v4290_v26 = vor.u32 %v4837_v10, %v4289_v44  ;;  %v4820_v10 = vld [vmem:[%s7397_s4 + $0xac] sm:$0xf] }
 0x332   :  { %v1765_v3 = vpop.f32.mrf.mxu2 }
 0x333   :  { %v1766_v28 = vadd.f32 %v1765_v3, %v6250_v21  ;;  %v4099_v3 = vld [vmem:[%s7391_s2 + $0x420] sm:$0xf] }
 0x334   :  { %v1738_v54 = vpop.f32.mrf.mxu1 }
 0x335   :  { %v4918_v29 = vpop.eup %4917  ;;  %3248 = vst [vmem:[%s7395_s6 + $0x48] sm:$0xff] %v1766_v28  ;;  %v1739_v39 = vadd.f32 %v1738_v54, %v6244_v33  ;;  %v1783_v7 = vmul.f32 1.442695, %v1766_v28  ;;  %v4788_v28 = vld [vmem:[%s7391_s2 + $0x424] sm:$0xf0] }
 0x336   :  { %v1802_v57 = vmul.f32 %v4918_v29, %v1794_v8  ;;  %v4787_v8 = vld [vmem:[%s7391_s2 + $0x424] sm:$0xf]  ;;  %v4100_v9 = vor.u32 %v4788_v28, %v4099_v3  ;;  %v4904_v28 = vld [vmem:[%s7397_s4 + $0x34c] sm:$0xf] }
 0x337   :  { %3249 = vst [vmem:[%s7395_s6 + $0x50] sm:$0xff] %v1739_v39  ;;  %4919 = vpow2.f32 %v1783_v7 }
 0x338   :  { %v1810_v63 = vadd.f32 %v1802_v57, %v1734_v50  ;;  %v4786_v57 = vld [vmem:[%s7391_s2 + $0x414] sm:$0xf0]  ;;  %2033 = vmatpush.bf16.msrb.mxu0 %v4100_v9  ;;  %v4830_v9 = vld [vmem:[%s7397_s4 + $0xf8] sm:$0xf0] }
 0x33a   :  { %v1767_v0 = vpop.f32.mrf.mxu2  ;;  %v1816_v41 = vpack.c.bf16 %v1810_v63, %v1809_v5  ;;  %v1797_v5 = vld [vmem:[%s7396_s1 + $0x30] sm:$0xff]  ;;  %v1798_v63 = vld [vmem:[%s7396_s1 + $0x38] sm:$0xff] }
 0x33b   :  { %v1768_v4 = vadd.f32 %v1767_v0, %v6250_v21 }
 0x33c   :  { %v1741_v60 = vpop.f32.mrf.mxu1  ;;  %1897 = vmatmul.bf16.gmra.mxu3 %v1816_v41 }
 0x33d   :  { %v1785_v1 = vmul.f32 1.442695, %v1768_v4  ;;  %3250 = vst [vmem:[%s7395_s6 + $0x58] sm:$0xff] %v1768_v4  ;;  %v6321_v14 = vadd.f32 %v1741_v60, %v6244_v33  ;;  %v4920_v58 = vpop.eup %4919 }
 0x33e   :  { %v1803_v56 = vmul.f32 %v4920_v58, %v1795_v32 }
 0x33f   :  { %4921 = vpow2.f32 %v1785_v1  ;;  %3251 = vst [vmem:[%s7395_s6 + $0x60] sm:$0xff] %v6321_v14  ;;  %v4785_v1 = vld [vmem:[%s7391_s2 + $0x414] sm:$0xf] }
 0x340   :  { %v1811_v38 = vadd.f32 %v1803_v56, %v6287_v31  ;;  %v4096_v17 = vor.u32 %v4785_v1, %v4093_v61  ;;  %v4890_v61 = vld [vmem:[%s7397_s4 + $0x2dc] sm:$0xf] }
 0x342   :  { %v1770_v35 = vpop.f32.mrf.mxu2 }
 0x343   :  { %v1771_v47 = vadd.f32 %v1770_v35, %v6250_v21 }
 0x344   :  { %v1743_v52 = vpop.f32.mrf.mxu1 }
 0x345   :  { %v4922_v51 = vpop.eup %4921  ;;  %3252 = vst [vmem:[%s7395_s6 + $0x68] sm:$0xff] %v1771_v47  ;;  %v1744_v16 = vadd.f32 %v1743_v52, %v6244_v33  ;;  %v1787_v50 = vmul.f32 1.442695, %v1771_v47  ;;  %v4120_v33 = vor.u32 %v4791_v30, %v4117_v20  ;;  %v4346_v30 = vor.u32 %v4851_v18, %v4345_v46  ;;  %v4907_v20 = vld [vmem:[%s7397_s4 + $0x360] sm:$0xf0] }
 0x346   :  { %v1804_v59 = vmul.f32 %v4922_v51, %v1796_v53  ;;  %v4569_v51 = vld [vmem:[%s7397_s4 + $0x348] sm:$0xf]  ;;  %v4429_v46 = vld [vmem:[%s7397_s4 + $0x230] sm:$0xf]  ;;  %v4872_v18 = vld [vmem:[%s7397_s4 + $0x248] sm:$0xf0] }
 0x347   :  { %3253 = vst [vmem:[%s7395_s6 + $0x70] sm:$0xff] %v1744_v16  ;;  %4923 = vpow2.f32 %v1787_v50  ;;  %2060 = vmatpush.bf16.msrb.mxu1 %v4120_v33  ;;  %v4844_v50 = vld [vmem:[%s7397_s4 + $0x168] sm:$0xf0]  ;;  %v4570_v43 = vor.u32 %v4907_v20, %v4569_v51  ;;  %2833 = vmatpush.bf16.msrb.mxu2 %v4346_v30  ;;  %v4177_v30 = vld [vmem:[%s7397_s4 + $0x38] sm:$0xf] }
 0x348   :  { %v1812_v2 = vadd.f32 %v1804_v59, %v1739_v39  ;;  %v4091_v39 = vld [vmem:[%s7391_s2 + $0x410] sm:$0xf]  ;;  %v4809_v20 = vld [vmem:[%s7397_s4 + $0x50] sm:$0xf0] }
 0x349   :  { %v4092_v0 = vor.u32 %v4786_v57, %v4091_v39  ;;  %v4317_v59 = vld [vmem:[%s7397_s4 + $0x150] sm:$0xf]  ;;  %2862 = vmatpush.bf16.msrb.mxu3 %v4570_v43  ;;  %v4841_v39 = vld [vmem:[%s7397_s4 + $0x154] sm:$0xf] }
 0x34a   :  { %v1772_v48 = vpop.f32.mrf.mxu2  ;;  %v1817_v45 = vpack.c.bf16 %v1812_v2, %v1811_v38  ;;  %v4541_v38 = vld [vmem:[%s7397_s4 + $0x310] sm:$0xf]  ;;  %v4900_v2 = vld [vmem:[%s7397_s4 + $0x328] sm:$0xf0]  ;;  %v4318_v33 = vor.u32 %v4844_v50, %v4317_v59  ;;  %v4430_v59 = vor.u32 %v4872_v18, %v4429_v46  ;;  %v4178_v50 = vor.u32 %v4809_v20, %v4177_v30  ;;  %v4894_v30 = vld [vmem:[%s7397_s4 + $0x2f8] sm:$0xf0] }
 0x34b   :  { %v1773_v31 = vadd.f32 %v1772_v48, %v6250_v21  ;;  %v4101_v21 = vld [vmem:[%s7391_s2 + $0x428] sm:$0xf0]  ;;  %2061 = vmatpush.bf16.msrb.mxu1 %v4112_v42  ;;  %2034 = vmatpush.bf16.msrb.mxu0 %v4092_v0  ;;  %v4542_v27 = vor.u32 %v4900_v2, %v4541_v38  ;;  %v4893_v48 = vld [vmem:[%s7397_s4 + $0x2f0] sm:$0xf0]  ;;  %v4261_v42 = vld [vmem:[%s7397_s4 + $0xe0] sm:$0xf] }
 0x34c   :  { %1902 = vmatmul.bf16.gmra.mxu3 %v1817_v45  ;;  %v4104_v29 = vor.u32 %v4787_v8, %v4101_v21  ;;  %v4848_v45 = vld [vmem:[%s7397_s4 + $0x18c] sm:$0xf]  ;;  %2834 = vmatpush.bf16.msrb.mxu2 %v4318_v33  ;;  %v4571_v8 = vld [vmem:[%s7397_s4 + $0x364] sm:$0xf0]  ;;  %v4514_v21 = vor.u32 %v4893_v48, %v4513_v55  ;;  %v4319_v57 = vld [vmem:[%s7397_s4 + $0x16c] sm:$0xf0]  ;;  %v4262_v1 = vor.u32 %v4830_v9, %v4261_v42 }
 0x34d   :  { %v1789_v54 = vmul.f32 1.442695, %v1773_v31  ;;  %3254 = vst [vmem:[%s7395_s6 + $0x78] sm:$0xff] %v1773_v31  ;;  %v4924_v7 = vpop.eup %4923  ;;  %v4347_v31 = vld [vmem:[%s7397_s4 + $0x1a4] sm:$0xf0]  ;;  %2863 = vmatpush.bf16.msrb.mxu3 %v4542_v27 }
 0x34e   :  { %v1805_v41 = vmul.f32 %v4924_v7, %v1797_v5  ;;  %v4350_v3 = vor.u32 %v4848_v45, %v4347_v31  ;;  %v4485_v5 = vld [vmem:[%s7397_s4 + $0x2a0] sm:$0xf]  ;;  %v4897_v0 = vld [vmem:[%s7397_s4 + $0x314] sm:$0xf]  ;;  %v4235_v55 = vld [vmem:[%s7397_s4 + $0xc4] sm:$0xf0] }
 0x34f   :  { %4925 = vpow2.f32 %v1789_v54  ;;  %2062 = vmatpush.bf16.msrb.mxu1 %v4104_v29  ;;  %v4574_v29 = vor.u32 %v4904_v28, %v4571_v8  ;;  %v4876_v48 = vld [vmem:[%s7397_s4 + $0x26c] sm:$0xf]  ;;  %v4238_v45 = vor.u32 %v4820_v10, %v4235_v55  ;;  %v4207_v42 = vld [vmem:[%s7397_s4 + $0x8c] sm:$0xf0]  ;;  %v4401_v28 = vld [vmem:[%s7397_s4 + $0x1f8] sm:$0xf] }
 0x350   :  { %v1813_v11 = vadd.f32 %v1805_v41, %v6321_v14  ;;  %v4784_v14 = vld [vmem:[%s7391_s2 + $0x404] sm:$0xf0]  ;;  %v4543_v41 = vld [vmem:[%s7397_s4 + $0x32c] sm:$0xf0]  ;;  %2835 = vmatpush.bf16.msrb.mxu2 %v4290_v26  ;;  %v4813_v26 = vld [vmem:[%s7397_s4 + $0x74] sm:$0xf] }
 0x351   :  { %v4084_v24 = vor.u32 %v4784_v14, %v4083_v15  ;;  %v4515_v15 = vld [vmem:[%s7397_s4 + $0x2f4] sm:$0xf0]  ;;  %2864 = vmatpush.bf16.msrb.mxu3 %v4514_v21  ;;  %v4865_v8 = vld [vmem:[%s7397_s4 + $0x210] sm:$0xf0]  ;;  %v4431_v21 = vld [vmem:[%s7397_s4 + $0x24c] sm:$0xf0] }
 0x352   :  { %v4402_v9 = vor.u32 %v4865_v8, %v4401_v28  ;;  %v4849_v8 = vld [vmem:[%s7397_s4 + $0x194] sm:$0xf] }
 0x353   :  { %2063 = vmatpush.bf16.msrb.mxu1 %v4096_v17  ;;  %2035 = vmatpush.bf16.msrb.mxu0 %v4084_v24  ;;  %v4233_v24 = vld [vmem:[%s7397_s4 + $0xa8] sm:$0xf] }
 0x354   :  { %2836 = vmatpush.bf16.msrb.mxu2 %v4262_v1 }
 0x355   :  { %v4926_v4 = vpop.eup %4925 }
 0x356   :  { %v1806_v60 = vmul.f32 %v4926_v4, %v1798_v63  ;;  %v4322_v63 = vor.u32 %v4841_v39, %v4319_v57  ;;  %v4149_v39 = vld [vmem:[%s7397_s4] sm:$0xf]  ;;  %v4802_v57 = vld [vmem:[%s7397_s4 + $0x18] sm:$0xf0] }
 0x357   :  { %2064 = vmatpush.bf16.msrb.mxu1 %v4088_v62  ;;  %2891 = vmatpush.bf16.msra.mxu0 %v4350_v3  ;;  %v4457_v62 = vld [vmem:[%s7397_s4 + $0x268] sm:$0xf]  ;;  %v4869_v3 = vld [vmem:[%s7397_s4 + $0x234] sm:$0xf] }
 0x358   :  { %v1814_v6 = vadd.f32 %v1806_v60, %v1744_v16  ;;  %v4886_v60 = vld [vmem:[%s7397_s4 + $0x2b8] sm:$0xf0] }
 0x359   :  { %v4486_v49 = vor.u32 %v4886_v60, %v4485_v5  ;;  %v4806_v5 = vld [vmem:[%s7397_s4 + $0x3c] sm:$0xf] }
 0x35a   :  { %v1818_v13 = vpack.c.bf16 %v1814_v6, %v1813_v11  ;;  %v4546_v11 = vor.u32 %v4897_v0, %v4543_v41  ;;  %v4834_v6 = vld [vmem:[%s7397_s4 + $0x11c] sm:$0xf] }
 0x35b   :  { %2920 = vmatpush.bf16.msra.mxu1 %v4574_v29  ;;  %2892 = vmatpush.bf16.msra.mxu0 %v4322_v63  ;;  %v4434_v29 = vor.u32 %v4869_v3, %v4431_v21  ;;  %v4179_v63 = vld [vmem:[%s7397_s4 + $0x54] sm:$0xf0]  ;;  %v4862_v0 = vld [vmem:[%s7397_s4 + $0x1fc] sm:$0xf]  ;;  %v4887_v3 = vld [vmem:[%s7397_s4 + $0x2c0] sm:$0xf0] }
 0x35c   :  { %1907 = vmatmul.bf16.gmra.mxu3 %v1818_v13  ;;  %v4291_v13 = vld [vmem:[%s7397_s4 + $0x134] sm:$0xf0]  ;;  %v4182_v41 = vor.u32 %v4806_v5, %v4179_v63  ;;  %v4905_v21 = vld [vmem:[%s7397_s4 + $0x354] sm:$0xf]  ;;  %v4824_v5 = vld [vmem:[%s7397_s4 + $0xc8] sm:$0xf0] }
 0x35d   :  { %2865 = vmatpush.bf16.msrb.mxu3 %v4486_v49  ;;  %v4852_v49 = vld [vmem:[%s7397_s4 + $0x1a8] sm:$0xf0] }
 0x35f   :  { %2921 = vmatpush.bf16.msra.mxu1 %v4546_v11  ;;  %v4373_v11 = vld [vmem:[%s7397_s4 + $0x1c0] sm:$0xf] }
 0x3af   :  { %v1893_v36 = vpop.f32.mrf.mxu3 }
 0x3b0   :  { %v1894_v34 = vadd.f32 %v1893_v36, %v6443_v22  ;;  %v4294_v36 = vor.u32 %v4834_v6, %v4291_v13  ;;  %v4858_v6 = vld [vmem:[%s7397_s4 + $0x1d8] sm:$0xf0]  ;;  %v4799_v13 = vld [vmem:[%s7397_s4 + $0x4] sm:$0xf] }
 0x3b1   :  { %v4374_v1 = vor.u32 %v4858_v6, %v4373_v11  ;;  %v4465_v11 = vld [vmem:[%s7397_s4 + $0x270] sm:$0xf]  ;;  %v4880_v6 = vld [vmem:[%s7397_s4 + $0x288] sm:$0xf0] }
 0x3b2   :  { %v1913_v32 = vmax.f32 %v1894_v34, 0.0  ;;  %2893 = vmatpush.bf16.msra.mxu0 %v4294_v36  ;;  %v4577_v36 = vld [vmem:[%s7397_s4 + $0x350] sm:$0xf] }
 0x3b7   :  { %v1895_v23 = vpop.f32.mrf.mxu3 }
 0x3b8   :  { %v1896_v58 = vadd.f32 %v1895_v23, %v6443_v22  ;;  %v4879_v23 = vld [vmem:[%s7397_s4 + $0x280] sm:$0xf0] }
 0x3ba   :  { %v1914_v40 = vmax.f32 %v1896_v58, 0.0  ;;  %v4518_v58 = vor.u32 %v4890_v61, %v4515_v15  ;;  %v4151_v61 = vld [vmem:[%s7397_s4 + $0x1c] sm:$0xf0]  ;;  %v4855_v15 = vld [vmem:[%s7397_s4 + $0x1c4] sm:$0xf] }
 0x3bc   :  { %v1921_v37 = vpack.c.bf16 %v1914_v40, %v1913_v32  ;;  %v4827_v32 = vld [vmem:[%s7397_s4 + $0xe4] sm:$0xf]  ;;  %v4263_v40 = vld [vmem:[%s7397_s4 + $0xfc] sm:$0xf0]  ;;  %2922 = vmatpush.bf16.msra.mxu1 %v4518_v58 }
 0x3be   :  { %2036 = vmatmul.bf16.vlgmr.msrb.gmra.mxu0 %v1921_v37  ;;  %2065 = vmatmul.bf16.vlgmr.msrb.gmra.mxu1 %v1921_v37  ;;  %v4234_v37 = vor.u32 %v4823_v25, %v4233_v24  ;;  %v4353_v25 = vld [vmem:[%s7397_s4 + $0x190] sm:$0xf] }
 0x3bf   :  { %v1898_v35 = vpop.f32.mrf.mxu3 }
 0x3c0   :  { %v1899_v47 = vadd.f32 %v1898_v35, %v6443_v22  ;;  %v4883_v35 = vld [vmem:[%s7397_s4 + $0x2a4] sm:$0xf]  ;;  %2837 = vmatpush.bf16.msrb.mxu2 %v4234_v37  ;;  %v4549_v37 = vld [vmem:[%s7397_s4 + $0x318] sm:$0xf] }
 0x3c2   :  { %v1915_v52 = vmax.f32 %v1899_v47, 0.0  ;;  %v4487_v47 = vld [vmem:[%s7397_s4 + $0x2bc] sm:$0xf0] }
 0x3c3   :  { %v4490_v51 = vor.u32 %v4883_v35, %v4487_v47  ;;  %v4901_v35 = vld [vmem:[%s7397_s4 + $0x330] sm:$0xf0] }
 0x3c4   :  { %v4550_v47 = vor.u32 %v4901_v35, %v4549_v37 }
 0x3c5   :  { %2923 = vmatpush.bf16.msra.mxu1 %v4490_v51 }
 0x3c7   :  { %v1900_v53 = vpop.f32.mrf.mxu3 }
 0x3c8   :  { %v1901_v19 = vadd.f32 %v1900_v53, %v6443_v22  ;;  %v4205_v53 = vld [vmem:[%s7397_s4 + $0x70] sm:$0xf] }
 0x3ca   :  { %v1916_v56 = vmax.f32 %v1901_v19, 0.0  ;;  %v4816_v19 = vld [vmem:[%s7397_s4 + $0x88] sm:$0xf0] }
 0x3cc   :  { %v1922_v12 = vpack.c.bf16 %v1916_v56, %v1915_v52  ;;  %v4458_v56 = vor.u32 %v4879_v23, %v4457_v62  ;;  %v4354_v62 = vor.u32 %v4852_v49, %v4353_v25  ;;  %v4325_v23 = vld [vmem:[%s7397_s4 + $0x158] sm:$0xf]  ;;  %v4835_v49 = vld [vmem:[%s7397_s4 + $0x124] sm:$0xf] }
 0x3ce   :  { %2041 = vmatmul.bf16.gmra.mxu0 %v1922_v12  ;;  %2070 = vmatmul.bf16.gmra.mxu1 %v1922_v12  ;;  %v4266_v12 = vor.u32 %v4827_v32, %v4263_v40  ;;  %v4845_v32 = vld [vmem:[%s7397_s4 + $0x170] sm:$0xf0] }
 0x3cf   :  { %v1903_v16 = vpop.f32.mrf.mxu3  ;;  %2866 = vmatpush.bf16.msrb.mxu3 %v4458_v56  ;;  %v4326_v40 = vor.u32 %v4845_v32, %v4325_v23  ;;  %v4297_v56 = vld [vmem:[%s7397_s4 + $0x120] sm:$0xf] }
 0x3d0   :  { %v1904_v54 = vadd.f32 %v1903_v16, %v6443_v22  ;;  %v4206_v16 = vor.u32 %v4816_v19, %v4205_v53  ;;  %2894 = vmatpush.bf16.msra.mxu0 %v4266_v12  ;;  %v4080_v53 = vld [vmem:[%s7393_s5 + $0x5] ss:$8 sm:$0x3]  ;;  %v4838_v12 = vld [vmem:[%s7397_s4 + $0x138] sm:$0xf0] }
 0x3d1   :  { %v4298_v46 = vor.u32 %v4838_v12, %v4297_v56  ;;  %v6678_v18 = vperm.slane %v4080_v53, 0  ;;  %v6680_v51 = vperm.slane %v4080_v53, 1  ;;  %v4884_v56 = vld [vmem:[%s7397_s4 + $0x2ac] sm:$0xf] }
 0x3d2   :  { %v1917_v17 = vmax.f32 %v1904_v54, 0.0  ;;  %2838 = vmatpush.bf16.msrb.mxu2 %v4206_v16  ;;  %v4210_v54 = vor.u32 %v4813_v26, %v4207_v42  ;;  %v4521_v16 = vld [vmem:[%s7397_s4 + $0x2e0] sm:$0xf]  ;;  %v4493_v42 = vld [vmem:[%s7397_s4 + $0x2a8] sm:$0xf] }
 0x3d3   :  { %2867 = vmatpush.bf16.msrb.mxu3 %v4430_v59  ;;  %v4522_v20 = vor.u32 %v4894_v30, %v4521_v16  ;;  %v4269_v59 = vld [vmem:[%s7397_s4 + $0xe8] sm:$0xf]  ;;  %v4494_v28 = vor.u32 %v4887_v3, %v4493_v42  ;;  %v4185_v42 = vld [vmem:[%s7397_s4 + $0x40] sm:$0xf]  ;;  %v4810_v3 = vld [vmem:[%s7397_s4 + $0x58] sm:$0xf0] }
 0x3d4   :  { %2895 = vmatpush.bf16.msra.mxu0 %v4238_v45 }
 0x3d6   :  { %2839 = vmatpush.bf16.msrb.mxu2 %v4178_v50  ;;  %v4831_v50 = vld [vmem:[%s7397_s4 + $0x100] sm:$0xf0] }
 0x3d7   :  { %v1905_v7 = vpop.f32.mrf.mxu3  ;;  %2868 = vmatpush.bf16.msrb.mxu3 %v4402_v9 }
 0x3d8   :  { %v1906_v4 = vadd.f32 %v1905_v7, %v6443_v22  ;;  %2896 = vmatpush.bf16.msra.mxu0 %v4210_v54  ;;  %v4150_v7 = vor.u32 %v4802_v57, %v4149_v39  ;;  %v4355_v54 = vld [vmem:[%s7397_s4 + $0x1ac] sm:$0xf0] }
 0x3d9   :  { %v4358_v9 = vor.u32 %v4849_v8, %v4355_v54  ;;  %v4186_v8 = vor.u32 %v4810_v3, %v4185_v42 }
 0x3da   :  { %v1918_v14 = vmax.f32 %v1906_v4, 0.0  ;;  %2840 = vmatpush.bf16.msrb.mxu2 %v4150_v7  ;;  %v4403_v4 = vld [vmem:[%s7397_s4 + $0x214] sm:$0xf0]  ;;  %v4241_v7 = vld [vmem:[%s7397_s4 + $0xb0] sm:$0xf] }
 0x3db   :  { %v4406_v60 = vor.u32 %v4862_v0, %v4403_v4  ;;  %2869 = vmatpush.bf16.msrb.mxu3 %v4374_v1  ;;  %v4242_v0 = vor.u32 %v4824_v5, %v4241_v7  ;;  %v4327_v4 = vld [vmem:[%s7397_s4 + $0x174] sm:$0xf0]  ;;  %v4466_v1 = vor.u32 %v4880_v6, %v4465_v11  ;;  %v4870_v7 = vld [vmem:[%s7397_s4 + $0x23c] sm:$0xf]  ;;  %v4381_v6 = vld [vmem:[%s7397_s4 + $0x1c8] sm:$0xf] }
 0x3dc   :  { %v1923_v34 = vpack.c.bf16 %v1918_v14, %v1917_v17  ;;  %2897 = vmatpush.bf16.msra.mxu0 %v4182_v41  ;;  %v4375_v17 = vld [vmem:[%s7397_s4 + $0x1dc] sm:$0xf0]  ;;  %v4154_v14 = vor.u32 %v4799_v13, %v4151_v61  ;;  %v4842_v41 = vld [vmem:[%s7397_s4 + $0x15c] sm:$0xf]  ;;  %v4551_v61 = vld [vmem:[%s7397_s4 + $0x334] sm:$0xf0] }
 0x3dd   :  { %v4378_v24 = vor.u32 %v4855_v15, %v4375_v17  ;;  %v4330_v13 = vor.u32 %v4842_v41, %v4327_v4  ;;  %v4213_v15 = vld [vmem:[%s7397_s4 + $0x78] sm:$0xf]  ;;  %v4817_v17 = vld [vmem:[%s7397_s4 + $0x90] sm:$0xf0]  ;;  %v4807_v41 = vld [vmem:[%s7397_s4 + $0x44] sm:$0xf] }
 0x3de   :  { %2046 = vmatmul.bf16.gmra.mxu0 %v1923_v34  ;;  %2075 = vmatmul.bf16.gmra.mxu1 %v1923_v34  ;;  %v4908_v34 = vld [vmem:[%s7397_s4 + $0x368] sm:$0xf0]  ;;  %v4214_v25 = vor.u32 %v4817_v17, %v4213_v15  ;;  %v4439_v5 = vld [vmem:[%s7397_s4 + $0x254] sm:$0xf0]  ;;  %v4411_v15 = vld [vmem:[%s7397_s4 + $0x21c] sm:$0xf0] }
 0x3df   :  { %v1908_v52 = vpop.f32.mrf.mxu3  ;;  %2949 = vmatpush.bf16.msra.mxu2 %v4354_v62  ;;  %v4578_v58 = vor.u32 %v4908_v34, %v4577_v36  ;;  %v4299_v62 = vld [vmem:[%s7397_s4 + $0x13c] sm:$0xf0]  ;;  %v4891_v36 = vld [vmem:[%s7397_s4 + $0x2e4] sm:$0xf]  ;;  %v4442_v11 = vor.u32 %v4870_v7, %v4439_v5  ;;  %v4529_v5 = vld [vmem:[%s7397_s4 + $0x2e8] sm:$0xf] }
 0x3e0   :  { %v1909_v43 = vadd.f32 %v1908_v52, %v6443_v22  ;;  %2898 = vmatpush.bf16.msra.mxu0 %v4154_v14  ;;  %v4302_v23 = vor.u32 %v4835_v49, %v4299_v62  ;;  %v4159_v49 = vld [vmem:[%s7397_s4 + $0x24] sm:$0xf0] }
 0x3e1   :  { %2978 = vmatpush.bf16.msra.mxu3 %v4578_v58  ;;  %v4523_v58 = vld [vmem:[%s7397_s4 + $0x2fc] sm:$0xf0] }
 0x3e2   :  { %v1919_v33 = vmax.f32 %v1909_v43, 0.0  ;;  %v4270_v43 = vor.u32 %v4831_v50, %v4269_v59  ;;  %v4526_v37 = vor.u32 %v4891_v36, %v4523_v58 }
 0x3e3   :  { %2950 = vmatpush.bf16.msra.mxu2 %v4326_v40 }
 0x3e4   :  { %3007 = vmatpush.bf16.msrb.mxu0 %v4358_v9  ;;  %v4814_v9 = vld [vmem:[%s7397_s4 + $0x7c] sm:$0xf] }
 0x3e5   :  { %2979 = vmatpush.bf16.msra.mxu3 %v4550_v47 }
 0x3e7   :  { %v1910_v38 = vpop.f32.mrf.mxu3  ;;  %2951 = vmatpush.bf16.msra.mxu2 %v4298_v46 }
 0x3e8   :  { %v1911_v2 = vadd.f32 %v1910_v38, %v6443_v22  ;;  %v4459_v22 = vld [vmem:[%s7397_s4 + $0x284] sm:$0xf0]  ;;  %3008 = vmatpush.bf16.msrb.mxu0 %v4330_v13  ;;  %v4859_v13 = vld [vmem:[%s7397_s4 + $0x1e0] sm:$0xf0] }
 0x3e9   :  { %v4462_v31 = vor.u32 %v4876_v48, %v4459_v22  ;;  %2980 = vmatpush.bf16.msra.mxu3 %v4522_v20  ;;  %v4495_v20 = vld [vmem:[%s7397_s4 + $0x2c4] sm:$0xf0]  ;;  %v4382_v17 = vor.u32 %v4859_v13, %v4381_v6  ;;  %v4888_v6 = vld [vmem:[%s7397_s4 + $0x2c8] sm:$0xf0] }
 0x3ea   :  { %v1920_v27 = vmax.f32 %v1911_v2, 0.0 }
 0x3eb   :  { %2924 = vmatpush.bf16.msra.mxu1 %v4462_v31  ;;  %2952 = vmatpush.bf16.msra.mxu2 %v4270_v43  ;;  %v4437_v43 = vld [vmem:[%s7397_s4 + $0x238] sm:$0xf] }
 0x3ec   :  { %v1924_v44 = vpack.c.bf16 %v1920_v27, %v1919_v33  ;;  %3009 = vmatpush.bf16.msrb.mxu0 %v4302_v23 }
 0x3ed   :  { %2981 = vmatpush.bf16.msra.mxu3 %v4494_v28  ;;  %v4409_v28 = vld [vmem:[%s7397_s4 + $0x200] sm:$0xf] }
 0x3ee   :  { %2051 = vmatmul.bf16.gmra.mxu0 %v1924_v44  ;;  %2080 = vmatmul.bf16.gmra.mxu1 %v1924_v44 }
 0x3ef   :  { %2925 = vmatpush.bf16.msra.mxu1 %v4434_v29  ;;  %v4579_v29 = vld [vmem:[%s7397_s4 + $0x36c] sm:$0xf0]  ;;  %2953 = vmatpush.bf16.msra.mxu2 %v4242_v0  ;;  %v4803_v0 = vld [vmem:[%s7397_s4 + $0x20] sm:$0xf0] }
 0x3f0   :  { %v4582_v63 = vor.u32 %v4905_v21, %v4579_v29  ;;  %v4866_v21 = vld [vmem:[%s7397_s4 + $0x218] sm:$0xf0]  ;;  %v4215_v29 = vld [vmem:[%s7397_s4 + $0x94] sm:$0xf0] }
 0x3f1   :  { %2982 = vmatpush.bf16.msra.mxu3 %v4466_v1 }
 0x3f3   :  { %2926 = vmatpush.bf16.msra.mxu1 %v4406_v60  ;;  %v4898_v60 = vld [vmem:[%s7397_s4 + $0x31c] sm:$0xf]  ;;  %2954 = vmatpush.bf16.msra.mxu2 %v4214_v25  ;;  %v4800_v25 = vld [vmem:[%s7397_s4 + $0xc] sm:$0xf] }
 0x3f7   :  { %2927 = vmatpush.bf16.msra.mxu1 %v4378_v24  ;;  %v4554_v24 = vor.u32 %v4898_v60, %v4551_v61  ;;  %2955 = vmatpush.bf16.msra.mxu2 %v4186_v8  ;;  %v4187_v60 = vld [vmem:[%s7397_s4 + $0x5c] sm:$0xf0]  ;;  %v4863_v61 = vld [vmem:[%s7397_s4 + $0x204] sm:$0xf] }
 0x3f8   :  { %v4190_v1 = vor.u32 %v4807_v41, %v4187_v60  ;;  %v4414_v58 = vor.u32 %v4863_v61, %v4411_v15  ;;  %v4277_v41 = vld [vmem:[%s7397_s4 + $0xf0] sm:$0xf]  ;;  %v4850_v61 = vld [vmem:[%s7397_s4 + $0x19c] sm:$0xf]  ;;  %v4363_v15 = vld [vmem:[%s7397_s4 + $0x1b4] sm:$0xf0] }
 0x3fb   :  { %3036 = vmatpush.bf16.msrb.mxu1 %v4582_v63  ;;  %v4157_v63 = vld [vmem:[%s7397_s4 + $0x8] sm:$0xf] }
 0x3fc   :  { %v4158_v4 = vor.u32 %v4803_v0, %v4157_v63  ;;  %v4895_v0 = vld [vmem:[%s7397_s4 + $0x300] sm:$0xf0] }
 0x3fd   :  { %v4530_v60 = vor.u32 %v4895_v0, %v4529_v5  ;;  %v4867_v5 = vld [vmem:[%s7397_s4 + $0x220] sm:$0xf0]  ;;  %v4223_v0 = vld [vmem:[%s7397_s4 + $0x9c] sm:$0xf0] }
 0x3fe   :  { %2956 = vmatpush.bf16.msra.mxu2 %v4158_v4  ;;  %v4832_v4 = vld [vmem:[%s7397_s4 + $0x108] sm:$0xf0] }
 0x3ff   :  { %3037 = vmatpush.bf16.msrb.mxu1 %v4554_v24  ;;  %v4278_v13 = vor.u32 %v4832_v4, %v4277_v41 }
 0x403   :  { %3038 = vmatpush.bf16.msrb.mxu1 %v4526_v37  ;;  %v4383_v37 = vld [vmem:[%s7397_s4 + $0x1e4] sm:$0xf0] }
 0x43b   :  { %v2037_v19 = vpop.f32.mrf.mxu0  ;;  %v2066_v52 = vpop.f32.mrf.mxu1 }
 0x43c   :  { %v2038_v38 = vadd.f32 %v2037_v19, %v6678_v18  ;;  %v2067_v2 = vadd.f32 %v2066_v52, %v6680_v51  ;;  %v4828_v19 = vld [vmem:[%s7397_s4 + $0xec] sm:$0xf]  ;;  %v4271_v52 = vld [vmem:[%s7397_s4 + $0x104] sm:$0xf0] }
 0x43d   :  { %v4274_v30 = vor.u32 %v4828_v19, %v4271_v52 }
 0x43e   :  { %v2086_v55 = vmax.f32 %v2038_v38, 0.0  ;;  %v2087_v48 = vmax.f32 %v2067_v2, 0.0  ;;  %v4873_v38 = vld [vmem:[%s7397_s4 + $0x250] sm:$0xf0]  ;;  %v4498_v2 = vor.u32 %v4884_v56, %v4495_v20 }
 0x43f   :  { %3010 = vmatpush.bf16.msrb.mxu0 %v4274_v30  ;;  %v4361_v30 = vld [vmem:[%s7397_s4 + $0x198] sm:$0xf]  ;;  %v4853_v20 = vld [vmem:[%s7397_s4 + $0x1b0] sm:$0xf0] }
 0x440   :  { %3039 = vmatpush.bf16.msrb.mxu1 %v4498_v2  ;;  %v4909_v2 = vld [vmem:[%s7397_s4 + $0x370] sm:$0xf0] }
 0x443   :  { %v2039_v33 = vpop.f32.mrf.mxu0  ;;  %v2068_v27 = vpop.f32.mrf.mxu1 }
 0x444   :  { %v2040_v44 = vadd.f32 %v2039_v33, %v6678_v18  ;;  %v2069_v10 = vadd.f32 %v2068_v27, %v6680_v51  ;;  %v4438_v33 = vor.u32 %v4873_v38, %v4437_v43  ;;  %v4821_v27 = vld [vmem:[%s7397_s4 + $0xb4] sm:$0xf]  ;;  %v4585_v43 = vld [vmem:[%s7397_s4 + $0x358] sm:$0xf]  ;;  %v4362_v38 = vor.u32 %v4853_v20, %v4361_v30  ;;  %v4892_v20 = vld [vmem:[%s7397_s4 + $0x2ec] sm:$0xf] }
 0x446   :  { %v2088_v45 = vmax.f32 %v2040_v44, 0.0  ;;  %v2089_v22 = vmax.f32 %v2069_v10, 0.0  ;;  %v4243_v44 = vld [vmem:[%s7397_s4 + $0xcc] sm:$0xf0]  ;;  %v4877_v10 = vld [vmem:[%s7397_s4 + $0x274] sm:$0xf]  ;;  %2983 = vmatpush.bf16.msra.mxu3 %v4438_v33 }
 0x447   :  { %v4333_v33 = vld [vmem:[%s7397_s4 + $0x160] sm:$0xf] }
 0x448   :  { %v6698_v31 = vpack.c.bf16 %v2088_v45, %v2086_v55  ;;  %v6700_v26 = vpack.c.bf16 %v2089_v22, %v2087_v48  ;;  %v4246_v55 = vor.u32 %v4821_v27, %v4243_v44  ;;  %v4467_v48 = vld [vmem:[%s7397_s4 + $0x28c] sm:$0xf0]  ;;  %v4846_v27 = vld [vmem:[%s7397_s4 + $0x178] sm:$0xf0]  ;;  %v4586_v44 = vor.u32 %v4909_v2, %v4585_v43  ;;  %v4531_v43 = vld [vmem:[%s7397_s4 + $0x304] sm:$0xf0] }
 0x449   :  { %v4470_v54 = vor.u32 %v4877_v10, %v4467_v48  ;;  %v4557_v10 = vld [vmem:[%s7397_s4 + $0x320] sm:$0xf]  ;;  %v4334_v48 = vor.u32 %v4846_v27, %v4333_v33  ;;  %v4874_v33 = vld [vmem:[%s7397_s4 + $0x258] sm:$0xf0]  ;;  %v4534_v27 = vor.u32 %v4892_v20, %v4531_v43  ;;  %v4847_v20 = vld [vmem:[%s7397_s4 + $0x180] sm:$0xf0] }
 0x44a   :  { %2841 = vmatmul.bf16.vlgmr.msrb.gmra.mxu2 %v6698_v31  ;;  %2870 = vmatmul.bf16.vlgmr.msrb.gmra.mxu3 %v6700_v26  ;;  %v4565_v43 = vld [vmem:[%s7397_s4 + $0x328] sm:$0xf] }
 0x44b   :  { %2899 = vmatmul.bf16.vlgmr.msra.gmra.mxu0 %v6698_v31  ;;  %2928 = vmatmul.bf16.vlgmr.msra.gmra.mxu1 %v6700_v26  ;;  %v2042_v39 = vpop.f32.mrf.mxu0  ;;  %v2071_v57 = vpop.f32.mrf.mxu1 }
 0x44c   :  { %v2043_v14 = vadd.f32 %v2042_v39, %v6678_v18  ;;  %v2072_v34 = vadd.f32 %v2071_v57, %v6680_v51  ;;  %3011 = vmatpush.bf16.msrb.mxu0 %v4246_v55  ;;  %v4410_v39 = vor.u32 %v4866_v21, %v4409_v28  ;;  %v4218_v57 = vor.u32 %v4814_v9, %v4215_v29  ;;  %v4902_v55 = vld [vmem:[%s7397_s4 + $0x338] sm:$0xf0] }
 0x44d   :  { %3040 = vmatpush.bf16.msrb.mxu1 %v4470_v54  ;;  %3065 = vmatpush.bf16.msrb.mxu2 %v4362_v38  ;;  %v4445_v38 = vld [vmem:[%s7397_s4 + $0x240] sm:$0xf] }
 0x44e   :  { %v2090_v35 = vmax.f32 %v2043_v14, 0.0  ;;  %v2091_v12 = vmax.f32 %v2072_v34, 0.0  ;;  %2984 = vmatpush.bf16.msra.mxu3 %v4410_v39 }
 0x450   :  { %3012 = vmatpush.bf16.msrb.mxu0 %v4218_v57 }
 0x451   :  { %3041 = vmatpush.bf16.msrb.mxu1 %v4442_v11  ;;  %3066 = vmatpush.bf16.msrb.mxu2 %v4334_v48  ;;  %v4501_v11 = vld [vmem:[%s7397_s4 + $0x2b0] sm:$0xf]  ;;  %v4885_v48 = vld [vmem:[%s7397_s4 + $0x2b4] sm:$0xf] }
 0x452   :  { %2985 = vmatpush.bf16.msra.mxu3 %v4382_v17  ;;  %v4906_v17 = vld [vmem:[%s7397_s4 + $0x35c] sm:$0xf] }
 0x453   :  { %v2044_v32 = vpop.f32.mrf.mxu0  ;;  %v2073_v40 = vpop.f32.mrf.mxu1 }
 0x454   :  { %v2045_v47 = vadd.f32 %v2044_v32, %v6678_v18  ;;  %v2074_v53 = vadd.f32 %v2073_v40, %v6680_v51  ;;  %3013 = vmatpush.bf16.msrb.mxu0 %v4190_v1  ;;  %v4162_v32 = vor.u32 %v4800_v25, %v4159_v49  ;;  %v4856_v40 = vld [vmem:[%s7397_s4 + $0x1cc] sm:$0xf]  ;;  %v4502_v1 = vor.u32 %v4888_v6, %v4501_v11  ;;  %v4249_v25 = vld [vmem:[%s7397_s4 + $0xb8] sm:$0xf]  ;;  %v4825_v49 = vld [vmem:[%s7397_s4 + $0xd0] sm:$0xf0] }
 0x455   :  { %3042 = vmatpush.bf16.msrb.mxu1 %v4414_v58  ;;  %v4843_v58 = vld [vmem:[%s7397_s4 + $0x164] sm:$0xf]  ;;  %v4447_v11 = vld [vmem:[%s7397_s4 + $0x25c] sm:$0xf0]  ;;  %v4165_v6 = vld [vmem:[%s7397_s4 + $0x10] sm:$0xf] }
 0x456   :  { %v2092_v46 = vmax.f32 %v2045_v47, 0.0  ;;  %v2093_v16 = vmax.f32 %v2074_v53, 0.0  ;;  %3094 = vmatpush.bf16.msrb.mxu3 %v4586_v44  ;;  %v4446_v44 = vor.u32 %v4874_v33, %v4445_v38 }
 0x458   :  { %v6782_v59 = vpack.c.bf16 %v2092_v46, %v2090_v35  ;;  %v6784_v50 = vpack.c.bf16 %v2093_v16, %v2091_v12  ;;  %v4386_v12 = vor.u32 %v4856_v40, %v4383_v37  ;;  %3014 = vmatpush.bf16.msrb.mxu0 %v4162_v32  ;;  %v4335_v32 = vld [vmem:[%s7397_s4 + $0x17c] sm:$0xf0] }
 0x459   :  { %v4338_v37 = vor.u32 %v4843_v58, %v4335_v32  ;;  %v4167_v58 = vld [vmem:[%s7397_s4 + $0x2c] sm:$0xf0]  ;;  %v4857_v32 = vld [vmem:[%s7397_s4 + $0x1d4] sm:$0xf] }
 0x45a   :  { %2846 = vmatmul.bf16.gmra.mxu2 %v6782_v59  ;;  %2875 = vmatmul.bf16.gmra.mxu3 %v6784_v50 }
 0x45b   :  { %2904 = vmatmul.bf16.gmra.mxu0 %v6782_v59  ;;  %2933 = vmatmul.bf16.gmra.mxu1 %v6784_v50  ;;  %v2047_v45 = vpop.f32.mrf.mxu0  ;;  %v2076_v22 = vpop.f32.mrf.mxu1 }
 0x45c   :  { %v2048_v14 = vadd.f32 %v2047_v45, %v6678_v18  ;;  %v2077_v24 = vadd.f32 %v2076_v22, %v6680_v51  ;;  %3043 = vmatpush.bf16.msrb.mxu1 %v4386_v12  ;;  %v4558_v45 = vor.u32 %v4902_v55, %v4557_v10  ;;  %v4818_v12 = vld [vmem:[%s7397_s4 + $0x98] sm:$0xf0]  ;;  %v4829_v10 = vld [vmem:[%s7397_s4 + $0xf4] sm:$0xf]  ;;  %v4279_v55 = vld [vmem:[%s7397_s4 + $0x10c] sm:$0xf0] }
 0x45e   :  { %v2094_v35 = vmax.f32 %v2048_v14, 0.0  ;;  %v2095_v47 = vmax.f32 %v2077_v24, 0.0  ;;  %3095 = vmatpush.bf16.msrb.mxu3 %v4558_v45  ;;  %v4366_v14 = vor.u32 %v4850_v61, %v4363_v15  ;;  %v4587_v24 = vld [vmem:[%s7397_s4 + $0x374] sm:$0xf0]  ;;  %v4503_v45 = vld [vmem:[%s7397_s4 + $0x2cc] sm:$0xf0] }
 0x45f   :  { %v4808_v61 = vld [vmem:[%s7397_s4 + $0x4c] sm:$0xf]  ;;  %v4195_v15 = vld [vmem:[%s7397_s4 + $0x64] sm:$0xf0] }
 0x460   :  { %3123 = vmatpush.bf16.msra.mxu0 %v4366_v14  ;;  %v4864_v14 = vld [vmem:[%s7397_s4 + $0x20c] sm:$0xf] }
 0x462   :  { %3096 = vmatpush.bf16.msrb.mxu3 %v4530_v60  ;;  %v4871_v60 = vld [vmem:[%s7397_s4 + $0x244] sm:$0xf] }
 0x463   :  { %v2049_v62 = vpop.f32.mrf.mxu0  ;;  %v2078_v36 = vpop.f32.mrf.mxu1 }
 0x464   :  { %v2050_v34 = vadd.f32 %v2049_v62, %v6678_v18  ;;  %v2079_v23 = vadd.f32 %v2078_v36, %v6680_v51  ;;  %v4590_v62 = vor.u32 %v4906_v17, %v4587_v24  ;;  %v4473_v36 = vld [vmem:[%s7397_s4 + $0x278] sm:$0xf]  ;;  %3124 = vmatpush.bf16.msra.mxu0 %v4338_v37  ;;  %v4419_v24 = vld [vmem:[%s7397_s4 + $0x224] sm:$0xf0]  ;;  %v4391_v37 = vld [vmem:[%s7397_s4 + $0x1ec] sm:$0xf0] }
 0x466   :  { %v2096_v53 = vmax.f32 %v2050_v34, 0.0  ;;  %v2097_v19 = vmax.f32 %v2079_v23, 0.0  ;;  %3097 = vmatpush.bf16.msrb.mxu3 %v4502_v1  ;;  %v4250_v34 = vor.u32 %v4825_v49, %v4249_v25  ;;  %v4881_v23 = vld [vmem:[%s7397_s4 + $0x290] sm:$0xf0]  ;;  %3152 = vmatpush.bf16.msra.mxu1 %v4590_v62  ;;  %v4804_v1 = vld [vmem:[%s7397_s4 + $0x28] sm:$0xf0]  ;;  %v4198_v49 = vor.u32 %v4808_v61, %v4195_v15 }
 0x467   :  { %v4474_v40 = vor.u32 %v4881_v23, %v4473_v36  ;;  %v4166_v17 = vor.u32 %v4804_v1, %v4165_v6  ;;  %v4389_v25 = vld [vmem:[%s7397_s4 + $0x1d0] sm:$0xf]  ;;  %v4860_v62 = vld [vmem:[%s7397_s4 + $0x1e8] sm:$0xf0]  ;;  %v4422_v36 = vor.u32 %v4864_v14, %v4419_v24  ;;  %v4801_v23 = vld [vmem:[%s7397_s4 + $0x14] sm:$0xf] }
 0x468   :  { %v6872_v52 = vpack.c.bf16 %v2096_v53, %v2094_v35  ;;  %v6874_v56 = vpack.c.bf16 %v2097_v19, %v2095_v47  ;;  %v4899_v35 = vld [vmem:[%s7397_s4 + $0x324] sm:$0xf]  ;;  %v4559_v47 = vld [vmem:[%s7397_s4 + $0x33c] sm:$0xf0] }
 0x469   :  { %v4221_v53 = vld [vmem:[%s7397_s4 + $0x80] sm:$0xf]  ;;  %v4562_v19 = vor.u32 %v4899_v35, %v4559_v47  ;;  %v4394_v35 = vor.u32 %v4857_v32, %v4391_v37 }
 0x46a   :  { %2851 = vmatmul.bf16.gmra.mxu2 %v6872_v52  ;;  %2880 = vmatmul.bf16.gmra.mxu3 %v6874_v56  ;;  %v4222_v30 = vor.u32 %v4818_v12, %v4221_v53  ;;  %v4369_v47 = vld [vmem:[%s7397_s4 + $0x1a0] sm:$0xf]  ;;  %v4854_v53 = vld [vmem:[%s7397_s4 + $0x1b8] sm:$0xf0] }
 0x46b   :  { %2909 = vmatmul.bf16.gmra.mxu0 %v6872_v52  ;;  %2938 = vmatmul.bf16.gmra.mxu1 %v6874_v56  ;;  %v2052_v46 = vpop.f32.mrf.mxu0  ;;  %v2081_v16 = vpop.f32.mrf.mxu1  ;;  %v4370_v12 = vor.u32 %v4854_v53, %v4369_v47 }
 0x46c   :  { %v2053_v22 = vadd.f32 %v2052_v46, %v6678_v18  ;;  %v2082_v42 = vadd.f32 %v2081_v16, %v6680_v51  ;;  %v4836_v46 = vld [vmem:[%s7397_s4 + $0x12c] sm:$0xf]  ;;  %v4307_v16 = vld [vmem:[%s7397_s4 + $0x144] sm:$0xf0]  ;;  %3098 = vmatpush.bf16.msrb.mxu3 %v4474_v40  ;;  %3153 = vmatpush.bf16.msra.mxu1 %v4562_v19  ;;  %v4170_v40 = vor.u32 %v4801_v23, %v4167_v58  ;;  %v4593_v19 = vld [vmem:[%s7397_s4 + $0x360] sm:$0xf] }
 0x46d   :  { %v4310_v2 = vor.u32 %v4836_v46, %v4307_v16  ;;  %v4910_v46 = vld [vmem:[%s7397_s4 + $0x378] sm:$0xf0] }
 0x46e   :  { %v2098_v21 = vmax.f32 %v2053_v22, 0.0  ;;  %v2099_v9 = vmax.f32 %v2082_v42, 0.0  ;;  %v4282_v22 = vor.u32 %v4829_v10, %v4279_v55  ;;  %v4506_v42 = vor.u32 %v4885_v48, %v4503_v45  ;;  %v4537_v10 = vld [vmem:[%s7397_s4 + $0x2f0] sm:$0xf]  ;;  %v4896_v48 = vld [vmem:[%s7397_s4 + $0x308] sm:$0xf0] }
 0x46f   :  { %3125 = vmatpush.bf16.msra.mxu0 %v4310_v2  ;;  %v4594_v16 = vor.u32 %v4910_v46, %v4593_v19  ;;  %v4903_v2 = vld [vmem:[%s7397_s4 + $0x340] sm:$0xf0]  ;;  %v4538_v45 = vor.u32 %v4896_v48, %v4537_v10 }
 0x470   :  { %3099 = vmatpush.bf16.msrb.mxu3 %v4446_v44  ;;  %3154 = vmatpush.bf16.msra.mxu1 %v4534_v27  ;;  %v4566_v33 = vor.u32 %v4903_v2, %v4565_v43  ;;  %v4313_v27 = vld [vmem:[%s7397_s4 + $0x130] sm:$0xf]  ;;  %v4840_v44 = vld [vmem:[%s7397_s4 + $0x148] sm:$0xf0] }
 0x471   :  { %v4314_v55 = vor.u32 %v4840_v44, %v4313_v27  ;;  %v4868_v27 = vld [vmem:[%s7397_s4 + $0x228] sm:$0xf0] }
 0x473   :  { %v2054_v3 = vpop.f32.mrf.mxu0  ;;  %v2083_v28 = vpop.f32.mrf.mxu1  ;;  %3126 = vmatpush.bf16.msra.mxu0 %v4282_v22  ;;  %v4145_v22 = vld [vmem:[%s7393_s5 + $0x6] ss:$8 sm:$0xf] }
 0x474   :  { %v2055_v8 = vadd.f32 %v2054_v3, %v6678_v18  ;;  %v2084_v54 = vadd.f32 %v2083_v28, %v6680_v51  ;;  %v4305_v18 = vld [vmem:[%s7397_s4 + $0x128] sm:$0xf]  ;;  %v4839_v51 = vld [vmem:[%s7397_s4 + $0x140] sm:$0xf0]  ;;  %3155 = vmatpush.bf16.msra.mxu1 %v4506_v42  ;;  %v4822_v3 = vld [vmem:[%s7397_s4 + $0xbc] sm:$0xf] }
 0x475   :  { %v4306_v63 = vor.u32 %v4839_v51, %v4305_v18  ;;  %v4251_v28 = vld [vmem:[%s7397_s4 + $0xd4] sm:$0xf0]  ;;  %v4417_v18 = vld [vmem:[%s7397_s4 + $0x208] sm:$0xf] }
 0x476   :  { %v2100_v29 = vmax.f32 %v2055_v8, 0.0  ;;  %v2101_v39 = vmax.f32 %v2084_v54, 0.0  ;;  %v4878_v8 = vld [vmem:[%s7397_s4 + $0x27c] sm:$0xf]  ;;  %v4254_v54 = vor.u32 %v4822_v3, %v4251_v28  ;;  %v4418_v41 = vor.u32 %v4867_v5, %v4417_v18  ;;  %v4285_v28 = vld [vmem:[%s7397_s4 + $0xf8] sm:$0xf] }
 0x477   :  { %3067 = vmatpush.bf16.msrb.mxu2 %v4306_v63  ;;  %v4815_v63 = vld [vmem:[%s7397_s4 + $0x84] sm:$0xf] }
 0x478   :  { %v6908_v57 = vpack.c.bf16 %v2100_v29, %v2098_v21  ;;  %v6910_v7 = vpack.c.bf16 %v2101_v39, %v2099_v9  ;;  %v4475_v21 = vld [vmem:[%s7397_s4 + $0x294] sm:$0xf0]  ;;  %v4193_v9 = vld [vmem:[%s7397_s4 + $0x48] sm:$0xf]  ;;  %v4811_v29 = vld [vmem:[%s7397_s4 + $0x60] sm:$0xf0]  ;;  %3127 = vmatpush.bf16.msra.mxu0 %v4254_v54  ;;  %v4226_v4 = vor.u32 %v4815_v63, %v4223_v0  ;;  %3100 = vmatpush.bf16.msrb.mxu3 %v4418_v41 }
 0x479   :  { %v4478_v39 = vor.u32 %v4878_v8, %v4475_v21  ;;  %v4194_v51 = vor.u32 %v4811_v29, %v4193_v9  ;;  %v4146_v42 = vld [vmem:[%s7393_s5 + $0x6] ss:$8 sm:$0xf0]  ;;  %v4509_v54 = vld [vmem:[%s7397_s4 + $0x2b8] sm:$0xf] }
 0x47a   :  { %2856 = vmatmul.bf16.gmra.mxu2 %v6908_v57  ;;  %2885 = vmatmul.bf16.gmra.mxu3 %v6910_v7  ;;  %v7142_v3 = vor.u32 %v4146_v42, %v4145_v22  ;;  %v4833_v8 = vld [vmem:[%s7397_s4 + $0x110] sm:$0xf0]  ;;  %v4257_v0 = vld [vmem:[%s7397_s4 + $0xc0] sm:$0xf]  ;;  %v4826_v41 = vld [vmem:[%s7397_s4 + $0xd8] sm:$0xf0] }
 0x47b   :  { %2914 = vmatmul.bf16.gmra.mxu0 %v6908_v57  ;;  %2943 = vmatmul.bf16.gmra.mxu1 %v6910_v7  ;;  %v4286_v21 = vor.u32 %v4833_v8, %v4285_v28  ;;  %v4889_v9 = vld [vmem:[%s7397_s4 + $0x2d0] sm:$0xf0]  ;;  %v4258_v6 = vor.u32 %v4826_v41, %v4257_v0  ;;  %v4173_v8 = vld [vmem:[%s7397_s4 + $0x18] sm:$0xf] }
 0x47c   :  { %3068 = vmatpush.bf16.msrb.mxu2 %v4278_v13  ;;  %3156 = vmatpush.bf16.msra.mxu1 %v4478_v39  ;;  %v4450_v13 = vor.u32 %v4871_v60, %v4447_v11  ;;  %v4510_v29 = vor.u32 %v4889_v9, %v4509_v54  ;;  %v7157_v39 = vperm.slane %v7142_v3, 1  ;;  %v7162_v5 = vperm.slane %v7142_v3, 0  ;;  %v4805_v54 = vld [vmem:[%s7397_s4 + $0x30] sm:$0xf0] }
 0x47d   :  { %3128 = vmatpush.bf16.msra.mxu0 %v4226_v4  ;;  %v4481_v4 = vld [vmem:[%s7397_s4 + $0x280] sm:$0xf] }
 0x480   :  { %3069 = vmatpush.bf16.msrb.mxu2 %v4250_v34  ;;  %3157 = vmatpush.bf16.msra.mxu1 %v4450_v13  ;;  %v4390_v34 = vor.u32 %v4860_v62, %v4389_v25  ;;  %v4882_v13 = vld [vmem:[%s7397_s4 + $0x298] sm:$0xf0]  ;;  %v4229_v62 = vld [vmem:[%s7397_s4 + $0x88] sm:$0xf] }
 0x481   :  { %3129 = vmatpush.bf16.msra.mxu0 %v4198_v49  ;;  %v4482_v61 = vor.u32 %v4882_v13, %v4481_v4 }
 0x482   :  { %3101 = vmatpush.bf16.msrb.mxu3 %v4390_v34  ;;  %v4453_v34 = vld [vmem:[%s7397_s4 + $0x248] sm:$0xf] }
 0x484   :  { %3070 = vmatpush.bf16.msrb.mxu2 %v4222_v30  ;;  %3158 = vmatpush.bf16.msra.mxu1 %v4422_v36  ;;  %v4341_v30 = vld [vmem:[%s7397_s4 + $0x168] sm:$0xf]  ;;  %v4819_v36 = vld [vmem:[%s7397_s4 + $0xa0] sm:$0xf0] }
 0x485   :  { %3130 = vmatpush.bf16.msra.mxu0 %v4170_v40  ;;  %v4342_v38 = vor.u32 %v4847_v20, %v4341_v30  ;;  %v4230_v32 = vor.u32 %v4819_v36, %v4229_v62  ;;  %v4875_v40 = vld [vmem:[%s7397_s4 + $0x260] sm:$0xf0]  ;;  %v4201_v30 = vld [vmem:[%s7397_s4 + $0x50] sm:$0xf]  ;;  %v4812_v20 = vld [vmem:[%s7397_s4 + $0x68] sm:$0xf0] }
 0x486   :  { %v4202_v2 = vor.u32 %v4812_v20, %v4201_v30 }
 0x488   :  { %3071 = vmatpush.bf16.msrb.mxu2 %v4194_v51  ;;  %3159 = vmatpush.bf16.msra.mxu1 %v4394_v35  ;;  %v4454_v35 = vor.u32 %v4875_v40, %v4453_v34 }
 0x48a   :  { %2957 = vmatmul.bf16.vlgmr.msra.gmra.mxu2 %v6698_v31  ;;  %2986 = vmatmul.bf16.vlgmr.msra.gmra.mxu3 %v6700_v26 }
 0x48b   :  { %3015 = vmatmul.bf16.vlgmr.msrb.gmra.mxu0 %v6698_v31  ;;  %3044 = vmatmul.bf16.vlgmr.msrb.gmra.mxu1 %v6700_v26 }
 0x48c   :  { %3072 = vmatpush.bf16.msrb.mxu2 %v4166_v17  ;;  %3210 = vmatpush.bf16.msra.mxu3 %v4594_v16 }
 0x490   :  { %3181 = vmatpush.bf16.msra.mxu2 %v4370_v12  ;;  %3211 = vmatpush.bf16.msra.mxu3 %v4566_v33  ;;  %v4425_v33 = vld [vmem:[%s7397_s4 + $0x210] sm:$0xf] }
 0x491   :  { %v4426_v10 = vor.u32 %v4868_v27, %v4425_v33 }
 0x494   :  { %3182 = vmatpush.bf16.msra.mxu2 %v4342_v38  ;;  %3212 = vmatpush.bf16.msra.mxu3 %v4538_v45 }
 0x498   :  { %3183 = vmatpush.bf16.msra.mxu2 %v4314_v55  ;;  %3213 = vmatpush.bf16.msra.mxu3 %v4510_v29  ;;  %v4174_v29 = vor.u32 %v4805_v54, %v4173_v8 }
 0x49a   :  { %2962 = vmatmul.bf16.gmra.mxu2 %v6782_v59  ;;  %2991 = vmatmul.bf16.gmra.mxu3 %v6784_v50 }
 0x49b   :  { %3020 = vmatmul.bf16.gmra.mxu0 %v6782_v59  ;;  %3049 = vmatmul.bf16.gmra.mxu1 %v6784_v50 }
 0x49c   :  { %3184 = vmatpush.bf16.msra.mxu2 %v4286_v21  ;;  %3214 = vmatpush.bf16.msra.mxu3 %v4482_v61 }
 0x4a0   :  { %3185 = vmatpush.bf16.msra.mxu2 %v4258_v6  ;;  %3215 = vmatpush.bf16.msra.mxu3 %v4454_v35 }
 0x4a4   :  { %3186 = vmatpush.bf16.msra.mxu2 %v4230_v32  ;;  %3216 = vmatpush.bf16.msra.mxu3 %v4426_v10 }
 0x4a8   :  { %3187 = vmatpush.bf16.msra.mxu2 %v4202_v2 }
 0x4aa   :  { %2967 = vmatmul.bf16.gmra.mxu2 %v6872_v52  ;;  %2996 = vmatmul.bf16.gmra.mxu3 %v6874_v56 }
 0x4ab   :  { %3025 = vmatmul.bf16.gmra.mxu0 %v6872_v52  ;;  %3054 = vmatmul.bf16.gmra.mxu1 %v6874_v56 }
 0x4ac   :  { %3188 = vmatpush.bf16.msra.mxu2 %v4174_v29 }
 0x4ba   :  { %2972 = vmatmul.bf16.gmra.mxu2 %v6908_v57  ;;  %3001 = vmatmul.bf16.gmra.mxu3 %v6910_v7 }
 0x4bb   :  { %3030 = vmatmul.bf16.gmra.mxu0 %v6908_v57  ;;  %3059 = vmatmul.bf16.gmra.mxu1 %v6910_v7 }
 0x4c8   :  { %v2900_v18 = vpop.f32.mrf.mxu0  ;;  %v2929_v51 = vpop.f32.mrf.mxu1 }
 0x4c9   :  { %v2901_v63 = vadd.f32 %v2900_v18, %v7157_v39  ;;  %v4397_v18 = vld [vmem:[%s7397_s4 + $0x1d8] sm:$0xf] }
 0x4ca   :  { %3073 = vmatmul.bf16.vlgmr.msrb.gmra.mxu2 %v6698_v31  ;;  %3102 = vmatmul.bf16.vlgmr.msrb.gmra.mxu3 %v6700_v26 }
 0x4cb   :  { %3131 = vmatmul.bf16.vlgmr.msra.gmra.mxu0 %v6698_v31  ;;  %3160 = vmatmul.bf16.vlgmr.msra.gmra.mxu1 %v6700_v26  ;;  %v2930_v15 = vadd.f32 %v2929_v51, %v2901_v63  ;;  %v4861_v51 = vld [vmem:[%s7397_s4 + $0x1f0] sm:$0xf0] }
 0x4cc   :  { %v4398_v0 = vor.u32 %v4861_v51, %v4397_v18 }
 0x4cd   :  { %v2842_v60 = vpop.f32.mrf.mxu2  ;;  %v2871_v11 = vpop.f32.mrf.mxu3 }
 0x4ce   :  { %v2843_v1 = vadd.f32 %v2842_v60, %v7162_v5  ;;  %3217 = vmatpush.bf16.msra.mxu3 %v4398_v0 }
 0x4d0   :  { %v2872_v17 = vadd.f32 %v2871_v11, %v2843_v1  ;;  %v2902_v14 = vpop.f32.mrf.mxu0  ;;  %v2931_v24 = vpop.f32.mrf.mxu1 }
 0x4d1   :  { %v2903_v49 = vadd.f32 %v2902_v14, %v7157_v39 }
 0x4d2   :  { %v3255_v25 = vpack.c.bf16 %v2930_v15, %v2872_v17 }
 0x4d3   :  { %v2932_v47 = vadd.f32 %v2931_v24, %v2903_v49 }
 0x4d4   :  { %3287 = vst [vmem:[%s7398_s7] sm:$0xff] %v3255_v25 }
 0x4d5   :  { %v2844_v23 = vpop.f32.mrf.mxu2  ;;  %v2873_v58 = vpop.f32.mrf.mxu3 }
 0x4d6   :  { %v2845_v37 = vadd.f32 %v2844_v23, %v7162_v5 }
 0x4d8   :  { %v2874_v53 = vadd.f32 %v2873_v58, %v2845_v37  ;;  %v2905_v19 = vpop.f32.mrf.mxu0  ;;  %v2934_v12 = vpop.f32.mrf.mxu1 }
 0x4d9   :  { %v2906_v16 = vadd.f32 %v2905_v19, %v7157_v39 }
 0x4da   :  { %v3259_v46 = vpack.c.bf16 %v2932_v47, %v2874_v53  ;;  %3078 = vmatmul.bf16.gmra.mxu2 %v6782_v59  ;;  %3107 = vmatmul.bf16.gmra.mxu3 %v6784_v50 }
 0x4db   :  { %3136 = vmatmul.bf16.gmra.mxu0 %v6782_v59  ;;  %3165 = vmatmul.bf16.gmra.mxu1 %v6784_v50  ;;  %v2935_v55 = vadd.f32 %v2934_v12, %v2906_v16 }
 0x4dc   :  { %3291 = vst [vmem:[%s7398_s7 + $0x1c] sm:$0xff] %v3259_v46 }
 0x4dd   :  { %v2847_v43 = vpop.f32.mrf.mxu2  ;;  %v2876_v38 = vpop.f32.mrf.mxu3 }
 0x4de   :  { %v2848_v44 = vadd.f32 %v2847_v43, %v7162_v5 }
 0x4e0   :  { %v2877_v48 = vadd.f32 %v2876_v38, %v2848_v44  ;;  %v2907_v45 = vpop.f32.mrf.mxu0  ;;  %v2936_v22 = vpop.f32.mrf.mxu1 }
 0x4e1   :  { %v2908_v28 = vadd.f32 %v2907_v45, %v7157_v39 }
 0x4e2   :  { %v3263_v42 = vpack.c.bf16 %v2935_v55, %v2877_v48  ;;  %v7264_v55 = vperm.slane %v7142_v3, 3 }
 0x4e3   :  { %v2937_v41 = vadd.f32 %v2936_v22, %v2908_v28 }
 0x4e4   :  { %3295 = vst [vmem:[%s7398_s7 + $0x38] sm:$0xff] %v3263_v42  ;;  %v7269_v42 = vperm.slane %v7142_v3, 2 }
 0x4e5   :  { %v2849_v21 = vpop.f32.mrf.mxu2  ;;  %v2878_v9 = vpop.f32.mrf.mxu3 }
 0x4e6   :  { %v2850_v63 = vadd.f32 %v2849_v21, %v7162_v5 }
 0x4e8   :  { %v2879_v4 = vadd.f32 %v2878_v9, %v2850_v63  ;;  %v2910_v60 = vpop.f32.mrf.mxu0  ;;  %v2939_v11 = vpop.f32.mrf.mxu1 }
 0x4e9   :  { %v2911_v13 = vadd.f32 %v2910_v60, %v7157_v39 }
 0x4ea   :  { %v3267_v6 = vpack.c.bf16 %v2937_v41, %v2879_v4  ;;  %3083 = vmatmul.bf16.gmra.mxu2 %v6872_v52  ;;  %3112 = vmatmul.bf16.gmra.mxu3 %v6874_v56 }
 0x4eb   :  { %3141 = vmatmul.bf16.gmra.mxu0 %v6872_v52  ;;  %3170 = vmatmul.bf16.gmra.mxu1 %v6874_v56  ;;  %v2940_v17 = vadd.f32 %v2939_v11, %v2911_v13 }
 0x4ec   :  { %3299 = vst [vmem:[%s7398_s7 + $0x54] sm:$0xff] %v3267_v6 }
 0x4ed   :  { %v2852_v1 = vpop.f32.mrf.mxu2  ;;  %v2881_v61 = vpop.f32.mrf.mxu3 }
 0x4ee   :  { %v2853_v15 = vadd.f32 %v2852_v1, %v7162_v5 }
 0x4f0   :  { %v2882_v14 = vadd.f32 %v2881_v61, %v2853_v15  ;;  %v2912_v24 = vpop.f32.mrf.mxu0  ;;  %v2941_v25 = vpop.f32.mrf.mxu1 }
 0x4f1   :  { %v2913_v62 = vadd.f32 %v2912_v24, %v7157_v39 }
 0x4f2   :  { %v3271_v49 = vpack.c.bf16 %v2940_v17, %v2882_v14 }
 0x4f3   :  { %v2942_v58 = vadd.f32 %v2941_v25, %v2913_v62 }
 0x4f4   :  { %3303 = vst [vmem:[%s7398_s7 + $0x70] sm:$0xff] %v3271_v49 }
 0x4f5   :  { %v2854_v36 = vpop.f32.mrf.mxu2  ;;  %v2883_v34 = vpop.f32.mrf.mxu3 }
 0x4f6   :  { %v2855_v23 = vadd.f32 %v2854_v36, %v7162_v5 }
 0x4f8   :  { %v2884_v32 = vadd.f32 %v2883_v34, %v2855_v23  ;;  %v2915_v40 = vpop.f32.mrf.mxu0  ;;  %v2944_v37 = vpop.f32.mrf.mxu1 }
 0x4f9   :  { %v2916_v47 = vadd.f32 %v2915_v40, %v7157_v39 }
 0x4fa   :  { %v3275_v35 = vpack.c.bf16 %v2942_v58, %v2884_v32  ;;  %3088 = vmatmul.bf16.gmra.mxu2 %v6908_v57  ;;  %3117 = vmatmul.bf16.gmra.mxu3 %v6910_v7 }
 0x4fb   :  { %3146 = vmatmul.bf16.gmra.mxu0 %v6908_v57  ;;  %3175 = vmatmul.bf16.gmra.mxu1 %v6910_v7  ;;  %v2945_v46 = vadd.f32 %v2944_v37, %v2916_v47 }
 0x4fc   :  { %3307 = vst [vmem:[%s7398_s7 + $0x8c] sm:$0xff] %v3275_v35 }
 0x4fd   :  { %v2857_v53 = vpop.f32.mrf.mxu2  ;;  %v2886_v19 = vpop.f32.mrf.mxu3 }
 0x4fe   :  { %v2858_v12 = vadd.f32 %v2857_v53, %v7162_v5 }
 0x500   :  { %v2887_v16 = vadd.f32 %v2886_v19, %v2858_v12  ;;  %v2917_v30 = vpop.f32.mrf.mxu0  ;;  %v2946_v20 = vpop.f32.mrf.mxu1 }
 0x501   :  { %v2918_v38 = vadd.f32 %v2917_v30, %v7157_v39 }
 0x502   :  { %v3279_v43 = vpack.c.bf16 %v2945_v46, %v2887_v16 }
 0x503   :  { %v2947_v44 = vadd.f32 %v2946_v20, %v2918_v38 }
 0x504   :  { %3311 = vst [vmem:[%s7398_s7 + $0xa8] sm:$0xff] %v3279_v43 }
 0x505   :  { %v2859_v2 = vpop.f32.mrf.mxu2  ;;  %v2888_v33 = vpop.f32.mrf.mxu3 }
 0x506   :  { %v2860_v27 = vadd.f32 %v2859_v2, %v7162_v5 }
 0x508   :  { %v2889_v10 = vadd.f32 %v2888_v33, %v2860_v27  ;;  %v3016_v48 = vpop.f32.mrf.mxu0  ;;  %v3045_v45 = vpop.f32.mrf.mxu1 }
 0x509   :  { %v3017_v39 = vadd.f32 %v3016_v48, %v7264_v55 }
 0x50a   :  { %v3283_v22 = vpack.c.bf16 %v2947_v44, %v2889_v10  ;;  %3189 = vmatmul.bf16.vlgmr.msra.gmra.mxu2 %v6698_v31  ;;  %3218 = vmatmul.bf16.vlgmr.msra.gmra.mxu3 %v6700_v26 }
 0x50b   :  { %v3046_v54 = vadd.f32 %v3045_v45, %v3017_v39 }
 0x50c   :  { %3315 = vst [vmem:[%s7398_s7 + $0xc4] sm:$0xff] %v3283_v22 }
 0x50d   :  { %v2958_v5 = vpop.f32.mrf.mxu2  ;;  %v2987_v28 = vpop.f32.mrf.mxu3 }
 0x50e   :  { %v2959_v8 = vadd.f32 %v2958_v5, %v7269_v42 }
 0x510   :  { %v2988_v21 = vadd.f32 %v2987_v28, %v2959_v8  ;;  %v3018_v9 = vpop.f32.mrf.mxu0  ;;  %v3047_v29 = vpop.f32.mrf.mxu1 }
 0x511   :  { %v3019_v26 = vadd.f32 %v3018_v9, %v7264_v55 }
 0x512   :  { %v3256_v31 = vpack.c.bf16 %v3046_v54, %v2988_v21 }
 0x513   :  { %v3048_v0 = vadd.f32 %v3047_v29, %v3019_v26 }
 0x514   :  { %3288 = vst [vmem:[%s7398_s7 + $0x8] sm:$0xff] %v3256_v31  ;;  %v7318_v31 = vperm.slane %v7142_v3, 5 }
 0x515   :  { %v2960_v18 = vpop.f32.mrf.mxu2  ;;  %v2989_v51 = vpop.f32.mrf.mxu3 }
 0x516   :  { %v2961_v63 = vadd.f32 %v2960_v18, %v7269_v42 }
 0x518   :  { %v2990_v41 = vadd.f32 %v2989_v51, %v2961_v63  ;;  %v3021_v4 = vpop.f32.mrf.mxu0  ;;  %v3050_v60 = vpop.f32.mrf.mxu1  ;;  %v7321_v63 = vperm.slane %v7142_v3, 4 }
 0x519   :  { %v3022_v6 = vadd.f32 %v3021_v4, %v7264_v55 }
 0x51a   :  { %v3260_v11 = vpack.c.bf16 %v3048_v0, %v2990_v41  ;;  %3194 = vmatmul.bf16.gmra.mxu2 %v6782_v59  ;;  %3223 = vmatmul.bf16.gmra.mxu3 %v6784_v50 }
 0x51b   :  { %v3051_v15 = vadd.f32 %v3050_v60, %v3022_v6 }
 0x51c   :  { %3292 = vst [vmem:[%s7398_s7 + $0x24] sm:$0xff] %v3260_v11 }
 0x51d   :  { %v2963_v13 = vpop.f32.mrf.mxu2  ;;  %v2992_v1 = vpop.f32.mrf.mxu3 }
 0x51e   :  { %v2964_v61 = vadd.f32 %v2963_v13, %v7269_v42 }
 0x520   :  { %v2993_v17 = vadd.f32 %v2992_v1, %v2964_v61  ;;  %v3023_v14 = vpop.f32.mrf.mxu0  ;;  %v3052_v24 = vpop.f32.mrf.mxu1 }
 0x521   :  { %v3024_v59 = vadd.f32 %v3023_v14, %v7264_v55 }
 0x522   :  { %v3264_v25 = vpack.c.bf16 %v3051_v15, %v2993_v17 }
 0x523   :  { %v3053_v36 = vadd.f32 %v3052_v24, %v3024_v59 }
 0x524   :  { %3296 = vst [vmem:[%s7398_s7 + $0x40] sm:$0xff] %v3264_v25 }
 0x525   :  { %v2965_v50 = vpop.f32.mrf.mxu2  ;;  %v2994_v49 = vpop.f32.mrf.mxu3 }
 0x526   :  { %v2966_v62 = vadd.f32 %v2965_v50, %v7269_v42 }
 0x528   :  { %v2995_v34 = vadd.f32 %v2994_v49, %v2966_v62  ;;  %v3026_v23 = vpop.f32.mrf.mxu0  ;;  %v3055_v58 = vpop.f32.mrf.mxu1 }
 0x529   :  { %v3027_v40 = vadd.f32 %v3026_v23, %v7264_v55 }
 0x52a   :  { %v3268_v32 = vpack.c.bf16 %v3053_v36, %v2995_v34  ;;  %3199 = vmatmul.bf16.gmra.mxu2 %v6872_v52  ;;  %3228 = vmatmul.bf16.gmra.mxu3 %v6874_v56 }
 0x52b   :  { %v3056_v53 = vadd.f32 %v3055_v58, %v3027_v40 }
 0x52c   :  { %3300 = vst [vmem:[%s7398_s7 + $0x5c] sm:$0xff] %v3268_v32 }
 0x52d   :  { %v2968_v37 = vpop.f32.mrf.mxu2  ;;  %v2997_v35 = vpop.f32.mrf.mxu3 }
 0x52e   :  { %v2969_v47 = vadd.f32 %v2968_v37, %v7269_v42 }
 0x530   :  { %v2998_v19 = vadd.f32 %v2997_v35, %v2969_v47  ;;  %v3028_v12 = vpop.f32.mrf.mxu0  ;;  %v3057_v46 = vpop.f32.mrf.mxu1 }
 0x531   :  { %v3029_v52 = vadd.f32 %v3028_v12, %v7264_v55 }
 0x532   :  { %v3272_v16 = vpack.c.bf16 %v3056_v53, %v2998_v19 }
 0x533   :  { %v3058_v43 = vadd.f32 %v3057_v46, %v3029_v52 }
 0x534   :  { %3304 = vst [vmem:[%s7398_s7 + $0x78] sm:$0xff] %v3272_v16 }
 0x535   :  { %v2970_v56 = vpop.f32.mrf.mxu2  ;;  %v2999_v30 = vpop.f32.mrf.mxu3 }
 0x536   :  { %v2971_v20 = vadd.f32 %v2970_v56, %v7269_v42 }
 0x538   :  { %v3000_v38 = vadd.f32 %v2999_v30, %v2971_v20  ;;  %v3031_v2 = vpop.f32.mrf.mxu0  ;;  %v3060_v33 = vpop.f32.mrf.mxu1 }
 0x539   :  { %v3032_v44 = vadd.f32 %v3031_v2, %v7264_v55 }
 0x53a   :  { %v3276_v27 = vpack.c.bf16 %v3058_v43, %v3000_v38  ;;  %3204 = vmatmul.bf16.gmra.mxu2 %v6908_v57  ;;  %3233 = vmatmul.bf16.gmra.mxu3 %v6910_v7 }
 0x53b   :  { %v3061_v22 = vadd.f32 %v3060_v33, %v3032_v44 }
 0x53c   :  { %3308 = vst [vmem:[%s7398_s7 + $0x94] sm:$0xff] %v3276_v27 }
 0x53d   :  { %v2973_v10 = vpop.f32.mrf.mxu2  ;;  %v3002_v48 = vpop.f32.mrf.mxu3 }
 0x53e   :  { %v2974_v45 = vadd.f32 %v2973_v10, %v7269_v42 }
 0x540   :  { %v3003_v39 = vadd.f32 %v3002_v48, %v2974_v45  ;;  %v3033_v5 = vpop.f32.mrf.mxu0  ;;  %v3062_v28 = vpop.f32.mrf.mxu1 }
 0x541   :  { %v3034_v57 = vadd.f32 %v3033_v5, %v7264_v55 }
 0x542   :  { %v3280_v8 = vpack.c.bf16 %v3061_v22, %v3003_v39 }
 0x543   :  { %v3063_v9 = vadd.f32 %v3062_v28, %v3034_v57 }
 0x544   :  { %3312 = vst [vmem:[%s7398_s7 + $0xb0] sm:$0xff] %v3280_v8 }
 0x545   :  { %v2975_v7 = vpop.f32.mrf.mxu2  ;;  %v3004_v54 = vpop.f32.mrf.mxu3 }
 0x546   :  { %v2976_v21 = vadd.f32 %v2975_v7, %v7269_v42 }
 0x548   :  { %v3005_v29 = vadd.f32 %v3004_v54, %v2976_v21  ;;  %v3132_v26 = vpop.f32.mrf.mxu0  ;;  %v3161_v18 = vpop.f32.mrf.mxu1 }
 0x549   :  { %v3133_v55 = vadd.f32 %v3132_v26, %v7318_v31 }
 0x54a   :  { %v3284_v51 = vpack.c.bf16 %v3063_v9, %v3005_v29 }
 0x54b   :  { %v3162_v4 = vadd.f32 %v3161_v18, %v3133_v55 }
 0x54c   :  { %3316 = vst [vmem:[%s7398_s7 + $0xcc] sm:$0xff] %v3284_v51 }
 0x54d   :  { %v3074_v0 = vpop.f32.mrf.mxu2  ;;  %v3103_v41 = vpop.f32.mrf.mxu3 }
 0x54e   :  { %v3075_v42 = vadd.f32 %v3074_v0, %v7321_v63 }
 0x550   :  { %v3104_v60 = vadd.f32 %v3103_v41, %v3075_v42  ;;  %v3134_v11 = vpop.f32.mrf.mxu0  ;;  %v3163_v6 = vpop.f32.mrf.mxu1 }
 0x551   :  { %v3135_v1 = vadd.f32 %v3134_v11, %v7318_v31 }
 0x552   :  { %v3257_v13 = vpack.c.bf16 %v3162_v4, %v3104_v60 }
 0x553   :  { %v3164_v14 = vadd.f32 %v3163_v6, %v3135_v1  ;;  %v2249_v1 = vperm.slane %v7142_v3, 6 }
 0x554   :  { %3289 = vst [vmem:[%s7398_s7 + $0x10] sm:$0xff] %v3257_v13 }
 0x555   :  { %v3076_v61 = vpop.f32.mrf.mxu2  ;;  %v3105_v15 = vpop.f32.mrf.mxu3 }
 0x556   :  { %v3077_v17 = vadd.f32 %v3076_v61, %v7321_v63 }
 0x558   :  { %v3106_v24 = vadd.f32 %v3105_v15, %v3077_v17  ;;  %v3137_v25 = vpop.f32.mrf.mxu0  ;;  %v3166_v59 = vpop.f32.mrf.mxu1 }
 0x559   :  { %v3138_v49 = vadd.f32 %v3137_v25, %v7318_v31 }
 0x55a   :  { %v3261_v50 = vpack.c.bf16 %v3164_v14, %v3106_v24 }
 0x55b   :  { %v3167_v23 = vadd.f32 %v3166_v59, %v3138_v49 }
 0x55c   :  { %3293 = vst [vmem:[%s7398_s7 + $0x2c] sm:$0xff] %v3261_v50 }
 0x55d   :  { %v3079_v62 = vpop.f32.mrf.mxu2  ;;  %v3108_v36 = vpop.f32.mrf.mxu3 }
 0x55e   :  { %v3080_v34 = vadd.f32 %v3079_v62, %v7321_v63 }
 0x560   :  { %v3109_v58 = vadd.f32 %v3108_v36, %v3080_v34  ;;  %v3139_v32 = vpop.f32.mrf.mxu0  ;;  %v3168_v40 = vpop.f32.mrf.mxu1 }
 0x561   :  { %v3140_v35 = vadd.f32 %v3139_v32, %v7318_v31 }
 0x562   :  { %v3265_v37 = vpack.c.bf16 %v3167_v23, %v3109_v58 }
 0x563   :  { %v3169_v12 = vadd.f32 %v3168_v40, %v3140_v35 }
 0x564   :  { %3297 = vst [vmem:[%s7398_s7 + $0x48] sm:$0xff] %v3265_v37 }
 0x565   :  { %v3081_v47 = vpop.f32.mrf.mxu2  ;;  %v3110_v53 = vpop.f32.mrf.mxu3 }
 0x566   :  { %v3082_v19 = vadd.f32 %v3081_v47, %v7321_v63 }
 0x568   :  { %v3111_v46 = vadd.f32 %v3110_v53, %v3082_v19  ;;  %v3142_v16 = vpop.f32.mrf.mxu0  ;;  %v3171_v52 = vpop.f32.mrf.mxu1 }
 0x569   :  { %v3143_v30 = vadd.f32 %v3142_v16, %v7318_v31 }
 0x56a   :  { %v3269_v56 = vpack.c.bf16 %v3169_v12, %v3111_v46 }
 0x56b   :  { %v3172_v2 = vadd.f32 %v3171_v52, %v3143_v30 }
 0x56c   :  { %3301 = vst [vmem:[%s7398_s7 + $0x64] sm:$0xff] %v3269_v56 }
 0x56d   :  { %v3084_v20 = vpop.f32.mrf.mxu2  ;;  %v3113_v43 = vpop.f32.mrf.mxu3 }
 0x56e   :  { %v3085_v38 = vadd.f32 %v3084_v20, %v7321_v63 }
 0x570   :  { %v3114_v33 = vadd.f32 %v3113_v43, %v3085_v38  ;;  %v3144_v27 = vpop.f32.mrf.mxu0  ;;  %v3173_v10 = vpop.f32.mrf.mxu1 }
 0x571   :  { %v3145_v48 = vadd.f32 %v3144_v27, %v7318_v31 }
 0x572   :  { %v3273_v44 = vpack.c.bf16 %v3172_v2, %v3114_v33 }
 0x573   :  { %v3174_v5 = vadd.f32 %v3173_v10, %v3145_v48 }
 0x574   :  { %3305 = vst [vmem:[%s7398_s7 + $0x80] sm:$0xff] %v3273_v44 }
 0x575   :  { %v3086_v45 = vpop.f32.mrf.mxu2  ;;  %v3115_v22 = vpop.f32.mrf.mxu3 }
 0x576   :  { %v3087_v39 = vadd.f32 %v3086_v45, %v7321_v63 }
 0x578   :  { %v3116_v28 = vadd.f32 %v3115_v22, %v3087_v39  ;;  %v3147_v8 = vpop.f32.mrf.mxu0  ;;  %v3176_v54 = vpop.f32.mrf.mxu1 }
 0x579   :  { %v3148_v7 = vadd.f32 %v3147_v8, %v7318_v31 }
 0x57a   :  { %v3277_v57 = vpack.c.bf16 %v3174_v5, %v3116_v28 }
 0x57b   :  { %v3177_v26 = vadd.f32 %v3176_v54, %v3148_v7 }
 0x57c   :  { %3309 = vst [vmem:[%s7398_s7 + $0x9c] sm:$0xff] %v3277_v57 }
 0x57d   :  { %v3089_v21 = vpop.f32.mrf.mxu2  ;;  %v3118_v9 = vpop.f32.mrf.mxu3 }
 0x57e   :  { %v3090_v29 = vadd.f32 %v3089_v21, %v7321_v63 }
 0x580   :  { %v3119_v18 = vadd.f32 %v3118_v9, %v3090_v29  ;;  %v3149_v51 = vpop.f32.mrf.mxu0  ;;  %v3178_v60 = vpop.f32.mrf.mxu1 }
 0x581   :  { %v3150_v0 = vadd.f32 %v3149_v51, %v7318_v31 }
 0x582   :  { %v3281_v55 = vpack.c.bf16 %v3177_v26, %v3119_v18 }
 0x583   :  { %v3179_v11 = vadd.f32 %v3178_v60, %v3150_v0 }
 0x584   :  { %3313 = vst [vmem:[%s7398_s7 + $0xb8] sm:$0xff] %v3281_v55 }
 0x585   :  { %v3091_v41 = vpop.f32.mrf.mxu2  ;;  %v3120_v42 = vpop.f32.mrf.mxu3 }
 0x586   :  { %v3092_v4 = vadd.f32 %v3091_v41, %v7321_v63 }
 0x588   :  { %v3121_v6 = vadd.f32 %v3120_v42, %v3092_v4 }
 0x58a   :  { %v3285_v13 = vpack.c.bf16 %v3179_v11, %v3121_v6 }
 0x58c   :  { %3317 = vst [vmem:[%s7398_s7 + $0xd4] sm:$0xff] %v3285_v13 }
 0x58d   :  { %v3190_v61 = vpop.f32.mrf.mxu2  ;;  %v3219_v15 = vpop.f32.mrf.mxu3 }
 0x58e   :  { %v3191_v17 = vadd.f32 %v3190_v61, %v2249_v1 }
 0x590   :  { %v3220_v14 = vadd.f32 %v3219_v15, %v3191_v17 }
 0x592   :  { %v3258_v24 = vpack.c.bf16 %v3220_v14, %v3220_v14 }
 0x594   :  { %3290 = vst [vmem:[%s7398_s7 + $0x18] sm:$0xf] %v3258_v24 }
 0x595   :  { %v3192_v31 = vpop.f32.mrf.mxu2  ;;  %v3221_v63 = vpop.f32.mrf.mxu3 }
 0x596   :  { %v3193_v25 = vadd.f32 %v3192_v31, %v2249_v1 }
 0x598   :  { %v3222_v59 = vadd.f32 %v3221_v63, %v3193_v25 }
 0x59a   :  { %v3262_v50 = vpack.c.bf16 %v3222_v59, %v3222_v59 }
 0x59c   :  { %3294 = vst [vmem:[%s7398_s7 + $0x34] sm:$0xf] %v3262_v50 }
 0x59d   :  { %v3195_v3 = vpop.f32.mrf.mxu2  ;;  %v3224_v49 = vpop.f32.mrf.mxu3 }
 0x59e   :  { %v3196_v62 = vadd.f32 %v3195_v3, %v2249_v1 }
 0x5a0   :  { %v3225_v36 = vadd.f32 %v3224_v49, %v3196_v62 }
 0x5a2   :  { %v3266_v34 = vpack.c.bf16 %v3225_v36, %v3225_v36 }
 0x5a4   :  { %3298 = vst [vmem:[%s7398_s7 + $0x50] sm:$0xf] %v3266_v34 }
 0x5a5   :  { %v3197_v23 = vpop.f32.mrf.mxu2  ;;  %v3226_v58 = vpop.f32.mrf.mxu3 }
 0x5a6   :  { %v3198_v32 = vadd.f32 %v3197_v23, %v2249_v1 }
 0x5a8   :  { %v3227_v40 = vadd.f32 %v3226_v58, %v3198_v32 }
 0x5aa   :  { %v3270_v37 = vpack.c.bf16 %v3227_v40, %v3227_v40 }
 0x5ac   :  { %3302 = vst [vmem:[%s7398_s7 + $0x6c] sm:$0xf] %v3270_v37 }
 0x5ad   :  { %v3200_v35 = vpop.f32.mrf.mxu2  ;;  %v3229_v47 = vpop.f32.mrf.mxu3 }
 0x5ae   :  { %v3201_v53 = vadd.f32 %v3200_v35, %v2249_v1 }
 0x5b0   :  { %v3230_v19 = vadd.f32 %v3229_v47, %v3201_v53 }
 0x5b2   :  { %v3274_v12 = vpack.c.bf16 %v3230_v19, %v3230_v19 }
 0x5b4   :  { %3306 = vst [vmem:[%s7398_s7 + $0x88] sm:$0xf] %v3274_v12 }
 0x5b5   :  { %v3202_v46 = vpop.f32.mrf.mxu2  ;;  %v3231_v16 = vpop.f32.mrf.mxu3 }
 0x5b6   :  { %v3203_v52 = vadd.f32 %v3202_v46, %v2249_v1 }
 0x5b8   :  { %v3232_v56 = vadd.f32 %v3231_v16, %v3203_v52 }
 0x5ba   :  { %v3278_v30 = vpack.c.bf16 %v3232_v56, %v3232_v56 }
 0x5bc   :  { %3310 = vst [vmem:[%s7398_s7 + $0xa4] sm:$0xf] %v3278_v30 }
 0x5bd   :  { %v3205_v20 = vpop.f32.mrf.mxu2  ;;  %v3234_v43 = vpop.f32.mrf.mxu3 }
 0x5be   :  { %v3206_v38 = vadd.f32 %v3205_v20, %v2249_v1 }
 0x5c0   :  { %v3235_v2 = vadd.f32 %v3234_v43, %v3206_v38 }
 0x5c2   :  { %v3282_v33 = vpack.c.bf16 %v3235_v2, %v3235_v2 }
 0x5c4   :  { %3314 = vst [vmem:[%s7398_s7 + $0xc0] sm:$0xf] %v3282_v33 }
 0x5c5   :  { %v3207_v27 = vpop.f32.mrf.mxu2  ;;  %v3236_v10 = vpop.f32.mrf.mxu3 }
 0x5c6   :  { %v3208_v44 = vadd.f32 %v3207_v27, %v2249_v1 }
 0x5c8   :  { %v3237_v48 = vadd.f32 %v3236_v10, %v3208_v44 }
 0x5ca   :  { %v3286_v45 = vpack.c.bf16 %v3237_v48, %v3237_v48 }
 0x5cc   :  { %3318 = vst [vmem:[%s7398_s7 + $0xdc] sm:$0xf] %v3286_v45 }

</bundles_post_ra>
